<compile_context>
chip_gen: v5e
topology: v5e:2x2
jax: 0.10.0
libtpu: 0.0.40
codegen_flags: <defaults>
</compile_context>

<pallas_src>
import numpy as np
import jax
import jax.numpy as jnp
from jax import lax
from jax.experimental import pallas as pl
from jax.experimental.pallas import tpu as pltpu

LANES = 128           # every kernel-side matrix is padded to this lane width
KH = KW = 5           # conv kernel size
C_IN, C1, C2 = 3, 6, 16
F1, F2, F3 = 120, 84, 10
K1 = C_IN * KH * KW   # 75: conv1 im2col contraction length


def _ceil8(n):
    return -(-n // 8) * 8


# ----------------------------------------------------------------------------
# The fused forward-pass kernel (all activations stay in VMEM).
# ----------------------------------------------------------------------------
def _lenet_kernel(p1_ref, w1_ref, b1_ref,            # conv1
                  g_ref, w2_ref, b2_ref,             # conv2 (+ row gather)
                  fs_ref, fw1_ref, fb1_ref,          # fc1 (+ flatten select)
                  fw2_ref, fb2_ref, fw3_ref, fb3_ref,
                  out_ref):
    f32 = jnp.float32
    n1p = p1_ref.shape[0] // 4        # rows per pooling-phase block, conv1
    n2p = g_ref.shape[1] // 4         # rows per pooling-phase block, conv2
    bsz = out_ref.shape[0]

    # ---- conv1 + bias + relu (im2col patches arrive phase-grouped) ---------
    y1 = jnp.dot(p1_ref[...], w1_ref[...], preferred_element_type=f32)
    y1 = jnp.maximum(y1 + b1_ref[...], 0.0)                   # (4*n1p, 128)

    # ---- pool1: 2x2/2 max == elementwise max of the 4 phase blocks ---------
    a1 = jnp.maximum(jnp.maximum(y1[0:n1p], y1[n1p:2 * n1p]),
                     jnp.maximum(y1[2 * n1p:3 * n1p], y1[3 * n1p:4 * n1p]))

    # ---- conv2: shift-and-matmul; the spatial gather is a 0/1 selection
    #      matmul so everything runs on the MXU (output rows phase-grouped). --
    def conv2_step(k, acc):
        gathered = jnp.dot(g_ref[k], a1, preferred_element_type=f32)
        return acc + jnp.dot(gathered, w2_ref[k], preferred_element_type=f32)

    acc2 = lax.fori_loop(0, KH * KW, conv2_step,
                         jnp.zeros((4 * n2p, LANES), f32))
    y2 = jnp.maximum(acc2 + b2_ref[...], 0.0)                  # (4*n2p, 128)

    # ---- pool2 --------------------------------------------------------------
    a2 = jnp.maximum(jnp.maximum(y2[0:n2p], y2[n2p:2 * n2p]),
                     jnp.maximum(y2[2 * n2p:3 * n2p], y2[3 * n2p:4 * n2p]))

    # ---- fc1: torch.flatten(x, 1) folded into 25 per-(i,j) weight blocks;
    #      tiny 0/1 selectors pull the (batch, channel) rows out of a2. -------
    def fc1_step(r, z):
        xr = jnp.dot(fs_ref[r], a2, preferred_element_type=f32)       # (B,128)
        return z + jnp.dot(xr, fw1_ref[r], preferred_element_type=f32)

    z = lax.fori_loop(0, 25, fc1_step, jnp.zeros((bsz, LANES), f32))
    z = jnp.maximum(z + fb1_ref[...], 0.0)

    # ---- fc2 / fc3 ----------------------------------------------------------
    z = jnp.maximum(jnp.dot(z, fw2_ref[...], preferred_element_type=f32)
                    + fb2_ref[...], 0.0)
    z = jnp.dot(z, fw3_ref[...], preferred_element_type=f32) + fb3_ref[...]
    out_ref[...] = z


# ----------------------------------------------------------------------------
# One-time parameter packing (padded, pre-transposed, MXU-friendly constants).
# ----------------------------------------------------------------------------
def pack_params(params, batch):
    f32 = np.float32
    n1 = batch * 14 * 14           # valid rows per conv1 pool-phase block
    n2 = batch * 5 * 5             # valid rows per conv2 pool-phase block
    n1p, n2p = _ceil8(n1), _ceil8(n2)

    def np32(a):
        return np.asarray(a, dtype=f32)

    # conv1: (6,3,5,5) -> (75,6), feature order (c,ki,kj), pad to 128x128.
    w1 = np.zeros((LANES, LANES), f32)
    w1[:K1, :C1] = np32(params["conv1_w"]).reshape(C1, K1).T
    b1 = np.zeros((1, LANES), f32)
    b1[0, :C1] = np32(params["conv1_b"])

    # conv2: one (C1 x C2) weight block per kernel offset (ki,kj), padded.
    w2 = np.zeros((KH * KW, LANES, LANES), f32)
    w2[:, :C1, :C2] = (np32(params["conv2_w"])
                       .transpose(2, 3, 1, 0).reshape(KH * KW, C1, C2))
    b2 = np.zeros((1, LANES), f32)
    b2[0, :C2] = np32(params["conv2_b"])

    # conv2 row-gather: G[k] @ A1 picks input row (b, 2*ii+ph+ki, 2*jj+pw+kj)
    # for every phase-grouped conv2 output row (ph, pw, b, ii, jj).
    g = np.zeros((KH * KW, 4 * n2p, n1p), f32)
    for k in range(KH * KW):
        ki, kj = divmod(k, KW)
        for ph in range(2):
            for pw in range(2):
                q = ph * 2 + pw
                for b in range(batch):
                    for ii in range(5):
                        for jj in range(5):
                            row = q * n2p + b * 25 + ii * 5 + jj
                            col = (b * 196 + (2 * ii + ph + ki) * 14
                                   + (2 * jj + pw + kj))
                            g[k, row, col] = 1.0

    # fc1: flatten order is (c, ii, jj) -> one (C2 x F1) block per (ii,jj),
    # plus a selector that pulls row (b*25 + r) of the pooled activations.
    fw1 = np.zeros((25, LANES, LANES), f32)
    fw1[:, :C2, :F1] = (np32(params["fc1_w"])
                        .reshape(F1, C2, 25).transpose(2, 1, 0))
    fb1 = np.zeros((1, LANES), f32)
    fb1[0, :F1] = np32(params["fc1_b"])
    fs = np.zeros((25, batch, n2p), f32)
    for r in range(25):
        for b in range(batch):
            fs[r, b, b * 25 + r] = 1.0

    fw2 = np.zeros((LANES, LANES), f32)
    fw2[:F1, :F2] = np32(params["fc2_w"]).T
    fb2 = np.zeros((1, LANES), f32)
    fb2[0, :F2] = np32(params["fc2_b"])

    fw3 = np.zeros((LANES, LANES), f32)
    fw3[:F2, :F3] = np32(params["fc3_w"]).T
    fb3 = np.zeros((1, LANES), f32)
    fb3[0, :F3] = np32(params["fc3_b"])

    packed = dict(W1=w1, B1=b1, G=g, W2=w2, B2=b2, FS=fs,
                  FW1=fw1, FB1=fb1, FW2=fw2, FB2=fb2, FW3=fw3, FB3=fb3)
    return {k: jnp.asarray(v) for k, v in packed.items()}


# ----------------------------------------------------------------------------
# Per-call input prep: phase-grouped, zero-padded conv1 im2col patches.
# ----------------------------------------------------------------------------
def _conv1_patches(x):
    b = x.shape[0]
    n1 = b * 14 * 14
    n1p = _ceil8(n1)
    cols = [x[:, :, ki:ki + 28, kj:kj + 28]
            for ki in range(KH) for kj in range(KW)]
    pat = jnp.stack(cols, axis=2)                       # (B, 3, 25, 28, 28)
    pat = pat.reshape(b, C_IN, KH * KW, 14, 2, 14, 2)   # oh=2i+ph, ow=2j+pw
    pat = pat.transpose(4, 6, 0, 3, 5, 1, 2)            # (ph, pw, B, i, j, C, 25)
    pat = pat.reshape(4, n1, K1)
    pat = jnp.pad(pat, ((0, 0), (0, n1p - n1), (0, LANES - K1)))
    return pat.reshape(4 * n1p, LANES)


# ----------------------------------------------------------------------------
# Fused forward pass (mirrors Net.forward exactly).
# ----------------------------------------------------------------------------
@jax.jit
def net_forward(x, packed):
    batch = x.shape[0]
    p1 = _conv1_patches(x)
    vmem = pl.BlockSpec(memory_space=pltpu.MemorySpace.VMEM)
    out = pl.pallas_call(
        _lenet_kernel,
        out_shape=jax.ShapeDtypeStruct((batch, LANES), jnp.float32),
        in_specs=[vmem] * 13,
        out_specs=vmem,
        compiler_params=pltpu.CompilerParams(
            vmem_limit_bytes=48 * 1024 * 1024),   # portable across v5e/v6e/v7x
    )(p1, packed["W1"], packed["B1"], packed["G"], packed["W2"], packed["B2"],
      packed["FS"], packed["FW1"], packed["FB1"], packed["FW2"], packed["FB2"],
      packed["FW3"], packed["FB3"])
    return out[:, :F3]


# ----------------------------------------------------------------------------
# Parameters (deterministic, PyTorch-style uniform init) + pure-JAX reference.
# ----------------------------------------------------------------------------
def init_params(key):
    def uniform(key, shape, fan_in):
        bound = 1.0 / jnp.sqrt(jnp.float32(fan_in))
        return jax.random.uniform(key, shape, jnp.float32, -bound, bound)

    ks = jax.random.split(key, 10)
    return {
        "conv1_w": uniform(ks[0], (C1, C_IN, KH, KW), C_IN * KH * KW),
        "conv1_b": uniform(ks[1], (C1,), C_IN * KH * KW),
        "conv2_w": uniform(ks[2], (C2, C1, KH, KW), C1 * KH * KW),
        "conv2_b": uniform(ks[3], (C2,), C1 * KH * KW),
        "fc1_w": uniform(ks[4], (F1, C2 * 5 * 5), C2 * 5 * 5),
        "fc1_b": uniform(ks[5], (F1,), C2 * 5 * 5),
        "fc2_w": uniform(ks[6], (F2, F1), F1),
        "fc2_b": uniform(ks[7], (F2,), F1),
        "fc3_w": uniform(ks[8], (F3, F2), F2),
        "fc3_b": uniform(ks[9], (F3,), F2),
    }


def reference_net_forward(x, params):
    def conv(x, w, b):
        y = lax.conv_general_dilated(
            x, w, (1, 1), "VALID",
            dimension_numbers=("NCHW", "OIHW", "NCHW"))
        return jax.nn.relu(y + b[None, :, None, None])

    def pool(x):
        return lax.reduce_window(x, -jnp.inf, lax.max,
                                 (1, 1, 2, 2), (1, 1, 2, 2), "VALID")

    x = pool(conv(x, params["conv1_w"], params["conv1_b"]))
    x = pool(conv(x, params["conv2_w"], params["conv2_b"]))
    x = x.reshape(x.shape[0], -1)
    x = jax.nn.relu(x @ params["fc1_w"].T + params["fc1_b"])
    x = jax.nn.relu(x @ params["fc2_w"].T + params["fc2_b"])
    return x @ params["fc3_w"].T + params["fc3_b"]


if __name__ == "__main__":
    key = jax.random.PRNGKey(0)
    k_param, k_input = jax.random.split(key)
    params = init_params(k_param)

    batch = 2  # spatial size fixed to 32x32 by fc1 (16*5*5)
    x = jax.random.normal(k_input, (batch, C_IN, 32, 32), jnp.float32)

    packed = pack_params(params, batch)
    out = jax.block_until_ready(net_forward(x, packed))
    assert out.shape == (batch, F3) and out.dtype == jnp.float32

    ref = jax.block_until_ready(jax.jit(reference_net_forward)(x, params))
    max_err = float(jnp.max(jnp.abs(out - ref)))
    assert max_err < 2e-3, f"Pallas forward mismatch vs reference: {max_err}"

    print("KERNEL_OK")
</pallas_src>

<mosaic_0001>
module attributes {stable_mosaic.version = 11 : i64} {
  func.func @_lenet_kernel(%arg0: memref<1568x128xf32, #tpu.memory_space<vmem>>, %arg1: memref<128x128xf32, #tpu.memory_space<vmem>>, %arg2: memref<1x128xf32, #tpu.memory_space<vmem>>, %arg3: memref<25x224x392xf32, #tpu.memory_space<vmem>>, %arg4: memref<25x128x128xf32, #tpu.memory_space<vmem>>, %arg5: memref<1x128xf32, #tpu.memory_space<vmem>>, %arg6: memref<25x2x56xf32, #tpu.memory_space<vmem>>, %arg7: memref<25x128x128xf32, #tpu.memory_space<vmem>>, %arg8: memref<1x128xf32, #tpu.memory_space<vmem>>, %arg9: memref<128x128xf32, #tpu.memory_space<vmem>>, %arg10: memref<1x128xf32, #tpu.memory_space<vmem>>, %arg11: memref<128x128xf32, #tpu.memory_space<vmem>>, %arg12: memref<1x128xf32, #tpu.memory_space<vmem>>, %arg13: memref<2x128xf32, #tpu.memory_space<vmem>>) attributes {dimension_semantics = [], scalar_prefetch = 0 : i64, scratch_operands = 0 : i64, tpu.core_type = #tpu.core_type<tc>} {
    %c0 = arith.constant 0 : index
    %c0_0 = arith.constant 0 : index
    %0 = vector.load %arg0[%c0, %c0_0] : memref<1568x128xf32, #tpu.memory_space<vmem>>, vector<1568x128xf32>
    %c0_1 = arith.constant 0 : index
    %c0_2 = arith.constant 0 : index
    %1 = vector.load %arg1[%c0_1, %c0_2] : memref<128x128xf32, #tpu.memory_space<vmem>>, vector<128x128xf32>
    %cst = arith.constant dense<0.000000e+00> : vector<1568x128xf32>
    %2 = tpu.matmul %0, %1, %cst {dimension_numbers = #tpu.dot_dimension_numbers<[1], [0], [0], [1], [0, 0, 1, 1], [], []>} : vector<1568x128xf32>, vector<128x128xf32>, vector<1568x128xf32> -> vector<1568x128xf32>
    %c0_3 = arith.constant 0 : index
    %c0_4 = arith.constant 0 : index
    %3 = vector.load %arg2[%c0_3, %c0_4] : memref<1x128xf32, #tpu.memory_space<vmem>>, vector<1x128xf32>
    %4 = vector.broadcast %3 : vector<1x128xf32> to vector<1568x128xf32>
    %5 = arith.addf %2, %4 : vector<1568x128xf32>
    %cst_5 = arith.constant 0.000000e+00 : f32
    %6 = vector.broadcast %cst_5 : f32 to vector<1568x128xf32>
    %7 = arith.maximumf %5, %6 : vector<1568x128xf32>
    %8 = vector.extract_strided_slice %7 {offsets = [0, 0], sizes = [392, 128], strides = [1, 1]} : vector<1568x128xf32> to vector<392x128xf32>
    %9 = vector.extract_strided_slice %7 {offsets = [392, 0], sizes = [392, 128], strides = [1, 1]} : vector<1568x128xf32> to vector<392x128xf32>
    %10 = arith.maximumf %8, %9 : vector<392x128xf32>
    %11 = vector.extract_strided_slice %7 {offsets = [784, 0], sizes = [392, 128], strides = [1, 1]} : vector<1568x128xf32> to vector<392x128xf32>
    %12 = vector.extract_strided_slice %7 {offsets = [1176, 0], sizes = [392, 128], strides = [1, 1]} : vector<1568x128xf32> to vector<392x128xf32>
    %13 = arith.maximumf %11, %12 : vector<392x128xf32>
    %14 = arith.maximumf %10, %13 : vector<392x128xf32>
    %cst_6 = arith.constant 0.000000e+00 : f32
    %15 = vector.broadcast %cst_6 : f32 to vector<224x128xf32>
    %c0_i32 = arith.constant 0 : i32
    %c25_i32 = arith.constant 25 : i32
    %16 = arith.addi %c0_i32, %c25_i32 : i32
    %c1_i32 = arith.constant 1 : i32
    %17 = scf.for %arg14 = %c0_i32 to %16 step %c1_i32 iter_args(%arg15 = %15) -> (vector<224x128xf32>)  : i32 {
      %51 = arith.index_cast %arg14 : i32 to index
      %c0_32 = arith.constant 0 : index
      %c0_33 = arith.constant 0 : index
      %52 = vector.load %arg3[%51, %c0_32, %c0_33] : memref<25x224x392xf32, #tpu.memory_space<vmem>>, vector<1x224x392xf32>
      %53 = vector.shape_cast %52 : vector<1x224x392xf32> to vector<224x392xf32>
      %cst_34 = arith.constant dense<0.000000e+00> : vector<224x128xf32>
      %54 = tpu.matmul %53, %14, %cst_34 {dimension_numbers = #tpu.dot_dimension_numbers<[1], [0], [0], [1], [0, 0, 1, 1], [], []>} : vector<224x392xf32>, vector<392x128xf32>, vector<224x128xf32> -> vector<224x128xf32>
      %55 = arith.index_cast %arg14 : i32 to index
      %c0_35 = arith.constant 0 : index
      %c0_36 = arith.constant 0 : index
      %56 = vector.load %arg4[%55, %c0_35, %c0_36] : memref<25x128x128xf32, #tpu.memory_space<vmem>>, vector<1x128x128xf32>
      %57 = vector.shape_cast %56 : vector<1x128x128xf32> to vector<128x128xf32>
      %cst_37 = arith.constant dense<0.000000e+00> : vector<224x128xf32>
      %58 = tpu.matmul %54, %57, %cst_37 {dimension_numbers = #tpu.dot_dimension_numbers<[1], [0], [0], [1], [0, 0, 1, 1], [], []>} : vector<224x128xf32>, vector<128x128xf32>, vector<224x128xf32> -> vector<224x128xf32>
      %59 = arith.addf %arg15, %58 : vector<224x128xf32>
      scf.yield %59 : vector<224x128xf32>
    }
    %c25_i32_7 = arith.constant 25 : i32
    %c0_8 = arith.constant 0 : index
    %c0_9 = arith.constant 0 : index
    %18 = vector.load %arg5[%c0_8, %c0_9] : memref<1x128xf32, #tpu.memory_space<vmem>>, vector<1x128xf32>
    %19 = vector.broadcast %18 : vector<1x128xf32> to vector<224x128xf32>
    %20 = arith.addf %17, %19 : vector<224x128xf32>
    %cst_10 = arith.constant 0.000000e+00 : f32
    %21 = vector.broadcast %cst_10 : f32 to vector<224x128xf32>
    %22 = arith.maximumf %20, %21 : vector<224x128xf32>
    %23 = vector.extract_strided_slice %22 {offsets = [0, 0], sizes = [56, 128], strides = [1, 1]} : vector<224x128xf32> to vector<56x128xf32>
    %24 = vector.extract_strided_slice %22 {offsets = [56, 0], sizes = [56, 128], strides = [1, 1]} : vector<224x128xf32> to vector<56x128xf32>
    %25 = arith.maximumf %23, %24 : vector<56x128xf32>
    %26 = vector.extract_strided_slice %22 {offsets = [112, 0], sizes = [56, 128], strides = [1, 1]} : vector<224x128xf32> to vector<56x128xf32>
    %27 = vector.extract_strided_slice %22 {offsets = [168, 0], sizes = [56, 128], strides = [1, 1]} : vector<224x128xf32> to vector<56x128xf32>
    %28 = arith.maximumf %26, %27 : vector<56x128xf32>
    %29 = arith.maximumf %25, %28 : vector<56x128xf32>
    %cst_11 = arith.constant 0.000000e+00 : f32
    %30 = vector.broadcast %cst_11 : f32 to vector<2x128xf32>
    %c0_i32_12 = arith.constant 0 : i32
    %c25_i32_13 = arith.constant 25 : i32
    %31 = arith.addi %c0_i32_12, %c25_i32_13 : i32
    %c1_i32_14 = arith.constant 1 : i32
    %32 = scf.for %arg14 = %c0_i32_12 to %31 step %c1_i32_14 iter_args(%arg15 = %30) -> (vector<2x128xf32>)  : i32 {
      %51 = arith.index_cast %arg14 : i32 to index
      %c0_32 = arith.constant 0 : index
      %c0_33 = arith.constant 0 : index
      %52 = vector.load %arg6[%51, %c0_32, %c0_33] : memref<25x2x56xf32, #tpu.memory_space<vmem>>, vector<1x2x56xf32>
      %53 = vector.shape_cast %52 : vector<1x2x56xf32> to vector<2x56xf32>
      %cst_34 = arith.constant dense<0.000000e+00> : vector<2x128xf32>
      %54 = tpu.matmul %53, %29, %cst_34 {dimension_numbers = #tpu.dot_dimension_numbers<[1], [0], [0], [1], [0, 0, 1, 1], [], []>} : vector<2x56xf32>, vector<56x128xf32>, vector<2x128xf32> -> vector<2x128xf32>
      %55 = arith.index_cast %arg14 : i32 to index
      %c0_35 = arith.constant 0 : index
      %c0_36 = arith.constant 0 : index
      %56 = vector.load %arg7[%55, %c0_35, %c0_36] : memref<25x128x128xf32, #tpu.memory_space<vmem>>, vector<1x128x128xf32>
      %57 = vector.shape_cast %56 : vector<1x128x128xf32> to vector<128x128xf32>
      %cst_37 = arith.constant dense<0.000000e+00> : vector<2x128xf32>
      %58 = tpu.matmul %54, %57, %cst_37 {dimension_numbers = #tpu.dot_dimension_numbers<[1], [0], [0], [1], [0, 0, 1, 1], [], []>} : vector<2x128xf32>, vector<128x128xf32>, vector<2x128xf32> -> vector<2x128xf32>
      %59 = arith.addf %arg15, %58 : vector<2x128xf32>
      scf.yield %59 : vector<2x128xf32>
    }
    %c25_i32_15 = arith.constant 25 : i32
    %c0_16 = arith.constant 0 : index
    %c0_17 = arith.constant 0 : index
    %33 = vector.load %arg8[%c0_16, %c0_17] : memref<1x128xf32, #tpu.memory_space<vmem>>, vector<1x128xf32>
    %34 = vector.broadcast %33 : vector<1x128xf32> to vector<2x128xf32>
    %35 = arith.addf %32, %34 : vector<2x128xf32>
    %cst_18 = arith.constant 0.000000e+00 : f32
    %36 = vector.broadcast %cst_18 : f32 to vector<2x128xf32>
    %37 = arith.maximumf %35, %36 : vector<2x128xf32>
    %c0_19 = arith.constant 0 : index
    %c0_20 = arith.constant 0 : index
    %38 = vector.load %arg9[%c0_19, %c0_20] : memref<128x128xf32, #tpu.memory_space<vmem>>, vector<128x128xf32>
    %cst_21 = arith.constant dense<0.000000e+00> : vector<2x128xf32>
    %39 = tpu.matmul %37, %38, %cst_21 {dimension_numbers = #tpu.dot_dimension_numbers<[1], [0], [0], [1], [0, 0, 1, 1], [], []>} : vector<2x128xf32>, vector<128x128xf32>, vector<2x128xf32> -> vector<2x128xf32>
    %c0_22 = arith.constant 0 : index
    %c0_23 = arith.constant 0 : index
    %40 = vector.load %arg10[%c0_22, %c0_23] : memref<1x128xf32, #tpu.memory_space<vmem>>, vector<1x128xf32>
    %41 = vector.broadcast %40 : vector<1x128xf32> to vector<2x128xf32>
    %42 = arith.addf %39, %41 : vector<2x128xf32>
    %cst_24 = arith.constant 0.000000e+00 : f32
    %43 = vector.broadcast %cst_24 : f32 to vector<2x128xf32>
    %44 = arith.maximumf %42, %43 : vector<2x128xf32>
    %c0_25 = arith.constant 0 : index
    %c0_26 = arith.constant 0 : index
    %45 = vector.load %arg11[%c0_25, %c0_26] : memref<128x128xf32, #tpu.memory_space<vmem>>, vector<128x128xf32>
    %cst_27 = arith.constant dense<0.000000e+00> : vector<2x128xf32>
    %46 = tpu.matmul %44, %45, %cst_27 {dimension_numbers = #tpu.dot_dimension_numbers<[1], [0], [0], [1], [0, 0, 1, 1], [], []>} : vector<2x128xf32>, vector<128x128xf32>, vector<2x128xf32> -> vector<2x128xf32>
    %c0_28 = arith.constant 0 : index
    %c0_29 = arith.constant 0 : index
    %47 = vector.load %arg12[%c0_28, %c0_29] : memref<1x128xf32, #tpu.memory_space<vmem>>, vector<1x128xf32>
    %48 = vector.broadcast %47 : vector<1x128xf32> to vector<2x128xf32>
    %49 = arith.addf %46, %48 : vector<2x128xf32>
    %c0_30 = arith.constant 0 : index
    %c0_31 = arith.constant 0 : index
    %50 = vector.load %arg13[%c0_30, %c0_31] : memref<2x128xf32, #tpu.memory_space<vmem>>, vector<2x128xf32>
    tpu.vector_store %arg13[%c0_30, %c0_31], %49 {strides = array<i32>} : memref<2x128xf32, #tpu.memory_space<vmem>>, vector<2x128xf32>,
    return
  }
}

</mosaic_0001>

<bundles_post_ra>
// kernel: net_forward.1
= control target key start
LH: loop header
LB: loop body
LE: loop exit
PB: predicated region body
PF: predicated region fallthrough
CT: control target
= control target key end

     0   :  { %s5136_s0 = inlined_call_operand.vmem [shape: f32[1568,128], index: 0, kind: input, shape index: {}]   ;;  %s5137_s1 = inlined_call_operand.vmem [shape: f32[128,128], index: 1, kind: input, shape index: {}]   ;;  %s5138_s2 = inlined_call_operand.vmem [shape: f32[1,128], index: 2, kind: input, shape index: {}]   ;;  %s5139_s3 = inlined_call_operand.vmem [shape: f32[25,224,392], index: 3, kind: input, shape index: {}]   ;;  %s5140_s4 = inlined_call_operand.vmem [shape: f32[25,128,128], index: 4, kind: input, shape index: {}]   ;;  %s5141_s5 = inlined_call_operand.vmem [shape: f32[1,128], index: 5, kind: input, shape index: {}]   ;;  %s5142_s6 = inlined_call_operand.vmem [shape: f32[25,2,56], index: 6, kind: input, shape index: {}]   ;;  %s5143_s7 = inlined_call_operand.vmem [shape: f32[25,128,128], index: 7, kind: input, shape index: {}]   ;;  %s5144_s8 = inlined_call_operand.vmem [shape: f32[1,128], index: 8, kind: input, shape index: {}]   ;;  %s5145_s9 = inlined_call_operand.vmem [shape: f32[128,128], index: 9, kind: input, shape index: {}]   ;;  %s5146_s10 = inlined_call_operand.vmem [shape: f32[1,128], index: 10, kind: input, shape index: {}]   ;;  %s5147_s11 = inlined_call_operand.vmem [shape: f32[128,128], index: 11, kind: input, shape index: {}]   ;;  %s5148_s12 = inlined_call_operand.vmem [shape: f32[1,128], index: 12, kind: input, shape index: {}]   ;;  %s5149_s13 = inlined_call_operand.hbm [shape: f32[2,128], index: 13, kind: output, shape index: {}]  }
   0x1   :  { %v256_v0 = vld [vmem:[%s5137_s1 + $0x78] sm:$0xff]  ;;  %v255_v1 = vld [vmem:[%s5137_s1 + $0x70] sm:$0xff] }
   0x2   :  { %2392 = vmatpush.msra.mxu2 %v256_v0  ;;  %2393 = vmatpush.msra.mxu3 %v256_v0 }
   0x3   :  { %18 = vsyncpa [#allocation3], 0  ;;  %v254_v2 = vld [vmem:[%s5137_s1 + $0x68] sm:$0xff]  ;;  %261 = vmatpush.msra.mxu0 %v256_v0  ;;  %2391 = vmatpush.msra.mxu1 %v256_v0  ;;  %v253_v3 = vld [vmem:[%s5137_s1 + $0x60] sm:$0xff] }
   0x4   :  { %2395 = vmatpush.msra.mxu2 %v255_v1  ;;  %2396 = vmatpush.msra.mxu3 %v255_v1  ;;  %v252_v4 = vld [vmem:[%s5137_s1 + $0x58] sm:$0xff]  ;;  %v251_v5 = vld [vmem:[%s5137_s1 + $0x50] sm:$0xff]  ;;  %v250_v6 = vld [vmem:[%s5137_s1 + $0x48] sm:$0xff] }
   0x5   :  { %262 = vmatpush.msra.mxu0 %v255_v1  ;;  %2394 = vmatpush.msra.mxu1 %v255_v1  ;;  %v249_v7 = vld [vmem:[%s5137_s1 + $0x40] sm:$0xff]  ;;  %v248_v8 = vld [vmem:[%s5137_s1 + $0x38] sm:$0xff]  ;;  %v247_v9 = vld [vmem:[%s5137_s1 + $0x30] sm:$0xff] }
   0x6   :  { %2398 = vmatpush.msra.mxu2 %v254_v2  ;;  %2399 = vmatpush.msra.mxu3 %v254_v2  ;;  %v246_v10 = vld [vmem:[%s5137_s1 + $0x28] sm:$0xff]  ;;  %v245_v11 = vld [vmem:[%s5137_s1 + $0x20] sm:$0xff]  ;;  %v244_v12 = vld [vmem:[%s5137_s1 + $0x18] sm:$0xff] }
   0x7   :  { %263 = vmatpush.msra.mxu0 %v254_v2  ;;  %2397 = vmatpush.msra.mxu1 %v254_v2  ;;  %v243_v13 = vld [vmem:[%s5137_s1 + $0x10] sm:$0xff]  ;;  %v242_v14 = vld [vmem:[%s5137_s1 + $0x8] sm:$0xff]  ;;  %v241_v15 = vld [vmem:[%s5137_s1] sm:$0xff] }
   0x8   :  { %2401 = vmatpush.msra.mxu2 %v253_v3  ;;  %2402 = vmatpush.msra.mxu3 %v253_v3  ;;  %v143_v16 = vld [vmem:[%s5136_s0 + $0x310] sm:$0xff]  ;;  %v192_v17 = vld [vmem:[%s5136_s0 + $0x498] sm:$0xff]  ;;  %v45_v18 = vld [vmem:[%s5136_s0] sm:$0xff] }
   0x9   :  { %264 = vmatpush.msra.mxu0 %v253_v3  ;;  %2400 = vmatpush.msra.mxu1 %v253_v3  ;;  %v94_v19 = vld [vmem:[%s5136_s0 + $0x188] sm:$0xff]  ;;  %v144_v20 = vld [vmem:[%s5136_s0 + $0x318] sm:$0xff]  ;;  %v193_v21 = vld [vmem:[%s5136_s0 + $0x4a0] sm:$0xff] }
   0xa   :  { %2404 = vmatpush.msra.mxu2 %v252_v4  ;;  %2405 = vmatpush.msra.mxu3 %v252_v4  ;;  %v46_v22 = vld [vmem:[%s5136_s0 + $0x8] sm:$0xff]  ;;  %v95_v23 = vld [vmem:[%s5136_s0 + $0x190] sm:$0xff]  ;;  %v145_v24 = vld [vmem:[%s5136_s0 + $0x320] sm:$0xff] }
   0xb   :  { %265 = vmatpush.msra.mxu0 %v252_v4  ;;  %2403 = vmatpush.msra.mxu1 %v252_v4  ;;  %v194_v25 = vld [vmem:[%s5136_s0 + $0x4a8] sm:$0xff]  ;;  %v47_v26 = vld [vmem:[%s5136_s0 + $0x10] sm:$0xff]  ;;  %v96_v27 = vld [vmem:[%s5136_s0 + $0x198] sm:$0xff] }
   0xc   :  { %2407 = vmatpush.msra.mxu2 %v251_v5  ;;  %2408 = vmatpush.msra.mxu3 %v251_v5  ;;  %v146_v28 = vld [vmem:[%s5136_s0 + $0x328] sm:$0xff]  ;;  %v195_v29 = vld [vmem:[%s5136_s0 + $0x4b0] sm:$0xff]  ;;  %v48_v30 = vld [vmem:[%s5136_s0 + $0x18] sm:$0xff] }
   0xd   :  { %266 = vmatpush.msra.mxu0 %v251_v5  ;;  %2406 = vmatpush.msra.mxu1 %v251_v5  ;;  %v97_v31 = vld [vmem:[%s5136_s0 + $0x1a0] sm:$0xff]  ;;  %v147_v32 = vld [vmem:[%s5136_s0 + $0x330] sm:$0xff]  ;;  %v196_v33 = vld [vmem:[%s5136_s0 + $0x4b8] sm:$0xff] }
   0xe   :  { %2410 = vmatpush.msra.mxu2 %v250_v6  ;;  %2411 = vmatpush.msra.mxu3 %v250_v6  ;;  %v49_v34 = vld [vmem:[%s5136_s0 + $0x20] sm:$0xff]  ;;  %v98_v35 = vld [vmem:[%s5136_s0 + $0x1a8] sm:$0xff]  ;;  %v148_v36 = vld [vmem:[%s5136_s0 + $0x338] sm:$0xff] }
   0xf   :  { %267 = vmatpush.msra.mxu0 %v250_v6  ;;  %2409 = vmatpush.msra.mxu1 %v250_v6  ;;  %v197_v37 = vld [vmem:[%s5136_s0 + $0x4c0] sm:$0xff]  ;;  %v50_v38 = vld [vmem:[%s5136_s0 + $0x28] sm:$0xff]  ;;  %v99_v39 = vld [vmem:[%s5136_s0 + $0x1b0] sm:$0xff] }
  0x10   :  { %2413 = vmatpush.msra.mxu2 %v249_v7  ;;  %2414 = vmatpush.msra.mxu3 %v249_v7  ;;  %v149_v40 = vld [vmem:[%s5136_s0 + $0x340] sm:$0xff]  ;;  %v198_v41 = vld [vmem:[%s5136_s0 + $0x4c8] sm:$0xff]  ;;  %v51_v42 = vld [vmem:[%s5136_s0 + $0x30] sm:$0xff] }
  0x11   :  { %268 = vmatpush.msra.mxu0 %v249_v7  ;;  %2412 = vmatpush.msra.mxu1 %v249_v7  ;;  %v100_v43 = vld [vmem:[%s5136_s0 + $0x1b8] sm:$0xff]  ;;  %v150_v44 = vld [vmem:[%s5136_s0 + $0x348] sm:$0xff]  ;;  %v199_v45 = vld [vmem:[%s5136_s0 + $0x4d0] sm:$0xff] }
  0x12   :  { %2416 = vmatpush.msra.mxu2 %v248_v8  ;;  %2417 = vmatpush.msra.mxu3 %v248_v8  ;;  %v52_v46 = vld [vmem:[%s5136_s0 + $0x38] sm:$0xff]  ;;  %v101_v47 = vld [vmem:[%s5136_s0 + $0x1c0] sm:$0xff]  ;;  %v151_v48 = vld [vmem:[%s5136_s0 + $0x350] sm:$0xff] }
  0x13   :  { %269 = vmatpush.msra.mxu0 %v248_v8  ;;  %2415 = vmatpush.msra.mxu1 %v248_v8  ;;  %v200_v49 = vld [vmem:[%s5136_s0 + $0x4d8] sm:$0xff]  ;;  %v53_v50 = vld [vmem:[%s5136_s0 + $0x40] sm:$0xff]  ;;  %v102_v51 = vld [vmem:[%s5136_s0 + $0x1c8] sm:$0xff] }
  0x14   :  { %2419 = vmatpush.msra.mxu2 %v247_v9  ;;  %2420 = vmatpush.msra.mxu3 %v247_v9  ;;  %v152_v52 = vld [vmem:[%s5136_s0 + $0x358] sm:$0xff]  ;;  %v201_v53 = vld [vmem:[%s5136_s0 + $0x4e0] sm:$0xff]  ;;  %v54_v54 = vld [vmem:[%s5136_s0 + $0x48] sm:$0xff] }
  0x15   :  { %270 = vmatpush.msra.mxu0 %v247_v9  ;;  %2418 = vmatpush.msra.mxu1 %v247_v9  ;;  %v103_v55 = vld [vmem:[%s5136_s0 + $0x1d0] sm:$0xff]  ;;  %v153_v56 = vld [vmem:[%s5136_s0 + $0x360] sm:$0xff]  ;;  %v202_v57 = vld [vmem:[%s5136_s0 + $0x4e8] sm:$0xff] }
  0x16   :  { %2422 = vmatpush.msra.mxu2 %v246_v10  ;;  %2423 = vmatpush.msra.mxu3 %v246_v10  ;;  %v55_v58 = vld [vmem:[%s5136_s0 + $0x50] sm:$0xff]  ;;  %v104_v59 = vld [vmem:[%s5136_s0 + $0x1d8] sm:$0xff]  ;;  %v154_v60 = vld [vmem:[%s5136_s0 + $0x368] sm:$0xff] }
  0x17   :  { %271 = vmatpush.msra.mxu0 %v246_v10  ;;  %2421 = vmatpush.msra.mxu1 %v246_v10  ;;  %v203_v61 = vld [vmem:[%s5136_s0 + $0x4f0] sm:$0xff]  ;;  %v56_v62 = vld [vmem:[%s5136_s0 + $0x58] sm:$0xff]  ;;  %v105_v63 = vld [vmem:[%s5136_s0 + $0x1e0] sm:$0xff] }
  0x18   :  { %2425 = vmatpush.msra.mxu2 %v245_v11  ;;  %2426 = vmatpush.msra.mxu3 %v245_v11  ;;  %v155_v0 = vld [vmem:[%s5136_s0 + $0x370] sm:$0xff]  ;;  %v204_v1 = vld [vmem:[%s5136_s0 + $0x4f8] sm:$0xff]  ;;  %v57_v2 = vld [vmem:[%s5136_s0 + $0x60] sm:$0xff] }
  0x19   :  { %272 = vmatpush.msra.mxu0 %v245_v11  ;;  %2424 = vmatpush.msra.mxu1 %v245_v11  ;;  %v106_v3 = vld [vmem:[%s5136_s0 + $0x1e8] sm:$0xff]  ;;  %v156_v4 = vld [vmem:[%s5136_s0 + $0x378] sm:$0xff]  ;;  %v205_v5 = vld [vmem:[%s5136_s0 + $0x500] sm:$0xff] }
  0x1a   :  { %2428 = vmatpush.msra.mxu2 %v244_v12  ;;  %2429 = vmatpush.msra.mxu3 %v244_v12  ;;  %v58_v6 = vld [vmem:[%s5136_s0 + $0x68] sm:$0xff]  ;;  %v107_v7 = vld [vmem:[%s5136_s0 + $0x1f0] sm:$0xff]  ;;  %v157_v8 = vld [vmem:[%s5136_s0 + $0x380] sm:$0xff] }
  0x1b   :  { %273 = vmatpush.msra.mxu0 %v244_v12  ;;  %2427 = vmatpush.msra.mxu1 %v244_v12  ;;  %v206_v9 = vld [vmem:[%s5136_s0 + $0x508] sm:$0xff]  ;;  %v59_v10 = vld [vmem:[%s5136_s0 + $0x70] sm:$0xff]  ;;  %v108_v11 = vld [vmem:[%s5136_s0 + $0x1f8] sm:$0xff] }
  0x1c   :  { %2431 = vmatpush.msra.mxu2 %v243_v13  ;;  %2432 = vmatpush.msra.mxu3 %v243_v13  ;;  %v158_v12 = vld [vmem:[%s5136_s0 + $0x388] sm:$0xff] }
  0x1d   :  { %274 = vmatpush.msra.mxu0 %v243_v13  ;;  %2430 = vmatpush.msra.mxu1 %v243_v13  ;;  %v207_v13 = vld [vmem:[%s5136_s0 + $0x510] sm:$0xff] }
  0x1e   :  { %2434 = vmatpush.msra.mxu2 %v242_v14  ;;  %2435 = vmatpush.msra.mxu3 %v242_v14 }
  0x1f   :  { %275 = vmatpush.msra.mxu0 %v242_v14  ;;  %2433 = vmatpush.msra.mxu1 %v242_v14  ;;  %v60_v14 = vld [vmem:[%s5136_s0 + $0x78] sm:$0xff] }
  0x20   :  { %2437 = vmatpush.msra.mxu2 %v241_v15  ;;  %2438 = vmatpush.msra.mxu3 %v241_v15 }
  0x21   :  { %571 = vmatmul.f32.vlgmr.msra.gmra.mxu2 %v143_v16  ;;  %718 = vmatmul.f32.vlgmr.msra.gmra.mxu3 %v192_v17  ;;  %v3315_v16 = vld [vmem:[%s5138_s2] ss:$0 sm:$0xff]  ;;  %v159_v17 = vld [vmem:[%s5136_s0 + $0x390] sm:$0xff] }
  0x22   :  { %276 = vmatpush.msra.mxu0 %v241_v15  ;;  %2436 = vmatpush.msra.mxu1 %v241_v15  ;;  %v109_v15 = vld [vmem:[%s5136_s0 + $0x200] sm:$0xff] }
  0x23   :  { %277 = vmatmul.f32.vlgmr.msra.gmra.mxu0 %v45_v18  ;;  %424 = vmatmul.f32.vlgmr.msra.gmra.mxu1 %v94_v19  ;;  %v208_v18 = vld [vmem:[%s5136_s0 + $0x518] sm:$0xff] }
  0x29   :  { %574 = vmatmul.f32.gmra.mxu2 %v144_v20  ;;  %721 = vmatmul.f32.gmra.mxu3 %v193_v21  ;;  %v61_v21 = vld [vmem:[%s5136_s0 + $0x80] sm:$0xff] }
  0x2b   :  { %280 = vmatmul.f32.gmra.mxu0 %v46_v22  ;;  %427 = vmatmul.f32.gmra.mxu1 %v95_v23  ;;  %v110_v22 = vld [vmem:[%s5136_s0 + $0x208] sm:$0xff] }
  0x31   :  { %577 = vmatmul.f32.gmra.mxu2 %v145_v24  ;;  %724 = vmatmul.f32.gmra.mxu3 %v194_v25 }
  0x33   :  { %283 = vmatmul.f32.gmra.mxu0 %v47_v26  ;;  %430 = vmatmul.f32.gmra.mxu1 %v96_v27 }
  0x39   :  { %580 = vmatmul.f32.gmra.mxu2 %v146_v28  ;;  %727 = vmatmul.f32.gmra.mxu3 %v195_v29 }
  0x3b   :  { %286 = vmatmul.f32.gmra.mxu0 %v48_v30  ;;  %433 = vmatmul.f32.gmra.mxu1 %v97_v31  ;;  %v160_v31 = vld [vmem:[%s5136_s0 + $0x398] sm:$0xff] }
  0x41   :  { %583 = vmatmul.f32.gmra.mxu2 %v147_v32  ;;  %730 = vmatmul.f32.gmra.mxu3 %v196_v33  ;;  %v209_v32 = vld [vmem:[%s5136_s0 + $0x520] sm:$0xff] }
  0x43   :  { %289 = vmatmul.f32.gmra.mxu0 %v49_v34  ;;  %436 = vmatmul.f32.gmra.mxu1 %v98_v35 }
  0x49   :  { %586 = vmatmul.f32.gmra.mxu2 %v148_v36  ;;  %733 = vmatmul.f32.gmra.mxu3 %v197_v37 }
  0x4b   :  { %292 = vmatmul.f32.gmra.mxu0 %v50_v38  ;;  %439 = vmatmul.f32.gmra.mxu1 %v99_v39  ;;  %v62_v38 = vld [vmem:[%s5136_s0 + $0x88] sm:$0xff]  ;;  %v111_v39 = vld [vmem:[%s5136_s0 + $0x210] sm:$0xff] }
  0x51   :  { %589 = vmatmul.f32.gmra.mxu2 %v149_v40  ;;  %736 = vmatmul.f32.gmra.mxu3 %v198_v41 }
  0x53   :  { %295 = vmatmul.f32.gmra.mxu0 %v51_v42  ;;  %442 = vmatmul.f32.gmra.mxu1 %v100_v43 }
  0x59   :  { %592 = vmatmul.f32.gmra.mxu2 %v150_v44  ;;  %739 = vmatmul.f32.gmra.mxu3 %v199_v45 }
  0x5b   :  { %298 = vmatmul.f32.gmra.mxu0 %v52_v46  ;;  %445 = vmatmul.f32.gmra.mxu1 %v101_v47 }
  0x61   :  { %595 = vmatmul.f32.gmra.mxu2 %v151_v48  ;;  %742 = vmatmul.f32.gmra.mxu3 %v200_v49 }
  0x63   :  { %301 = vmatmul.f32.gmra.mxu0 %v53_v50  ;;  %448 = vmatmul.f32.gmra.mxu1 %v102_v51  ;;  %v161_v50 = vld [vmem:[%s5136_s0 + $0x3a0] sm:$0xff]  ;;  %v210_v51 = vld [vmem:[%s5136_s0 + $0x528] sm:$0xff] }
  0x69   :  { %598 = vmatmul.f32.gmra.mxu2 %v152_v52  ;;  %745 = vmatmul.f32.gmra.mxu3 %v201_v53 }
  0x6b   :  { %304 = vmatmul.f32.gmra.mxu0 %v54_v54  ;;  %451 = vmatmul.f32.gmra.mxu1 %v103_v55 }
  0x71   :  { %601 = vmatmul.f32.gmra.mxu2 %v153_v56  ;;  %748 = vmatmul.f32.gmra.mxu3 %v202_v57  ;;  %v63_v57 = vld [vmem:[%s5136_s0 + $0x90] sm:$0xff] }
  0x73   :  { %307 = vmatmul.f32.gmra.mxu0 %v55_v58  ;;  %454 = vmatmul.f32.gmra.mxu1 %v104_v59  ;;  %v112_v58 = vld [vmem:[%s5136_s0 + $0x218] sm:$0xff] }
  0x79   :  { %604 = vmatmul.f32.gmra.mxu2 %v154_v60  ;;  %751 = vmatmul.f32.gmra.mxu3 %v203_v61 }
  0x7b   :  { %310 = vmatmul.f32.gmra.mxu0 %v56_v62  ;;  %457 = vmatmul.f32.gmra.mxu1 %v105_v63 }
  0x81   :  { %607 = vmatmul.f32.gmra.mxu2 %v155_v0  ;;  %754 = vmatmul.f32.gmra.mxu3 %v204_v1 }
  0x83   :  { %313 = vmatmul.f32.gmra.mxu0 %v57_v2  ;;  %460 = vmatmul.f32.gmra.mxu1 %v106_v3 }
  0x89   :  { %610 = vmatmul.f32.gmra.mxu2 %v156_v4  ;;  %757 = vmatmul.f32.gmra.mxu3 %v205_v5  ;;  %v162_v5 = vld [vmem:[%s5136_s0 + $0x3a8] sm:$0xff] }
  0x8b   :  { %316 = vmatmul.f32.gmra.mxu0 %v58_v6  ;;  %463 = vmatmul.f32.gmra.mxu1 %v107_v7  ;;  %v211_v6 = vld [vmem:[%s5136_s0 + $0x530] sm:$0xff] }
  0x91   :  { %613 = vmatmul.f32.gmra.mxu2 %v157_v8  ;;  %760 = vmatmul.f32.gmra.mxu3 %v206_v9 }
  0x93   :  { %319 = vmatmul.f32.gmra.mxu0 %v59_v10  ;;  %466 = vmatmul.f32.gmra.mxu1 %v108_v11 }
  0x99   :  { %616 = vmatmul.f32.gmra.mxu2 %v158_v12  ;;  %763 = vmatmul.f32.gmra.mxu3 %v207_v13  ;;  %v64_v12 = vld [vmem:[%s5136_s0 + $0x98] sm:$0xff]  ;;  %v113_v13 = vld [vmem:[%s5136_s0 + $0x220] sm:$0xff] }
  0x9b   :  { %322 = vmatmul.f32.gmra.mxu0 %v60_v14  ;;  %469 = vmatmul.f32.gmra.mxu1 %v109_v15 }
  0xa0   :  { %v278_v19 = vpop.f32.mrf.mxu0  ;;  %v425_v20 = vpop.f32.mrf.mxu1 }
  0xa1   :  { %619 = vmatmul.f32.gmra.mxu2 %v159_v17  ;;  %766 = vmatmul.f32.gmra.mxu3 %v208_v18  ;;  %v279_v23 = vadd.f32 %v3315_v16, %v278_v19  ;;  %v426_v24 = vadd.f32 %v3315_v16, %v425_v20 }
  0xa3   :  { %v866_v25 = vmax.f32 %v279_v23, 0.0  ;;  %v915_v26 = vmax.f32 %v426_v24, 0.0  ;;  %325 = vmatmul.f32.gmra.mxu0 %v61_v21  ;;  %472 = vmatmul.f32.gmra.mxu1 %v110_v22 }
  0xa4   :  { %v572_v27 = vpop.f32.mrf.mxu2  ;;  %v719_v28 = vpop.f32.mrf.mxu3 }
  0xa5   :  { %v573_v29 = vadd.f32 %v3315_v16, %v572_v27  ;;  %v720_v30 = vadd.f32 %v3315_v16, %v719_v28  ;;  %v1062_v33 = vmax.f32 %v866_v25, %v915_v26  ;;  %v163_v25 = vld [vmem:[%s5136_s0 + $0x3b0] sm:$0xff]  ;;  %v212_v26 = vld [vmem:[%s5136_s0 + $0x538] sm:$0xff] }
  0xa7   :  { %v964_v34 = vmax.f32 %v573_v29, 0.0  ;;  %v1013_v35 = vmax.f32 %v720_v30, 0.0 }
  0xa8   :  { %v281_v36 = vpop.f32.mrf.mxu0  ;;  %v428_v37 = vpop.f32.mrf.mxu1 }
  0xa9   :  { %v1111_v40 = vmax.f32 %v964_v34, %v1013_v35  ;;  %622 = vmatmul.f32.gmra.mxu2 %v160_v31  ;;  %769 = vmatmul.f32.gmra.mxu3 %v209_v32  ;;  %v282_v41 = vadd.f32 %v3315_v16, %v281_v36  ;;  %v429_v42 = vadd.f32 %v3315_v16, %v428_v37  ;;  %v65_v32 = vld [vmem:[%s5136_s0 + $0xa0] sm:$0xff] }
  0xab   :  { %v3347_v43 = vmax.f32 %v1062_v33, %v1111_v40  ;;  %v867_v44 = vmax.f32 %v282_v41, 0.0  ;;  %v916_v45 = vmax.f32 %v429_v42, 0.0  ;;  %328 = vmatmul.f32.gmra.mxu0 %v62_v38  ;;  %475 = vmatmul.f32.gmra.mxu1 %v111_v39  ;;  %v114_v33 = vld [vmem:[%s5136_s0 + $0x228] sm:$0xff] }
  0xac   :  { %v575_v46 = vpop.f32.mrf.mxu2  ;;  %v722_v47 = vpop.f32.mrf.mxu3 }
  0xad   :  { %5231 = vst [vmem:[#allocation5_spill] sm:$0xff] %v3347_v43  ;;  %v576_v48 = vadd.f32 %v3315_v16, %v575_v46  ;;  %v723_v49 = vadd.f32 %v3315_v16, %v722_v47  ;;  %v1063_v52 = vmax.f32 %v867_v44, %v916_v45  ;;  %v164_v45 = vld [vmem:[%s5136_s0 + $0x3b8] sm:$0xff]  ;;  %v213_v46 = vld [vmem:[%s5136_s0 + $0x540] sm:$0xff] }
  0xaf   :  { %v965_v53 = vmax.f32 %v576_v48, 0.0  ;;  %v1014_v54 = vmax.f32 %v723_v49, 0.0 }
  0xb0   :  { %v284_v55 = vpop.f32.mrf.mxu0  ;;  %v431_v56 = vpop.f32.mrf.mxu1 }
  0xb1   :  { %v1112_v59 = vmax.f32 %v965_v53, %v1014_v54  ;;  %625 = vmatmul.f32.gmra.mxu2 %v161_v50  ;;  %772 = vmatmul.f32.gmra.mxu3 %v210_v51  ;;  %v285_v60 = vadd.f32 %v3315_v16, %v284_v55  ;;  %v432_v61 = vadd.f32 %v3315_v16, %v431_v56  ;;  %v115_v53 = vld [vmem:[%s5136_s0 + $0x230] sm:$0xff] }
  0xb3   :  { %v3365_v62 = vmax.f32 %v1063_v52, %v1112_v59  ;;  %v868_v63 = vmax.f32 %v285_v60, 0.0  ;;  %v917_v0 = vmax.f32 %v432_v61, 0.0  ;;  %331 = vmatmul.f32.gmra.mxu0 %v63_v57  ;;  %478 = vmatmul.f32.gmra.mxu1 %v112_v58  ;;  %v66_v52 = vld [vmem:[%s5136_s0 + $0xa8] sm:$0xff] }
  0xb4   :  { %v578_v1 = vpop.f32.mrf.mxu2  ;;  %v725_v2 = vpop.f32.mrf.mxu3 }
  0xb5   :  { %5232 = vst [vmem:[#allocation6_spill] sm:$0xff] %v3365_v62  ;;  %v579_v3 = vadd.f32 %v3315_v16, %v578_v1  ;;  %v726_v4 = vadd.f32 %v3315_v16, %v725_v2  ;;  %v1064_v7 = vmax.f32 %v868_v63, %v917_v0  ;;  %v165_v1 = vld [vmem:[%s5136_s0 + $0x3c0] sm:$0xff]  ;;  %v214_v2 = vld [vmem:[%s5136_s0 + $0x548] sm:$0xff] }
  0xb7   :  { %v966_v8 = vmax.f32 %v579_v3, 0.0  ;;  %v1015_v9 = vmax.f32 %v726_v4, 0.0 }
  0xb8   :  { %v287_v10 = vpop.f32.mrf.mxu0  ;;  %v434_v11 = vpop.f32.mrf.mxu1 }
  0xb9   :  { %v1113_v14 = vmax.f32 %v966_v8, %v1015_v9  ;;  %628 = vmatmul.f32.gmra.mxu2 %v162_v5  ;;  %775 = vmatmul.f32.gmra.mxu3 %v211_v6  ;;  %v288_v15 = vadd.f32 %v3315_v16, %v287_v10  ;;  %v435_v17 = vadd.f32 %v3315_v16, %v434_v11  ;;  %v67_v8 = vld [vmem:[%s5136_s0 + $0xb0] sm:$0xff]  ;;  %v116_v9 = vld [vmem:[%s5136_s0 + $0x238] sm:$0xff] }
  0xbb   :  { %v3383_v18 = vmax.f32 %v1064_v7, %v1113_v14  ;;  %v869_v19 = vmax.f32 %v288_v15, 0.0  ;;  %v918_v20 = vmax.f32 %v435_v17, 0.0  ;;  %334 = vmatmul.f32.gmra.mxu0 %v64_v12  ;;  %481 = vmatmul.f32.gmra.mxu1 %v113_v13 }
  0xbc   :  { %v581_v21 = vpop.f32.mrf.mxu2  ;;  %v728_v22 = vpop.f32.mrf.mxu3 }
  0xbd   :  { %5233 = vst [vmem:[#allocation7_spill] sm:$0xff] %v3383_v18  ;;  %v582_v23 = vadd.f32 %v3315_v16, %v581_v21  ;;  %v729_v24 = vadd.f32 %v3315_v16, %v728_v22  ;;  %v1065_v27 = vmax.f32 %v869_v19, %v918_v20  ;;  %v166_v22 = vld [vmem:[%s5136_s0 + $0x3c8] sm:$0xff] }
  0xbf   :  { %v967_v28 = vmax.f32 %v582_v23, 0.0  ;;  %v1016_v29 = vmax.f32 %v729_v24, 0.0  ;;  %v215_v23 = vld [vmem:[%s5136_s0 + $0x550] sm:$0xff] }
  0xc0   :  { %v290_v30 = vpop.f32.mrf.mxu0  ;;  %v437_v31 = vpop.f32.mrf.mxu1 }
  0xc1   :  { %v1114_v34 = vmax.f32 %v967_v28, %v1016_v29  ;;  %631 = vmatmul.f32.gmra.mxu2 %v163_v25  ;;  %778 = vmatmul.f32.gmra.mxu3 %v212_v26  ;;  %v291_v35 = vadd.f32 %v3315_v16, %v290_v30  ;;  %v438_v36 = vadd.f32 %v3315_v16, %v437_v31  ;;  %v68_v29 = vld [vmem:[%s5136_s0 + $0xb8] sm:$0xff]  ;;  %v117_v30 = vld [vmem:[%s5136_s0 + $0x240] sm:$0xff] }
  0xc3   :  { %v3401_v37 = vmax.f32 %v1065_v27, %v1114_v34  ;;  %v870_v38 = vmax.f32 %v291_v35, 0.0  ;;  %v919_v39 = vmax.f32 %v438_v36, 0.0  ;;  %337 = vmatmul.f32.gmra.mxu0 %v65_v32  ;;  %484 = vmatmul.f32.gmra.mxu1 %v114_v33 }
  0xc4   :  { %v584_v40 = vpop.f32.mrf.mxu2  ;;  %v731_v41 = vpop.f32.mrf.mxu3 }
  0xc5   :  { %5234 = vst [vmem:[#allocation8_spill] sm:$0xff] %v3401_v37  ;;  %v585_v42 = vadd.f32 %v3315_v16, %v584_v40  ;;  %v732_v44 = vadd.f32 %v3315_v16, %v731_v41  ;;  %v1066_v47 = vmax.f32 %v870_v38, %v919_v39 }
  0xc7   :  { %v968_v48 = vmax.f32 %v585_v42, 0.0  ;;  %v1017_v49 = vmax.f32 %v732_v44, 0.0  ;;  %v167_v42 = vld [vmem:[%s5136_s0 + $0x3d0] sm:$0xff]  ;;  %v216_v44 = vld [vmem:[%s5136_s0 + $0x558] sm:$0xff] }
  0xc8   :  { %v293_v50 = vpop.f32.mrf.mxu0  ;;  %v440_v51 = vpop.f32.mrf.mxu1 }
  0xc9   :  { %v1115_v54 = vmax.f32 %v968_v48, %v1017_v49  ;;  %634 = vmatmul.f32.gmra.mxu2 %v164_v45  ;;  %781 = vmatmul.f32.gmra.mxu3 %v213_v46  ;;  %v294_v55 = vadd.f32 %v3315_v16, %v293_v50  ;;  %v441_v56 = vadd.f32 %v3315_v16, %v440_v51  ;;  %v69_v50 = vld [vmem:[%s5136_s0 + $0xc0] sm:$0xff]  ;;  %v118_v51 = vld [vmem:[%s5136_s0 + $0x248] sm:$0xff] }
  0xcb   :  { %v3419_v57 = vmax.f32 %v1066_v47, %v1115_v54  ;;  %v871_v58 = vmax.f32 %v294_v55, 0.0  ;;  %v920_v59 = vmax.f32 %v441_v56, 0.0  ;;  %340 = vmatmul.f32.gmra.mxu0 %v66_v52  ;;  %487 = vmatmul.f32.gmra.mxu1 %v115_v53 }
  0xcc   :  { %v587_v60 = vpop.f32.mrf.mxu2  ;;  %v734_v61 = vpop.f32.mrf.mxu3 }
  0xcd   :  { %5235 = vst [vmem:[#allocation9_spill] sm:$0xff] %v3419_v57  ;;  %v588_v63 = vadd.f32 %v3315_v16, %v587_v60  ;;  %v735_v0 = vadd.f32 %v3315_v16, %v734_v61  ;;  %v1067_v3 = vmax.f32 %v871_v58, %v920_v59 }
  0xcf   :  { %v969_v4 = vmax.f32 %v588_v63, 0.0  ;;  %v1018_v5 = vmax.f32 %v735_v0, 0.0  ;;  %v168_v0 = vld [vmem:[%s5136_s0 + $0x3d8] sm:$0xff] }
  0xd0   :  { %v296_v6 = vpop.f32.mrf.mxu0  ;;  %v443_v7 = vpop.f32.mrf.mxu1 }
  0xd1   :  { %v1116_v10 = vmax.f32 %v969_v4, %v1018_v5  ;;  %637 = vmatmul.f32.gmra.mxu2 %v165_v1  ;;  %784 = vmatmul.f32.gmra.mxu3 %v214_v2  ;;  %v297_v11 = vadd.f32 %v3315_v16, %v296_v6  ;;  %v444_v12 = vadd.f32 %v3315_v16, %v443_v7  ;;  %v217_v1 = vld [vmem:[%s5136_s0 + $0x560] sm:$0xff]  ;;  %v70_v7 = vld [vmem:[%s5136_s0 + $0xc8] sm:$0xff] }
  0xd3   :  { %v3437_v13 = vmax.f32 %v1067_v3, %v1116_v10  ;;  %v872_v14 = vmax.f32 %v297_v11, 0.0  ;;  %v921_v15 = vmax.f32 %v444_v12, 0.0  ;;  %343 = vmatmul.f32.gmra.mxu0 %v67_v8  ;;  %490 = vmatmul.f32.gmra.mxu1 %v116_v9  ;;  %v119_v8 = vld [vmem:[%s5136_s0 + $0x250] sm:$0xff] }
  0xd4   :  { %v590_v17 = vpop.f32.mrf.mxu2  ;;  %v737_v19 = vpop.f32.mrf.mxu3 }
  0xd5   :  { %5236 = vst [vmem:[#allocation10_spill] sm:$0xff] %v3437_v13  ;;  %v591_v20 = vadd.f32 %v3315_v16, %v590_v17  ;;  %v738_v21 = vadd.f32 %v3315_v16, %v737_v19  ;;  %v1068_v24 = vmax.f32 %v872_v14, %v921_v15 }
  0xd7   :  { %v970_v25 = vmax.f32 %v591_v20, 0.0  ;;  %v1019_v26 = vmax.f32 %v738_v21, 0.0 }
  0xd8   :  { %v299_v27 = vpop.f32.mrf.mxu0  ;;  %v446_v28 = vpop.f32.mrf.mxu1 }
  0xd9   :  { %v1117_v31 = vmax.f32 %v970_v25, %v1019_v26  ;;  %640 = vmatmul.f32.gmra.mxu2 %v166_v22  ;;  %787 = vmatmul.f32.gmra.mxu3 %v215_v23  ;;  %v300_v32 = vadd.f32 %v3315_v16, %v299_v27  ;;  %v447_v33 = vadd.f32 %v3315_v16, %v446_v28  ;;  %v169_v22 = vld [vmem:[%s5136_s0 + $0x3e0] sm:$0xff]  ;;  %v218_v23 = vld [vmem:[%s5136_s0 + $0x568] sm:$0xff] }
  0xdb   :  { %v3455_v34 = vmax.f32 %v1068_v24, %v1117_v31  ;;  %v873_v35 = vmax.f32 %v300_v32, 0.0  ;;  %v922_v36 = vmax.f32 %v447_v33, 0.0  ;;  %346 = vmatmul.f32.gmra.mxu0 %v68_v29  ;;  %493 = vmatmul.f32.gmra.mxu1 %v117_v30  ;;  %v71_v29 = vld [vmem:[%s5136_s0 + $0xd0] sm:$0xff]  ;;  %v120_v30 = vld [vmem:[%s5136_s0 + $0x258] sm:$0xff] }
  0xdc   :  { %v593_v38 = vpop.f32.mrf.mxu2  ;;  %v740_v39 = vpop.f32.mrf.mxu3 }
  0xdd   :  { %5237 = vst [vmem:[#allocation11_spill] sm:$0xff] %v3455_v34  ;;  %v594_v40 = vadd.f32 %v3315_v16, %v593_v38  ;;  %v741_v41 = vadd.f32 %v3315_v16, %v740_v39  ;;  %v1069_v45 = vmax.f32 %v873_v35, %v922_v36 }
  0xdf   :  { %v971_v46 = vmax.f32 %v594_v40, 0.0  ;;  %v1020_v47 = vmax.f32 %v741_v41, 0.0 }
  0xe0   :  { %v302_v48 = vpop.f32.mrf.mxu0  ;;  %v449_v49 = vpop.f32.mrf.mxu1 }
  0xe1   :  { %v1118_v52 = vmax.f32 %v971_v46, %v1020_v47  ;;  %643 = vmatmul.f32.gmra.mxu2 %v167_v42  ;;  %790 = vmatmul.f32.gmra.mxu3 %v216_v44  ;;  %v303_v53 = vadd.f32 %v3315_v16, %v302_v48  ;;  %v450_v54 = vadd.f32 %v3315_v16, %v449_v49  ;;  %v170_v44 = vld [vmem:[%s5136_s0 + $0x3e8] sm:$0xff] }
  0xe3   :  { %v3473_v55 = vmax.f32 %v1069_v45, %v1118_v52  ;;  %v874_v56 = vmax.f32 %v303_v53, 0.0  ;;  %v923_v58 = vmax.f32 %v450_v54, 0.0  ;;  %349 = vmatmul.f32.gmra.mxu0 %v69_v50  ;;  %496 = vmatmul.f32.gmra.mxu1 %v118_v51  ;;  %v219_v45 = vld [vmem:[%s5136_s0 + $0x570] sm:$0xff]  ;;  %v72_v51 = vld [vmem:[%s5136_s0 + $0xd8] sm:$0xff]  ;;  %v121_v52 = vld [vmem:[%s5136_s0 + $0x260] sm:$0xff] }
  0xe4   :  { %v596_v59 = vpop.f32.mrf.mxu2  ;;  %v743_v60 = vpop.f32.mrf.mxu3 }
  0xe5   :  { %5238 = vst [vmem:[#allocation12_spill] sm:$0xff] %v3473_v55  ;;  %v597_v61 = vadd.f32 %v3315_v16, %v596_v59  ;;  %v744_v63 = vadd.f32 %v3315_v16, %v743_v60  ;;  %v1070_v2 = vmax.f32 %v874_v56, %v923_v58 }
  0xe7   :  { %v972_v3 = vmax.f32 %v597_v61, 0.0  ;;  %v1021_v4 = vmax.f32 %v744_v63, 0.0 }
  0xe8   :  { %v305_v5 = vpop.f32.mrf.mxu0  ;;  %v452_v6 = vpop.f32.mrf.mxu1 }
  0xe9   :  { %v1119_v9 = vmax.f32 %v972_v3, %v1021_v4  ;;  %646 = vmatmul.f32.gmra.mxu2 %v168_v0  ;;  %793 = vmatmul.f32.gmra.mxu3 %v217_v1  ;;  %v306_v10 = vadd.f32 %v3315_v16, %v305_v5  ;;  %v453_v11 = vadd.f32 %v3315_v16, %v452_v6  ;;  %v220_v3 = vld [vmem:[%s5136_s0 + $0x578] sm:$0xff] }
  0xeb   :  { %v3491_v12 = vmax.f32 %v1070_v2, %v1119_v9  ;;  %v875_v14 = vmax.f32 %v306_v10, 0.0  ;;  %v924_v15 = vmax.f32 %v453_v11, 0.0  ;;  %352 = vmatmul.f32.gmra.mxu0 %v70_v7  ;;  %499 = vmatmul.f32.gmra.mxu1 %v119_v8  ;;  %v171_v2 = vld [vmem:[%s5136_s0 + $0x3f0] sm:$0xff]  ;;  %v73_v9 = vld [vmem:[%s5136_s0 + $0xe0] sm:$0xff]  ;;  %v122_v10 = vld [vmem:[%s5136_s0 + $0x268] sm:$0xff] }
  0xec   :  { %v599_v17 = vpop.f32.mrf.mxu2  ;;  %v746_v19 = vpop.f32.mrf.mxu3 }
  0xed   :  { %5239 = vst [vmem:[#allocation13_spill] sm:$0xff] %v3491_v12  ;;  %v600_v20 = vadd.f32 %v3315_v16, %v599_v17  ;;  %v747_v21 = vadd.f32 %v3315_v16, %v746_v19  ;;  %v1071_v24 = vmax.f32 %v875_v14, %v924_v15 }
  0xef   :  { %v973_v25 = vmax.f32 %v600_v20, 0.0  ;;  %v1022_v26 = vmax.f32 %v747_v21, 0.0 }
  0xf0   :  { %v308_v27 = vpop.f32.mrf.mxu0  ;;  %v455_v28 = vpop.f32.mrf.mxu1 }
  0xf1   :  { %v1120_v31 = vmax.f32 %v973_v25, %v1022_v26  ;;  %649 = vmatmul.f32.gmra.mxu2 %v169_v22  ;;  %796 = vmatmul.f32.gmra.mxu3 %v218_v23  ;;  %v309_v32 = vadd.f32 %v3315_v16, %v308_v27  ;;  %v456_v33 = vadd.f32 %v3315_v16, %v455_v28  ;;  %v172_v25 = vld [vmem:[%s5136_s0 + $0x3f8] sm:$0xff]  ;;  %v221_v26 = vld [vmem:[%s5136_s0 + $0x580] sm:$0xff] }
  0xf3   :  { %v3509_v35 = vmax.f32 %v1071_v24, %v1120_v31  ;;  %v876_v36 = vmax.f32 %v309_v32, 0.0  ;;  %v925_v38 = vmax.f32 %v456_v33, 0.0  ;;  %355 = vmatmul.f32.gmra.mxu0 %v71_v29  ;;  %502 = vmatmul.f32.gmra.mxu1 %v120_v30  ;;  %v74_v32 = vld [vmem:[%s5136_s0 + $0xe8] sm:$0xff]  ;;  %v123_v33 = vld [vmem:[%s5136_s0 + $0x270] sm:$0xff] }
  0xf4   :  { %v602_v39 = vpop.f32.mrf.mxu2  ;;  %v749_v40 = vpop.f32.mrf.mxu3 }
  0xf5   :  { %5240 = vst [vmem:[#allocation14_spill] sm:$0xff] %v3509_v35  ;;  %v603_v41 = vadd.f32 %v3315_v16, %v602_v39  ;;  %v750_v42 = vadd.f32 %v3315_v16, %v749_v40  ;;  %v1072_v46 = vmax.f32 %v876_v36, %v925_v38 }
  0xf7   :  { %v974_v47 = vmax.f32 %v603_v41, 0.0  ;;  %v1023_v48 = vmax.f32 %v750_v42, 0.0 }
  0xf8   :  { %v311_v49 = vpop.f32.mrf.mxu0  ;;  %v458_v50 = vpop.f32.mrf.mxu1 }
  0xf9   :  { %v1121_v53 = vmax.f32 %v974_v47, %v1023_v48  ;;  %652 = vmatmul.f32.gmra.mxu2 %v170_v44  ;;  %799 = vmatmul.f32.gmra.mxu3 %v219_v45  ;;  %v312_v54 = vadd.f32 %v3315_v16, %v311_v49  ;;  %v459_v56 = vadd.f32 %v3315_v16, %v458_v50  ;;  %v173_v48 = vld [vmem:[%s5136_s0 + $0x400] sm:$0xff]  ;;  %v222_v49 = vld [vmem:[%s5136_s0 + $0x588] sm:$0xff] }
  0xfb   :  { %v3527_v58 = vmax.f32 %v1072_v46, %v1121_v53  ;;  %v877_v59 = vmax.f32 %v312_v54, 0.0  ;;  %v926_v60 = vmax.f32 %v459_v56, 0.0  ;;  %358 = vmatmul.f32.gmra.mxu0 %v72_v51  ;;  %505 = vmatmul.f32.gmra.mxu1 %v121_v52  ;;  %v75_v56 = vld [vmem:[%s5136_s0 + $0xf0] sm:$0xff] }
  0xfc   :  { %v605_v61 = vpop.f32.mrf.mxu2  ;;  %v752_v63 = vpop.f32.mrf.mxu3 }
  0xfd   :  { %5241 = vst [vmem:[#allocation15_spill] sm:$0xff] %v3527_v58  ;;  %v606_v0 = vadd.f32 %v3315_v16, %v605_v61  ;;  %v753_v1 = vadd.f32 %v3315_v16, %v752_v63  ;;  %v1073_v4 = vmax.f32 %v877_v59, %v926_v60  ;;  %v124_v59 = vld [vmem:[%s5136_s0 + $0x278] sm:$0xff] }
  0xff   :  { %v975_v5 = vmax.f32 %v606_v0, 0.0  ;;  %v1024_v6 = vmax.f32 %v753_v1, 0.0 }
 0x100   :  { %v314_v7 = vpop.f32.mrf.mxu0  ;;  %v461_v8 = vpop.f32.mrf.mxu1 }
 0x101   :  { %v1122_v11 = vmax.f32 %v975_v5, %v1024_v6  ;;  %655 = vmatmul.f32.gmra.mxu2 %v171_v2  ;;  %802 = vmatmul.f32.gmra.mxu3 %v220_v3  ;;  %v315_v14 = vadd.f32 %v3315_v16, %v314_v7  ;;  %v462_v15 = vadd.f32 %v3315_v16, %v461_v8  ;;  %v174_v7 = vld [vmem:[%s5136_s0 + $0x408] sm:$0xff]  ;;  %v223_v8 = vld [vmem:[%s5136_s0 + $0x590] sm:$0xff] }
 0x103   :  { %v3545_v17 = vmax.f32 %v1073_v4, %v1122_v11  ;;  %v878_v19 = vmax.f32 %v315_v14, 0.0  ;;  %v927_v20 = vmax.f32 %v462_v15, 0.0  ;;  %361 = vmatmul.f32.gmra.mxu0 %v73_v9  ;;  %508 = vmatmul.f32.gmra.mxu1 %v122_v10 }
 0x104   :  { %v608_v21 = vpop.f32.mrf.mxu2  ;;  %v755_v22 = vpop.f32.mrf.mxu3 }
 0x105   :  { %5242 = vst [vmem:[#allocation16_spill] sm:$0xff] %v3545_v17  ;;  %v609_v23 = vadd.f32 %v3315_v16, %v608_v21  ;;  %v756_v24 = vadd.f32 %v3315_v16, %v755_v22  ;;  %v1074_v27 = vmax.f32 %v878_v19, %v927_v20  ;;  %v76_v19 = vld [vmem:[%s5136_s0 + $0xf8] sm:$0xff]  ;;  %v125_v20 = vld [vmem:[%s5136_s0 + $0x280] sm:$0xff] }
 0x107   :  { %v976_v28 = vmax.f32 %v609_v23, 0.0  ;;  %v1025_v29 = vmax.f32 %v756_v24, 0.0 }
 0x108   :  { %v317_v30 = vpop.f32.mrf.mxu0  ;;  %v464_v31 = vpop.f32.mrf.mxu1 }
 0x109   :  { %v1123_v36 = vmax.f32 %v976_v28, %v1025_v29  ;;  %658 = vmatmul.f32.gmra.mxu2 %v172_v25  ;;  %805 = vmatmul.f32.gmra.mxu3 %v221_v26  ;;  %v318_v38 = vadd.f32 %v3315_v16, %v317_v30  ;;  %v465_v39 = vadd.f32 %v3315_v16, %v464_v31  ;;  %v175_v31 = vld [vmem:[%s5136_s0 + $0x410] sm:$0xff] }
 0x10b   :  { %v3563_v40 = vmax.f32 %v1074_v27, %v1123_v36  ;;  %v879_v41 = vmax.f32 %v318_v38, 0.0  ;;  %v928_v42 = vmax.f32 %v465_v39, 0.0  ;;  %364 = vmatmul.f32.gmra.mxu0 %v74_v32  ;;  %511 = vmatmul.f32.gmra.mxu1 %v123_v33  ;;  %v224_v32 = vld [vmem:[%s5136_s0 + $0x598] sm:$0xff] }
 0x10c   :  { %v611_v44 = vpop.f32.mrf.mxu2  ;;  %v758_v45 = vpop.f32.mrf.mxu3 }
 0x10d   :  { %5243 = vst [vmem:[#allocation17_spill] sm:$0xff] %v3563_v40  ;;  %v612_v46 = vadd.f32 %v3315_v16, %v611_v44  ;;  %v759_v47 = vadd.f32 %v3315_v16, %v758_v45  ;;  %v1075_v50 = vmax.f32 %v879_v41, %v928_v42  ;;  %v77_v42 = vld [vmem:[%s5136_s0 + $0x100] sm:$0xff]  ;;  %v126_v44 = vld [vmem:[%s5136_s0 + $0x288] sm:$0xff] }
 0x10f   :  { %v977_v51 = vmax.f32 %v612_v46, 0.0  ;;  %v1026_v52 = vmax.f32 %v759_v47, 0.0 }
 0x110   :  { %v320_v53 = vpop.f32.mrf.mxu0  ;;  %v467_v54 = vpop.f32.mrf.mxu1 }
 0x111   :  { %v1124_v60 = vmax.f32 %v977_v51, %v1026_v52  ;;  %661 = vmatmul.f32.gmra.mxu2 %v173_v48  ;;  %808 = vmatmul.f32.gmra.mxu3 %v222_v49  ;;  %v321_v61 = vadd.f32 %v3315_v16, %v320_v53  ;;  %v468_v63 = vadd.f32 %v3315_v16, %v467_v54 }
 0x113   :  { %v3581_v0 = vmax.f32 %v1075_v50, %v1124_v60  ;;  %v880_v1 = vmax.f32 %v321_v61, 0.0  ;;  %v929_v2 = vmax.f32 %v468_v63, 0.0  ;;  %367 = vmatmul.f32.gmra.mxu0 %v75_v56  ;;  %514 = vmatmul.f32.gmra.mxu1 %v124_v59  ;;  %v176_v56 = vld [vmem:[%s5136_s0 + $0x418] sm:$0xff]  ;;  %v225_v59 = vld [vmem:[%s5136_s0 + $0x5a0] sm:$0xff] }
 0x114   :  { %v614_v3 = vpop.f32.mrf.mxu2  ;;  %v761_v4 = vpop.f32.mrf.mxu3 }
 0x115   :  { %5244 = vst [vmem:[#allocation18_spill] sm:$0xff] %v3581_v0  ;;  %v615_v5 = vadd.f32 %v3315_v16, %v614_v3  ;;  %v762_v6 = vadd.f32 %v3315_v16, %v761_v4  ;;  %v1076_v9 = vmax.f32 %v880_v1, %v929_v2  ;;  %v78_v3 = vld [vmem:[%s5136_s0 + $0x108] sm:$0xff]  ;;  %v127_v4 = vld [vmem:[%s5136_s0 + $0x290] sm:$0xff] }
 0x117   :  { %v978_v10 = vmax.f32 %v615_v5, 0.0  ;;  %v1027_v11 = vmax.f32 %v762_v6, 0.0 }
 0x118   :  { %v323_v14 = vpop.f32.mrf.mxu0  ;;  %v470_v15 = vpop.f32.mrf.mxu1 }
 0x119   :  { %v1125_v21 = vmax.f32 %v978_v10, %v1027_v11  ;;  %664 = vmatmul.f32.gmra.mxu2 %v174_v7  ;;  %811 = vmatmul.f32.gmra.mxu3 %v223_v8  ;;  %v324_v22 = vadd.f32 %v3315_v16, %v323_v14  ;;  %v471_v23 = vadd.f32 %v3315_v16, %v470_v15 }
 0x11b   :  { %v3599_v24 = vmax.f32 %v1076_v9, %v1125_v21  ;;  %v881_v25 = vmax.f32 %v324_v22, 0.0  ;;  %v930_v26 = vmax.f32 %v471_v23, 0.0  ;;  %370 = vmatmul.f32.gmra.mxu0 %v76_v19  ;;  %517 = vmatmul.f32.gmra.mxu1 %v125_v20  ;;  %v177_v20 = vld [vmem:[%s5136_s0 + $0x420] sm:$0xff]  ;;  %v226_v21 = vld [vmem:[%s5136_s0 + $0x5a8] sm:$0xff] }
 0x11c   :  { %v617_v27 = vpop.f32.mrf.mxu2  ;;  %v764_v28 = vpop.f32.mrf.mxu3 }
 0x11d   :  { %5245 = vst [vmem:[#allocation19_spill] sm:$0xff] %v3599_v24  ;;  %v618_v29 = vadd.f32 %v3315_v16, %v617_v27  ;;  %v765_v30 = vadd.f32 %v3315_v16, %v764_v28  ;;  %v1077_v33 = vmax.f32 %v881_v25, %v930_v26  ;;  %v79_v28 = vld [vmem:[%s5136_s0 + $0x110] sm:$0xff] }
 0x11f   :  { %v979_v36 = vmax.f32 %v618_v29, 0.0  ;;  %v1028_v38 = vmax.f32 %v765_v30, 0.0  ;;  %v128_v29 = vld [vmem:[%s5136_s0 + $0x298] sm:$0xff] }
 0x120   :  { %v326_v39 = vpop.f32.mrf.mxu0  ;;  %v473_v41 = vpop.f32.mrf.mxu1 }
 0x121   :  { %v1126_v45 = vmax.f32 %v979_v36, %v1028_v38  ;;  %667 = vmatmul.f32.gmra.mxu2 %v175_v31  ;;  %814 = vmatmul.f32.gmra.mxu3 %v224_v32  ;;  %v327_v46 = vadd.f32 %v3315_v16, %v326_v39  ;;  %v474_v47 = vadd.f32 %v3315_v16, %v473_v41 }
 0x123   :  { %v3617_v48 = vmax.f32 %v1077_v33, %v1126_v45  ;;  %v882_v49 = vmax.f32 %v327_v46, 0.0  ;;  %v931_v50 = vmax.f32 %v474_v47, 0.0  ;;  %373 = vmatmul.f32.gmra.mxu0 %v77_v42  ;;  %520 = vmatmul.f32.gmra.mxu1 %v126_v44  ;;  %v178_v45 = vld [vmem:[%s5136_s0 + $0x428] sm:$0xff]  ;;  %v227_v46 = vld [vmem:[%s5136_s0 + $0x5b0] sm:$0xff] }
 0x124   :  { %v620_v51 = vpop.f32.mrf.mxu2  ;;  %v767_v52 = vpop.f32.mrf.mxu3 }
 0x125   :  { %5246 = vst [vmem:[#allocation20_spill] sm:$0xff] %v3617_v48  ;;  %v621_v53 = vadd.f32 %v3315_v16, %v620_v51  ;;  %v768_v54 = vadd.f32 %v3315_v16, %v767_v52  ;;  %v3627_v60 = vmax.f32 %v882_v49, %v931_v50 }
 0x127   :  { %5247 = vst [vmem:[#allocation21_spill] sm:$0xff] %v3627_v60  ;;  %v980_v61 = vmax.f32 %v621_v53, 0.0  ;;  %v1029_v63 = vmax.f32 %v768_v54, 0.0  ;;  %v80_v53 = vld [vmem:[%s5136_s0 + $0x118] sm:$0xff]  ;;  %v129_v54 = vld [vmem:[%s5136_s0 + $0x2a0] sm:$0xff] }
 0x128   :  { %v329_v1 = vpop.f32.mrf.mxu0  ;;  %v476_v2 = vpop.f32.mrf.mxu1 }
 0x129   :  { %v3635_v5 = vmax.f32 %v980_v61, %v1029_v63  ;;  %670 = vmatmul.f32.gmra.mxu2 %v176_v56  ;;  %817 = vmatmul.f32.gmra.mxu3 %v225_v59  ;;  %v330_v6 = vadd.f32 %v3315_v16, %v329_v1  ;;  %v477_v7 = vadd.f32 %v3315_v16, %v476_v2 }
 0x12b   :  { %5248 = vst [vmem:[#allocation22_spill] sm:$0xff] %v3635_v5  ;;  %v883_v9 = vmax.f32 %v330_v6, 0.0  ;;  %v932_v10 = vmax.f32 %v477_v7, 0.0  ;;  %376 = vmatmul.f32.gmra.mxu0 %v78_v3  ;;  %523 = vmatmul.f32.gmra.mxu1 %v127_v4 }
 0x12c   :  { %v623_v11 = vpop.f32.mrf.mxu2  ;;  %v770_v14 = vpop.f32.mrf.mxu3 }
 0x12d   :  { %v624_v15 = vadd.f32 %v3315_v16, %v623_v11  ;;  %v771_v19 = vadd.f32 %v3315_v16, %v770_v14  ;;  %v3649_v22 = vmax.f32 %v883_v9, %v932_v10  ;;  %v179_v9 = vld [vmem:[%s5136_s0 + $0x430] sm:$0xff]  ;;  %v228_v10 = vld [vmem:[%s5136_s0 + $0x5b8] sm:$0xff] }
 0x12f   :  { %5249 = vst [vmem:[#allocation23_spill] sm:$0xff] %v3649_v22  ;;  %v981_v23 = vmax.f32 %v624_v15, 0.0  ;;  %v1030_v25 = vmax.f32 %v771_v19, 0.0 }
 0x130   :  { %v332_v26 = vpop.f32.mrf.mxu0  ;;  %v479_v27 = vpop.f32.mrf.mxu1 }
 0x131   :  { %v3657_v30 = vmax.f32 %v981_v23, %v1030_v25  ;;  %673 = vmatmul.f32.gmra.mxu2 %v177_v20  ;;  %820 = vmatmul.f32.gmra.mxu3 %v226_v21  ;;  %v333_v31 = vadd.f32 %v3315_v16, %v332_v26  ;;  %v480_v32 = vadd.f32 %v3315_v16, %v479_v27  ;;  %v81_v21 = vld [vmem:[%s5136_s0 + $0x120] sm:$0xff]  ;;  %v130_v23 = vld [vmem:[%s5136_s0 + $0x2a8] sm:$0xff] }
 0x133   :  { %5250 = vst [vmem:[#allocation24_spill] sm:$0xff] %v3657_v30  ;;  %v884_v36 = vmax.f32 %v333_v31, 0.0  ;;  %v933_v38 = vmax.f32 %v480_v32, 0.0  ;;  %379 = vmatmul.f32.gmra.mxu0 %v79_v28  ;;  %526 = vmatmul.f32.gmra.mxu1 %v128_v29 }
 0x134   :  { %v626_v39 = vpop.f32.mrf.mxu2  ;;  %v773_v41 = vpop.f32.mrf.mxu3 }
 0x135   :  { %v627_v42 = vadd.f32 %v3315_v16, %v626_v39  ;;  %v774_v44 = vadd.f32 %v3315_v16, %v773_v41  ;;  %v3671_v47 = vmax.f32 %v884_v36, %v933_v38  ;;  %v180_v41 = vld [vmem:[%s5136_s0 + $0x438] sm:$0xff] }
 0x137   :  { %5251 = vst [vmem:[#allocation25_spill] sm:$0xff] %v3671_v47  ;;  %v982_v49 = vmax.f32 %v627_v42, 0.0  ;;  %v1031_v50 = vmax.f32 %v774_v44, 0.0  ;;  %v229_v42 = vld [vmem:[%s5136_s0 + $0x5c0] sm:$0xff] }
 0x138   :  { %v335_v51 = vpop.f32.mrf.mxu0  ;;  %v482_v52 = vpop.f32.mrf.mxu1 }
 0x139   :  { %v3679_v56 = vmax.f32 %v982_v49, %v1031_v50  ;;  %676 = vmatmul.f32.gmra.mxu2 %v178_v45  ;;  %823 = vmatmul.f32.gmra.mxu3 %v227_v46  ;;  %v336_v59 = vadd.f32 %v3315_v16, %v335_v51  ;;  %v483_v61 = vadd.f32 %v3315_v16, %v482_v52  ;;  %v82_v51 = vld [vmem:[%s5136_s0 + $0x128] sm:$0xff]  ;;  %v131_v52 = vld [vmem:[%s5136_s0 + $0x2b0] sm:$0xff] }
 0x13b   :  { %5252 = vst [vmem:[#allocation26_spill] sm:$0xff] %v3679_v56  ;;  %v885_v1 = vmax.f32 %v336_v59, 0.0  ;;  %v934_v2 = vmax.f32 %v483_v61, 0.0  ;;  %382 = vmatmul.f32.gmra.mxu0 %v80_v53  ;;  %529 = vmatmul.f32.gmra.mxu1 %v129_v54 }
 0x13c   :  { %v629_v3 = vpop.f32.mrf.mxu2  ;;  %v776_v4 = vpop.f32.mrf.mxu3 }
 0x13d   :  { %v630_v6 = vadd.f32 %v3315_v16, %v629_v3  ;;  %v777_v7 = vadd.f32 %v3315_v16, %v776_v4  ;;  %v3693_v11 = vmax.f32 %v885_v1, %v934_v2 }
 0x13f   :  { %5253 = vst [vmem:[#allocation27_spill] sm:$0xff] %v3693_v11  ;;  %v983_v14 = vmax.f32 %v630_v6, 0.0  ;;  %v1032_v15 = vmax.f32 %v777_v7, 0.0 }
 0x140   :  { %v338_v19 = vpop.f32.mrf.mxu0  ;;  %v485_v20 = vpop.f32.mrf.mxu1 }
 0x141   :  { %v3701_v25 = vmax.f32 %v983_v14, %v1032_v15  ;;  %679 = vmatmul.f32.gmra.mxu2 %v179_v9  ;;  %826 = vmatmul.f32.gmra.mxu3 %v228_v10  ;;  %v339_v26 = vadd.f32 %v3315_v16, %v338_v19  ;;  %v486_v27 = vadd.f32 %v3315_v16, %v485_v20  ;;  %v181_v9 = vld [vmem:[%s5136_s0 + $0x440] sm:$0xff]  ;;  %v230_v10 = vld [vmem:[%s5136_s0 + $0x5c8] sm:$0xff] }
 0x143   :  { %5254 = vst [vmem:[#allocation28_spill] sm:$0xff] %v3701_v25  ;;  %v886_v29 = vmax.f32 %v339_v26, 0.0  ;;  %v935_v31 = vmax.f32 %v486_v27, 0.0  ;;  %385 = vmatmul.f32.gmra.mxu0 %v81_v21  ;;  %532 = vmatmul.f32.gmra.mxu1 %v130_v23  ;;  %v83_v23 = vld [vmem:[%s5136_s0 + $0x130] sm:$0xff]  ;;  %v3750_v27 = vld [vmem:[%s5138_s2] ss:$0 sm:$0xff] }
 0x144   :  { %v632_v32 = vpop.f32.mrf.mxu2  ;;  %v779_v36 = vpop.f32.mrf.mxu3 }
 0x145   :  { %v633_v38 = vadd.f32 %v3315_v16, %v632_v32  ;;  %v780_v39 = vadd.f32 %v3315_v16, %v779_v36  ;;  %v3715_v44 = vmax.f32 %v886_v29, %v935_v31 }
 0x147   :  { %5255 = vst [vmem:[#allocation29_spill] sm:$0xff] %v3715_v44  ;;  %v984_v45 = vmax.f32 %v633_v38, 0.0  ;;  %v1033_v46 = vmax.f32 %v780_v39, 0.0 }
 0x148   :  { %v341_v49 = vpop.f32.mrf.mxu0  ;;  %v488_v50 = vpop.f32.mrf.mxu1 }
 0x149   :  { %v3723_v53 = vmax.f32 %v984_v45, %v1033_v46  ;;  %682 = vmatmul.f32.gmra.mxu2 %v180_v41  ;;  %829 = vmatmul.f32.gmra.mxu3 %v229_v42  ;;  %v342_v54 = vadd.f32 %v3315_v16, %v341_v49  ;;  %v489_v59 = vadd.f32 %v3315_v16, %v488_v50  ;;  %v182_v46 = vld [vmem:[%s5136_s0 + $0x448] sm:$0xff]  ;;  %v231_v49 = vld [vmem:[%s5136_s0 + $0x5d0] sm:$0xff] }
 0x14b   :  { %5256 = vst [vmem:[#allocation30_spill] sm:$0xff] %v3723_v53  ;;  %v887_v1 = vmax.f32 %v342_v54, 0.0  ;;  %v936_v2 = vmax.f32 %v489_v59, 0.0  ;;  %388 = vmatmul.f32.gmra.mxu0 %v82_v51  ;;  %535 = vmatmul.f32.gmra.mxu1 %v131_v52 }
 0x14c   :  { %v635_v3 = vpop.f32.mrf.mxu2  ;;  %v782_v4 = vpop.f32.mrf.mxu3 }
 0x14d   :  { %v636_v6 = vadd.f32 %v3315_v16, %v635_v3  ;;  %v783_v7 = vadd.f32 %v3315_v16, %v782_v4  ;;  %v3737_v14 = vmax.f32 %v887_v1, %v936_v2  ;;  %v132_v16 = vld [vmem:[%s5136_s0 + $0x2b8] sm:$0xff]  ;;  %v133_v2 = vld [vmem:[%s5136_s0 + $0x2c0] sm:$0xff] }
 0x14e   :  { %v84_v1 = vld [vmem:[%s5136_s0 + $0x138] sm:$0xff] }
 0x14f   :  { %5257 = vst [vmem:[#allocation31_spill] sm:$0xff] %v3737_v14  ;;  %v985_v15 = vmax.f32 %v636_v6, 0.0  ;;  %v1034_v19 = vmax.f32 %v783_v7, 0.0 }
 0x150   :  { %v344_v20 = vpop.f32.mrf.mxu0  ;;  %v491_v21 = vpop.f32.mrf.mxu1 }
 0x151   :  { %v3745_v26 = vmax.f32 %v985_v15, %v1034_v19  ;;  %685 = vmatmul.f32.gmra.mxu2 %v181_v9  ;;  %832 = vmatmul.f32.gmra.mxu3 %v230_v10  ;;  %v345_v29 = vadd.f32 %v3750_v27, %v344_v20  ;;  %v492_v31 = vadd.f32 %v3750_v27, %v491_v21 }
 0x153   :  { %5258 = vst [vmem:[#allocation32_spill] sm:$0xff] %v3745_v26  ;;  %v888_v36 = vmax.f32 %v345_v29, 0.0  ;;  %v937_v38 = vmax.f32 %v492_v31, 0.0  ;;  %391 = vmatmul.f32.gmra.mxu0 %v83_v23  ;;  %538 = vmatmul.f32.gmra.mxu1 %v132_v16  ;;  %v183_v23 = vld [vmem:[%s5136_s0 + $0x450] sm:$0xff]  ;;  %v232_v16 = vld [vmem:[%s5136_s0 + $0x5d8] sm:$0xff] }
 0x154   :  { %v638_v39 = vpop.f32.mrf.mxu2  ;;  %v785_v41 = vpop.f32.mrf.mxu3 }
 0x155   :  { %v639_v42 = vadd.f32 %v3750_v27, %v638_v39  ;;  %v786_v45 = vadd.f32 %v3750_v27, %v785_v41  ;;  %v3764_v50 = vmax.f32 %v888_v36, %v937_v38  ;;  %v85_v41 = vld [vmem:[%s5136_s0 + $0x140] sm:$0xff] }
 0x157   :  { %5259 = vst [vmem:[#allocation33_spill] sm:$0xff] %v3764_v50  ;;  %v986_v51 = vmax.f32 %v639_v42, 0.0  ;;  %v1035_v52 = vmax.f32 %v786_v45, 0.0  ;;  %v134_v42 = vld [vmem:[%s5136_s0 + $0x2c8] sm:$0xff] }
 0x158   :  { %v347_v54 = vpop.f32.mrf.mxu0  ;;  %v494_v59 = vpop.f32.mrf.mxu1 }
 0x159   :  { %v3772_v3 = vmax.f32 %v986_v51, %v1035_v52  ;;  %688 = vmatmul.f32.gmra.mxu2 %v182_v46  ;;  %835 = vmatmul.f32.gmra.mxu3 %v231_v49  ;;  %v348_v4 = vadd.f32 %v3750_v27, %v347_v54  ;;  %v495_v6 = vadd.f32 %v3750_v27, %v494_v59 }
 0x15b   :  { %5260 = vst [vmem:[#allocation34_spill] sm:$0xff] %v3772_v3  ;;  %v889_v9 = vmax.f32 %v348_v4, 0.0  ;;  %v938_v10 = vmax.f32 %v495_v6, 0.0  ;;  %394 = vmatmul.f32.gmra.mxu0 %v84_v1  ;;  %541 = vmatmul.f32.gmra.mxu1 %v133_v2  ;;  %v184_v6 = vld [vmem:[%s5136_s0 + $0x458] sm:$0xff] }
 0x15c   :  { %v641_v15 = vpop.f32.mrf.mxu2  ;;  %v788_v19 = vpop.f32.mrf.mxu3 }
 0x15d   :  { %v642_v20 = vadd.f32 %v3750_v27, %v641_v15  ;;  %v789_v21 = vadd.f32 %v3750_v27, %v788_v19  ;;  %v3786_v29 = vmax.f32 %v889_v9, %v938_v10  ;;  %v233_v9 = vld [vmem:[%s5136_s0 + $0x5e0] sm:$0xff] }
 0x15f   :  { %5261 = vst [vmem:[#allocation35_spill] sm:$0xff] %v3786_v29  ;;  %v987_v31 = vmax.f32 %v642_v20, 0.0  ;;  %v1036_v36 = vmax.f32 %v789_v21, 0.0 }
 0x160   :  { %v350_v38 = vpop.f32.mrf.mxu0  ;;  %v497_v39 = vpop.f32.mrf.mxu1 }
 0x161   :  { %v3794_v45 = vmax.f32 %v987_v31, %v1036_v36  ;;  %691 = vmatmul.f32.gmra.mxu2 %v183_v23  ;;  %838 = vmatmul.f32.gmra.mxu3 %v232_v16  ;;  %v351_v46 = vadd.f32 %v3750_v27, %v350_v38  ;;  %v498_v49 = vadd.f32 %v3750_v27, %v497_v39  ;;  %v86_v23 = vld [vmem:[%s5136_s0 + $0x148] sm:$0xff]  ;;  %v135_v16 = vld [vmem:[%s5136_s0 + $0x2d0] sm:$0xff] }
 0x163   :  { %5262 = vst [vmem:[#allocation36_spill] sm:$0xff] %v3794_v45  ;;  %v890_v52 = vmax.f32 %v351_v46, 0.0  ;;  %v939_v54 = vmax.f32 %v498_v49, 0.0  ;;  %397 = vmatmul.f32.gmra.mxu0 %v85_v41  ;;  %544 = vmatmul.f32.gmra.mxu1 %v134_v42 }
 0x164   :  { %v644_v59 = vpop.f32.mrf.mxu2  ;;  %v791_v1 = vpop.f32.mrf.mxu3 }
 0x165   :  { %v645_v2 = vadd.f32 %v3750_v27, %v644_v59  ;;  %v792_v4 = vadd.f32 %v3750_v27, %v791_v1  ;;  %v3808_v10 = vmax.f32 %v890_v52, %v939_v54  ;;  %v185_v1 = vld [vmem:[%s5136_s0 + $0x460] sm:$0xff] }
 0x167   :  { %5263 = vst [vmem:[#allocation37_spill] sm:$0xff] %v3808_v10  ;;  %v988_v15 = vmax.f32 %v645_v2, 0.0  ;;  %v1037_v19 = vmax.f32 %v792_v4, 0.0  ;;  %v234_v2 = vld [vmem:[%s5136_s0 + $0x5e8] sm:$0xff]  ;;  %v4176_v10 = vmov 0.0  }
 0x168   :  { %v353_v20 = vpop.f32.mrf.mxu0  ;;  %v500_v21 = vpop.f32.mrf.mxu1 }
 0x169   :  { %v3816_v31 = vmax.f32 %v988_v15, %v1037_v19  ;;  %694 = vmatmul.f32.gmra.mxu2 %v184_v6  ;;  %841 = vmatmul.f32.gmra.mxu3 %v233_v9  ;;  %v354_v36 = vadd.f32 %v3750_v27, %v353_v20  ;;  %v501_v38 = vadd.f32 %v3750_v27, %v500_v21  ;;  %v87_v19 = vld [vmem:[%s5136_s0 + $0x150] sm:$0xff]  ;;  %v136_v20 = vld [vmem:[%s5136_s0 + $0x2d8] sm:$0xff] }
 0x16b   :  { %5264 = vst [vmem:[#allocation38_spill] sm:$0xff] %v3816_v31  ;;  %v891_v41 = vmax.f32 %v354_v36, 0.0  ;;  %v940_v42 = vmax.f32 %v501_v38, 0.0  ;;  %400 = vmatmul.f32.gmra.mxu0 %v86_v23  ;;  %547 = vmatmul.f32.gmra.mxu1 %v135_v16  ;;  %v4174_v31 = vmov 0.0  }
 0x16c   :  { %v647_v46 = vpop.f32.mrf.mxu2  ;;  %v794_v49 = vpop.f32.mrf.mxu3 }
 0x16d   :  { %v3822_v52 = vmax.f32 %v891_v41, %v940_v42  ;;  %v648_v54 = vadd.f32 %v3750_v27, %v647_v46  ;;  %v795_v59 = vadd.f32 %v3750_v27, %v794_v49 }
 0x16f   :  { %5265 = vst [vmem:[#allocation39_spill] sm:$0xff] %v3822_v52  ;;  %v989_v4 = vmax.f32 %v648_v54, 0.0  ;;  %v1038_v6 = vmax.f32 %v795_v59, 0.0  ;;  %v4184_v52 = vmov 0.0  }
 0x170   :  { %v356_v9 = vpop.f32.mrf.mxu0  ;;  %v503_v15 = vpop.f32.mrf.mxu1 }
 0x171   :  { %v3838_v21 = vmax.f32 %v989_v4, %v1038_v6  ;;  %697 = vmatmul.f32.gmra.mxu2 %v185_v1  ;;  %844 = vmatmul.f32.gmra.mxu3 %v234_v2  ;;  %v357_v23 = vadd.f32 %v3750_v27, %v356_v9  ;;  %v504_v16 = vadd.f32 %v3750_v27, %v503_v15  ;;  %v186_v1 = vld [vmem:[%s5136_s0 + $0x468] sm:$0xff]  ;;  %v235_v2 = vld [vmem:[%s5136_s0 + $0x5f0] sm:$0xff] }
 0x173   :  { %5266 = vst [vmem:[#allocation40_spill] sm:$0xff] %v3838_v21  ;;  %v892_v38 = vmax.f32 %v357_v23, 0.0  ;;  %v941_v41 = vmax.f32 %v504_v16, 0.0  ;;  %403 = vmatmul.f32.gmra.mxu0 %v87_v19  ;;  %550 = vmatmul.f32.gmra.mxu1 %v136_v20  ;;  %v88_v19 = vld [vmem:[%s5136_s0 + $0x158] sm:$0xff]  ;;  %v137_v20 = vld [vmem:[%s5136_s0 + $0x2e0] sm:$0xff]  ;;  %v4182_v21 = vmov 0.0  }
 0x174   :  { %v650_v42 = vpop.f32.mrf.mxu2  ;;  %v797_v46 = vpop.f32.mrf.mxu3 }
 0x175   :  { %v3844_v49 = vmax.f32 %v892_v38, %v941_v41  ;;  %v651_v54 = vadd.f32 %v3750_v27, %v650_v42  ;;  %v798_v59 = vadd.f32 %v3750_v27, %v797_v46 }
 0x177   :  { %5267 = vst [vmem:[#allocation41_spill] sm:$0xff] %v3844_v49  ;;  %v990_v4 = vmax.f32 %v651_v54, 0.0  ;;  %v1039_v6 = vmax.f32 %v798_v59, 0.0  ;;  %v4192_v49 = vmov 0.0  }
 0x178   :  { %v359_v9 = vpop.f32.mrf.mxu0  ;;  %v506_v15 = vpop.f32.mrf.mxu1 }
 0x179   :  { %v3860_v23 = vmax.f32 %v990_v4, %v1039_v6  ;;  %700 = vmatmul.f32.gmra.mxu2 %v186_v1  ;;  %847 = vmatmul.f32.gmra.mxu3 %v235_v2  ;;  %v360_v16 = vadd.f32 %v3750_v27, %v359_v9  ;;  %v507_v38 = vadd.f32 %v3750_v27, %v506_v15  ;;  %v187_v2 = vld [vmem:[%s5136_s0 + $0x470] sm:$0xff]  ;;  %v236_v6 = vld [vmem:[%s5136_s0 + $0x5f8] sm:$0xff] }
 0x17b   :  { %5268 = vst [vmem:[#allocation42_spill] sm:$0xff] %v3860_v23  ;;  %v893_v42 = vmax.f32 %v360_v16, 0.0  ;;  %v942_v46 = vmax.f32 %v507_v38, 0.0  ;;  %406 = vmatmul.f32.gmra.mxu0 %v88_v19  ;;  %553 = vmatmul.f32.gmra.mxu1 %v137_v20  ;;  %v89_v16 = vld [vmem:[%s5136_s0 + $0x160] sm:$0xff]  ;;  %v138_v38 = vld [vmem:[%s5136_s0 + $0x2e8] sm:$0xff]  ;;  %v4190_v23 = vmov 0.0  }
 0x17c   :  { %v653_v54 = vpop.f32.mrf.mxu2  ;;  %v800_v59 = vpop.f32.mrf.mxu3 }
 0x17d   :  { %v3866_v8 = vmax.f32 %v893_v42, %v942_v46  ;;  %v654_v4 = vadd.f32 %v3750_v27, %v653_v54  ;;  %v801_v1 = vadd.f32 %v3750_v27, %v800_v59 }
 0x17f   :  { %5269 = vst [vmem:[#allocation43_spill] sm:$0xff] %v3866_v8  ;;  %v991_v9 = vmax.f32 %v654_v4, 0.0  ;;  %v1040_v15 = vmax.f32 %v801_v1, 0.0 }
 0x180   :  { %v362_v19 = vpop.f32.mrf.mxu0  ;;  %v509_v20 = vpop.f32.mrf.mxu1 }
 0x181   :  { %v3882_v42 = vmax.f32 %v991_v9, %v1040_v15  ;;  %703 = vmatmul.f32.gmra.mxu2 %v187_v2  ;;  %850 = vmatmul.f32.gmra.mxu3 %v236_v6  ;;  %v363_v46 = vadd.f32 %v3750_v27, %v362_v19  ;;  %v510_v54 = vadd.f32 %v3750_v27, %v509_v20  ;;  %v188_v6 = vld [vmem:[%s5136_s0 + $0x478] sm:$0xff]  ;;  %v237_v15 = vld [vmem:[%s5136_s0 + $0x600] sm:$0xff] }
 0x183   :  { %5270 = vst [vmem:[#allocation44_spill] sm:$0xff] %v3882_v42  ;;  %v894_v4 = vmax.f32 %v363_v46, 0.0  ;;  %v943_v1 = vmax.f32 %v510_v54, 0.0  ;;  %409 = vmatmul.f32.gmra.mxu0 %v89_v16  ;;  %556 = vmatmul.f32.gmra.mxu1 %v138_v38  ;;  %v90_v46 = vld [vmem:[%s5136_s0 + $0x168] sm:$0xff] }
 0x184   :  { %v656_v33 = vpop.f32.mrf.mxu2  ;;  %v803_v63 = vpop.f32.mrf.mxu3 }
 0x185   :  { %v3888_v28 = vmax.f32 %v894_v4, %v943_v1  ;;  %v657_v9 = vadd.f32 %v3750_v27, %v656_v33  ;;  %v804_v2 = vadd.f32 %v3750_v27, %v803_v63  ;;  %v139_v33 = vld [vmem:[%s5136_s0 + $0x2f0] sm:$0xff] }
 0x187   :  { %5271 = vst [vmem:[#allocation45_spill] sm:$0xff] %v3888_v28  ;;  %v992_v19 = vmax.f32 %v657_v9, 0.0  ;;  %v1041_v20 = vmax.f32 %v804_v2, 0.0 }
 0x188   :  { %v365_v16 = vpop.f32.mrf.mxu0  ;;  %v512_v38 = vpop.f32.mrf.mxu1 }
 0x189   :  { %v3904_v63 = vmax.f32 %v992_v19, %v1041_v20  ;;  %706 = vmatmul.f32.gmra.mxu2 %v188_v6  ;;  %853 = vmatmul.f32.gmra.mxu3 %v237_v15  ;;  %v366_v54 = vadd.f32 %v3750_v27, %v365_v16  ;;  %v513_v4 = vadd.f32 %v3750_v27, %v512_v38  ;;  %v189_v15 = vld [vmem:[%s5136_s0 + $0x480] sm:$0xff]  ;;  %v238_v20 = vld [vmem:[%s5136_s0 + $0x608] sm:$0xff] }
 0x18b   :  { %5272 = vst [vmem:[#allocation46_spill] sm:$0xff] %v3904_v63  ;;  %v895_v9 = vmax.f32 %v366_v54, 0.0  ;;  %v944_v2 = vmax.f32 %v513_v4, 0.0  ;;  %412 = vmatmul.f32.gmra.mxu0 %v90_v46  ;;  %559 = vmatmul.f32.gmra.mxu1 %v139_v33  ;;  %v91_v54 = vld [vmem:[%s5136_s0 + $0x170] sm:$0xff] }
 0x18c   :  { %v659_v61 = vpop.f32.mrf.mxu2  ;;  %v806_v32 = vpop.f32.mrf.mxu3 }
 0x18d   :  { %v3910_v7 = vmax.f32 %v895_v9, %v944_v2  ;;  %v660_v19 = vadd.f32 %v3750_v27, %v659_v61  ;;  %v807_v6 = vadd.f32 %v3750_v27, %v806_v32  ;;  %v140_v61 = vld [vmem:[%s5136_s0 + $0x2f8] sm:$0xff] }
 0x18f   :  { %5273 = vst [vmem:[#allocation47_spill] sm:$0xff] %v3910_v7  ;;  %v993_v16 = vmax.f32 %v660_v19, 0.0  ;;  %v1042_v38 = vmax.f32 %v807_v6, 0.0 }
 0x190   :  { %v368_v46 = vpop.f32.mrf.mxu0  ;;  %v515_v33 = vpop.f32.mrf.mxu1 }
 0x191   :  { %v3926_v32 = vmax.f32 %v993_v16, %v1042_v38  ;;  %709 = vmatmul.f32.gmra.mxu2 %v189_v15  ;;  %856 = vmatmul.f32.gmra.mxu3 %v238_v20  ;;  %v369_v4 = vadd.f32 %v3750_v27, %v368_v46  ;;  %v516_v9 = vadd.f32 %v3750_v27, %v515_v33  ;;  %v190_v20 = vld [vmem:[%s5136_s0 + $0x488] sm:$0xff]  ;;  %v239_v38 = vld [vmem:[%s5136_s0 + $0x610] sm:$0xff] }
 0x193   :  { %5274 = vst [vmem:[#allocation48_spill] sm:$0xff] %v3926_v32  ;;  %v896_v19 = vmax.f32 %v369_v4, 0.0  ;;  %v945_v6 = vmax.f32 %v516_v9, 0.0  ;;  %415 = vmatmul.f32.gmra.mxu0 %v91_v54  ;;  %562 = vmatmul.f32.gmra.mxu1 %v140_v61  ;;  %v92_v4 = vld [vmem:[%s5136_s0 + $0x178] sm:$0xff] }
 0x194   :  { %v662_v51 = vpop.f32.mrf.mxu2  ;;  %v809_v39 = vpop.f32.mrf.mxu3 }
 0x195   :  { %v3932_v36 = vmax.f32 %v896_v19, %v945_v6  ;;  %v663_v16 = vadd.f32 %v3750_v27, %v662_v51  ;;  %v810_v15 = vadd.f32 %v3750_v27, %v809_v39  ;;  %v141_v51 = vld [vmem:[%s5136_s0 + $0x300] sm:$0xff] }
 0x197   :  { %5275 = vst [vmem:[#allocation49_spill] sm:$0xff] %v3932_v36  ;;  %v994_v46 = vmax.f32 %v663_v16, 0.0  ;;  %v1043_v33 = vmax.f32 %v810_v15, 0.0 }
 0x198   :  { %v371_v54 = vpop.f32.mrf.mxu0  ;;  %v518_v61 = vpop.f32.mrf.mxu1 }
 0x199   :  { %v3948_v39 = vmax.f32 %v994_v46, %v1043_v33  ;;  %712 = vmatmul.f32.gmra.mxu2 %v190_v20  ;;  %859 = vmatmul.f32.gmra.mxu3 %v239_v38  ;;  %v372_v9 = vadd.f32 %v3750_v27, %v371_v54  ;;  %v519_v19 = vadd.f32 %v3750_v27, %v518_v61  ;;  %v191_v38 = vld [vmem:[%s5136_s0 + $0x490] sm:$0xff]  ;;  %v240_v33 = vld [vmem:[%s5136_s0 + $0x618] sm:$0xff] }
 0x19b   :  { %5276 = vst [vmem:[#allocation50_spill] sm:$0xff] %v3948_v39  ;;  %v897_v16 = vmax.f32 %v372_v9, 0.0  ;;  %v946_v15 = vmax.f32 %v519_v19, 0.0  ;;  %418 = vmatmul.f32.gmra.mxu0 %v92_v4  ;;  %565 = vmatmul.f32.gmra.mxu1 %v141_v51  ;;  %v93_v9 = vld [vmem:[%s5136_s0 + $0x180] sm:$0xff] }
 0x19c   :  { %v665_v41 = vpop.f32.mrf.mxu2  ;;  %v812_v59 = vpop.f32.mrf.mxu3 }
 0x19d   :  { %v3954_v1 = vmax.f32 %v897_v16, %v946_v15  ;;  %v666_v46 = vadd.f32 %v3750_v27, %v665_v41  ;;  %v813_v20 = vadd.f32 %v3750_v27, %v812_v59  ;;  %v142_v41 = vld [vmem:[%s5136_s0 + $0x308] sm:$0xff]  ;;  %s4196_s0 = smov 0  }
 0x19f   :  { %5277 = vst [vmem:[#allocation51_spill] sm:$0xff] %v3954_v1  ;;  %v995_v54 = vmax.f32 %v666_v46, 0.0  ;;  %v1044_v61 = vmax.f32 %v813_v20, 0.0 }
 0x1a0   :  { %v374_v4 = vpop.f32.mrf.mxu0  ;;  %v521_v51 = vpop.f32.mrf.mxu1 }
 0x1a1   :  { %v3970_v59 = vmax.f32 %v995_v54, %v1044_v61  ;;  %715 = vmatmul.f32.gmra.mxu2 %v191_v38  ;;  %862 = vmatmul.f32.gmra.mxu3 %v240_v33  ;;  %v375_v19 = vadd.f32 %v3750_v27, %v374_v4  ;;  %v522_v16 = vadd.f32 %v3750_v27, %v521_v51 }
 0x1a3   :  { %5278 = vst [vmem:[#allocation52_spill] sm:$0xff] %v3970_v59  ;;  %v898_v46 = vmax.f32 %v375_v19, 0.0  ;;  %v947_v20 = vmax.f32 %v522_v16, 0.0  ;;  %421 = vmatmul.f32.gmra.mxu0 %v93_v9  ;;  %568 = vmatmul.f32.gmra.mxu1 %v142_v41 }
 0x1a4   :  { %v668_v2 = vpop.f32.mrf.mxu2  ;;  %v815_v6 = vpop.f32.mrf.mxu3 }
 0x1a5   :  { %v3976_v5 = vmax.f32 %v898_v46, %v947_v20  ;;  %v669_v54 = vadd.f32 %v3750_v27, %v668_v2  ;;  %v816_v38 = vadd.f32 %v3750_v27, %v815_v6 }
 0x1a7   :  { %5279 = vst [vmem:[#allocation53_spill] sm:$0xff] %v3976_v5  ;;  %v996_v33 = vmax.f32 %v669_v54, 0.0  ;;  %v1045_v61 = vmax.f32 %v816_v38, 0.0 }
 0x1a8   :  { %v377_v4 = vpop.f32.mrf.mxu0  ;;  %v524_v60 = vpop.f32.mrf.mxu1 }
 0x1a9   :  { %v3980_v51 = vmax.f32 %v996_v33, %v1045_v61  ;;  %v378_v15 = vadd.f32 %v3750_v27, %v377_v4  ;;  %v525_v19 = vadd.f32 %v3750_v27, %v524_v60 }
 0x1ab   :  { %5280 = vst [vmem:[#allocation54_spill] sm:$0xff] %v3980_v51  ;;  %v899_v41 = vmax.f32 %v378_v15, 0.0  ;;  %v948_v16 = vmax.f32 %v525_v19, 0.0 }
 0x1ac   :  { %v671_v46 = vpop.f32.mrf.mxu2  ;;  %v818_v20 = vpop.f32.mrf.mxu3 }
 0x1ad   :  { %v3986_v2 = vmax.f32 %v899_v41, %v948_v16  ;;  %v672_v6 = vadd.f32 %v3750_v27, %v671_v46  ;;  %v819_v54 = vadd.f32 %v3750_v27, %v818_v20 }
 0x1af   :  { %5281 = vst [vmem:[#allocation55_spill] sm:$0xff] %v3986_v2  ;;  %v997_v38 = vmax.f32 %v672_v6, 0.0  ;;  %v1046_v33 = vmax.f32 %v819_v54, 0.0 }
 0x1b0   :  { %v380_v61 = vpop.f32.mrf.mxu0  ;;  %v527_v30 = vpop.f32.mrf.mxu1 }
 0x1b1   :  { %v3990_v4 = vmax.f32 %v997_v38, %v1046_v33  ;;  %v381_v60 = vadd.f32 %v3750_v27, %v380_v61  ;;  %v528_v9 = vadd.f32 %v3750_v27, %v527_v30 }
 0x1b3   :  { %5282 = vst [vmem:[#allocation56_spill] sm:$0xff] %v3990_v4  ;;  %v900_v19 = vmax.f32 %v381_v60, 0.0  ;;  %v949_v41 = vmax.f32 %v528_v9, 0.0 }
 0x1b4   :  { %v674_v16 = vpop.f32.mrf.mxu2  ;;  %v821_v51 = vpop.f32.mrf.mxu3 }
 0x1b5   :  { %v3996_v46 = vmax.f32 %v900_v19, %v949_v41  ;;  %v675_v20 = vadd.f32 %v3750_v27, %v674_v16  ;;  %v822_v6 = vadd.f32 %v3750_v27, %v821_v51 }
 0x1b7   :  { %5283 = vst [vmem:[#allocation57_spill] sm:$0xff] %v3996_v46  ;;  %v998_v54 = vmax.f32 %v675_v20, 0.0  ;;  %v1047_v38 = vmax.f32 %v822_v6, 0.0 }
 0x1b8   :  { %v383_v33 = vpop.f32.mrf.mxu0  ;;  %v530_v5 = vpop.f32.mrf.mxu1 }
 0x1b9   :  { %v4000_v61 = vmax.f32 %v998_v54, %v1047_v38  ;;  %v384_v30 = vadd.f32 %v3750_v27, %v383_v33  ;;  %v531_v15 = vadd.f32 %v3750_v27, %v530_v5 }
 0x1bb   :  { %5284 = vst [vmem:[#allocation58_spill] sm:$0xff] %v4000_v61  ;;  %v901_v60 = vmax.f32 %v384_v30, 0.0  ;;  %v950_v19 = vmax.f32 %v531_v15, 0.0 }
 0x1bc   :  { %v677_v41 = vpop.f32.mrf.mxu2  ;;  %v824_v4 = vpop.f32.mrf.mxu3 }
 0x1bd   :  { %v4006_v16 = vmax.f32 %v901_v60, %v950_v19  ;;  %v678_v51 = vadd.f32 %v3750_v27, %v677_v41  ;;  %v825_v20 = vadd.f32 %v3750_v27, %v824_v4 }
 0x1bf   :  { %5285 = vst [vmem:[#allocation59_spill] sm:$0xff] %v4006_v16  ;;  %v999_v6 = vmax.f32 %v678_v51, 0.0  ;;  %v1048_v54 = vmax.f32 %v825_v20, 0.0 }
 0x1c0   :  { %v386_v38 = vpop.f32.mrf.mxu0  ;;  %v533_v2 = vpop.f32.mrf.mxu1 }
 0x1c1   :  { %v4010_v33 = vmax.f32 %v999_v6, %v1048_v54  ;;  %v387_v5 = vadd.f32 %v3750_v27, %v386_v38  ;;  %v534_v9 = vadd.f32 %v3750_v27, %v533_v2 }
 0x1c3   :  { %5286 = vst [vmem:[#allocation60_spill] sm:$0xff] %v4010_v33  ;;  %v902_v30 = vmax.f32 %v387_v5, 0.0  ;;  %v951_v60 = vmax.f32 %v534_v9, 0.0 }
 0x1c4   :  { %v680_v19 = vpop.f32.mrf.mxu2  ;;  %v827_v22 = vpop.f32.mrf.mxu3 }
 0x1c5   :  { %v4016_v41 = vmax.f32 %v902_v30, %v951_v60  ;;  %v681_v4 = vadd.f32 %v3750_v27, %v680_v19  ;;  %v828_v51 = vadd.f32 %v3750_v27, %v827_v22 }
 0x1c7   :  { %5287 = vst [vmem:[#allocation61_spill] sm:$0xff] %v4016_v41  ;;  %v1000_v20 = vmax.f32 %v681_v4, 0.0  ;;  %v1049_v6 = vmax.f32 %v828_v51, 0.0 }
 0x1c8   :  { %v389_v54 = vpop.f32.mrf.mxu0  ;;  %v536_v61 = vpop.f32.mrf.mxu1 }
 0x1c9   :  { %v4020_v38 = vmax.f32 %v1000_v20, %v1049_v6  ;;  %v390_v2 = vadd.f32 %v3750_v27, %v389_v54  ;;  %v537_v15 = vadd.f32 %v3750_v27, %v536_v61 }
 0x1cb   :  { %5288 = vst [vmem:[#allocation62_spill] sm:$0xff] %v4020_v38  ;;  %v903_v5 = vmax.f32 %v390_v2, 0.0  ;;  %v952_v30 = vmax.f32 %v537_v15, 0.0 }
 0x1cc   :  { %v683_v60 = vpop.f32.mrf.mxu2  ;;  %v830_v46 = vpop.f32.mrf.mxu3 }
 0x1cd   :  { %v4026_v19 = vmax.f32 %v903_v5, %v952_v30  ;;  %v684_v22 = vadd.f32 %v3750_v27, %v683_v60  ;;  %v831_v4 = vadd.f32 %v3750_v27, %v830_v46 }
 0x1cf   :  { %5289 = vst [vmem:[#allocation63_spill] sm:$0xff] %v4026_v19  ;;  %v1001_v51 = vmax.f32 %v684_v22, 0.0  ;;  %v1050_v20 = vmax.f32 %v831_v4, 0.0 }
 0x1d0   :  { %v392_v6 = vpop.f32.mrf.mxu0  ;;  %v539_v56 = vpop.f32.mrf.mxu1 }
 0x1d1   :  { %v4030_v54 = vmax.f32 %v1001_v51, %v1050_v20  ;;  %v393_v61 = vadd.f32 %v3750_v27, %v392_v6  ;;  %v540_v9 = vadd.f32 %v3750_v27, %v539_v56 }
 0x1d3   :  { %5290 = vst [vmem:[#allocation64_spill] sm:$0xff] %v4030_v54  ;;  %v904_v2 = vmax.f32 %v393_v61, 0.0  ;;  %v953_v5 = vmax.f32 %v540_v9, 0.0 }
 0x1d4   :  { %v686_v30 = vpop.f32.mrf.mxu2  ;;  %v833_v47 = vpop.f32.mrf.mxu3 }
 0x1d5   :  { %v4036_v60 = vmax.f32 %v904_v2, %v953_v5  ;;  %v687_v46 = vadd.f32 %v3750_v27, %v686_v30  ;;  %v834_v22 = vadd.f32 %v3750_v27, %v833_v47 }
 0x1d7   :  { %5291 = vst [vmem:[#allocation65_spill] sm:$0xff] %v4036_v60  ;;  %v1002_v4 = vmax.f32 %v687_v46, 0.0  ;;  %v1051_v51 = vmax.f32 %v834_v22, 0.0 }
 0x1d8   :  { %v395_v20 = vpop.f32.mrf.mxu0  ;;  %v542_v33 = vpop.f32.mrf.mxu1 }
 0x1d9   :  { %v4040_v6 = vmax.f32 %v1002_v4, %v1051_v51  ;;  %v396_v56 = vadd.f32 %v3750_v27, %v395_v20  ;;  %v543_v15 = vadd.f32 %v3750_v27, %v542_v33 }
 0x1db   :  { %5292 = vst [vmem:[#allocation66_spill] sm:$0xff] %v4040_v6  ;;  %v905_v61 = vmax.f32 %v396_v56, 0.0  ;;  %v954_v2 = vmax.f32 %v543_v15, 0.0 }
 0x1dc   :  { %v689_v5 = vpop.f32.mrf.mxu2  ;;  %v836_v16 = vpop.f32.mrf.mxu3 }
 0x1dd   :  { %v4046_v30 = vmax.f32 %v905_v61, %v954_v2  ;;  %v690_v47 = vadd.f32 %v3750_v27, %v689_v5  ;;  %v837_v46 = vadd.f32 %v3750_v27, %v836_v16 }
 0x1df   :  { %5293 = vst [vmem:[#allocation67_spill] sm:$0xff] %v4046_v30  ;;  %v1003_v22 = vmax.f32 %v690_v47, 0.0  ;;  %v1052_v4 = vmax.f32 %v837_v46, 0.0 }
 0x1e0   :  { %v398_v51 = vpop.f32.mrf.mxu0  ;;  %v545_v25 = vpop.f32.mrf.mxu1 }
 0x1e1   :  { %v4050_v20 = vmax.f32 %v1003_v22, %v1052_v4  ;;  %v399_v33 = vadd.f32 %v3750_v27, %v398_v51  ;;  %v546_v9 = vadd.f32 %v3750_v27, %v545_v25 }
 0x1e3   :  { %5294 = vst [vmem:[#allocation68_spill] sm:$0xff] %v4050_v20  ;;  %v906_v56 = vmax.f32 %v399_v33, 0.0  ;;  %v955_v61 = vmax.f32 %v546_v9, 0.0 }
 0x1e4   :  { %v692_v2 = vpop.f32.mrf.mxu2  ;;  %v839_v11 = vpop.f32.mrf.mxu3 }
 0x1e5   :  { %v4056_v5 = vmax.f32 %v906_v56, %v955_v61  ;;  %v693_v16 = vadd.f32 %v3750_v27, %v692_v2  ;;  %v840_v47 = vadd.f32 %v3750_v27, %v839_v11 }
 0x1e7   :  { %5295 = vst [vmem:[#allocation69_spill] sm:$0xff] %v4056_v5  ;;  %v1004_v46 = vmax.f32 %v693_v16, 0.0  ;;  %v1053_v22 = vmax.f32 %v840_v47, 0.0  ;;  %v4144_v5 = vmov 0.0  }
 0x1e8   :  { %v401_v4 = vpop.f32.mrf.mxu0  ;;  %v548_v38 = vpop.f32.mrf.mxu1 }
 0x1e9   :  { %v4060_v51 = vmax.f32 %v1004_v46, %v1053_v22  ;;  %v402_v25 = vadd.f32 %v3750_v27, %v401_v4  ;;  %v549_v15 = vadd.f32 %v3750_v27, %v548_v38 }
 0x1eb   :  { %5296 = vst [vmem:[#allocation70_spill] sm:$0xff] %v4060_v51  ;;  %v907_v33 = vmax.f32 %v402_v25, 0.0  ;;  %v956_v56 = vmax.f32 %v549_v15, 0.0 }
 0x1ec   :  { %v695_v61 = vpop.f32.mrf.mxu2  ;;  %v842_v41 = vpop.f32.mrf.mxu3 }
 0x1ed   :  { %v696_v2 = vadd.f32 %v3750_v27, %v695_v61  ;;  %v843_v11 = vadd.f32 %v3750_v27, %v842_v41  ;;  %v4068_v16 = vmax.f32 %v907_v33, %v956_v56 }
 0x1ef   :  { %5297 = vst [vmem:[#allocation71_spill] sm:$0xff] %v4068_v16  ;;  %v1005_v47 = vmax.f32 %v696_v2, 0.0  ;;  %v1054_v46 = vmax.f32 %v843_v11, 0.0  ;;  %v4180_v16 = vmov 0.0  }
 0x1f0   :  { %v404_v22 = vpop.f32.mrf.mxu0  ;;  %v551_v53 = vpop.f32.mrf.mxu1 }
 0x1f1   :  { %v4070_v4 = vmax.f32 %v1005_v47, %v1054_v46  ;;  %v405_v38 = vadd.f32 %v3750_v27, %v404_v22  ;;  %v552_v9 = vadd.f32 %v3750_v27, %v551_v53 }
 0x1f3   :  { %5298 = vst [vmem:[#allocation72_spill] sm:$0xff] %v4070_v4  ;;  %v908_v25 = vmax.f32 %v405_v38, 0.0  ;;  %v957_v44 = vmax.f32 %v552_v9, 0.0  ;;  %v4178_v4 = vmov 0.0  }
 0x1f4   :  { %v698_v61 = vpop.f32.mrf.mxu2  ;;  %v845_v54 = vpop.f32.mrf.mxu3 }
 0x1f5   :  { %v699_v41 = vadd.f32 %v3750_v27, %v698_v61  ;;  %v846_v33 = vadd.f32 %v3750_v27, %v845_v54  ;;  %v4078_v56 = vmax.f32 %v908_v25, %v957_v44 }
 0x1f7   :  { %5299 = vst [vmem:[#allocation73_spill] sm:$0xff] %v4078_v56  ;;  %v1006_v2 = vmax.f32 %v699_v41, 0.0  ;;  %v1055_v11 = vmax.f32 %v846_v33, 0.0  ;;  %v4188_v56 = vmov 0.0  }
 0x1f8   :  { %v407_v47 = vpop.f32.mrf.mxu0  ;;  %v554_v46 = vpop.f32.mrf.mxu1 }
 0x1f9   :  { %v4080_v22 = vmax.f32 %v1006_v2, %v1055_v11  ;;  %v408_v53 = vadd.f32 %v3750_v27, %v407_v47  ;;  %v555_v15 = vadd.f32 %v3750_v27, %v554_v46 }
 0x1fb   :  { %5300 = vst [vmem:[#allocation74_spill] sm:$0xff] %v4080_v22  ;;  %v909_v38 = vmax.f32 %v408_v53, 0.0  ;;  %v958_v19 = vmax.f32 %v555_v15, 0.0  ;;  %v4186_v22 = vmov 0.0  }
 0x1fc   :  { %v701_v61 = vpop.f32.mrf.mxu2  ;;  %v848_v26 = vpop.f32.mrf.mxu3 }
 0x1fd   :  { %v702_v44 = vadd.f32 %v3750_v27, %v701_v61  ;;  %v849_v54 = vadd.f32 %v3750_v27, %v848_v26  ;;  %v4088_v25 = vmax.f32 %v909_v38, %v958_v19 }
 0x1ff   :  { %5301 = vst [vmem:[#allocation75_spill] sm:$0xff] %v4088_v25  ;;  %v1007_v41 = vmax.f32 %v702_v44, 0.0  ;;  %v1056_v33 = vmax.f32 %v849_v54, 0.0 }
 0x200   :  { %v410_v2 = vpop.f32.mrf.mxu0  ;;  %v557_v11 = vpop.f32.mrf.mxu1 }
 0x201   :  { %v4090_v47 = vmax.f32 %v1007_v41, %v1056_v33  ;;  %v411_v46 = vadd.f32 %v3750_v27, %v410_v2  ;;  %v558_v9 = vadd.f32 %v3750_v27, %v557_v11 }
 0x203   :  { %5302 = vst [vmem:[#allocation76_spill] sm:$0xff] %v4090_v47  ;;  %v910_v53 = vmax.f32 %v411_v46, 0.0  ;;  %v959_v14 = vmax.f32 %v558_v9, 0.0  ;;  %v4194_v47 = vmov 0.0  }
 0x204   :  { %v704_v61 = vpop.f32.mrf.mxu2  ;;  %v851_v6 = vpop.f32.mrf.mxu3 }
 0x205   :  { %v705_v26 = vadd.f32 %v3750_v27, %v704_v61  ;;  %v852_v19 = vadd.f32 %v3750_v27, %v851_v6  ;;  %v4098_v38 = vmax.f32 %v910_v53, %v959_v14 }
 0x207   :  { %5303 = vst [vmem:[#allocation77_spill] sm:$0xff] %v4098_v38  ;;  %v1008_v44 = vmax.f32 %v705_v26, 0.0  ;;  %v1057_v54 = vmax.f32 %v852_v19, 0.0 }
 0x208   :  { %v413_v41 = vpop.f32.mrf.mxu0  ;;  %v560_v33 = vpop.f32.mrf.mxu1 }
 0x209   :  { %v4100_v2 = vmax.f32 %v1008_v44, %v1057_v54  ;;  %v414_v11 = vadd.f32 %v3750_v27, %v413_v41  ;;  %v561_v15 = vadd.f32 %v3750_v27, %v560_v33 }
 0x20b   :  { %5304 = vst [vmem:[#allocation78_spill] sm:$0xff] %v4100_v2  ;;  %v911_v46 = vmax.f32 %v414_v11, 0.0  ;;  %v960_v60 = vmax.f32 %v561_v15, 0.0 }
 0x20c   :  { %v707_v61 = vpop.f32.mrf.mxu2  ;;  %v854_v3 = vpop.f32.mrf.mxu3 }
 0x20d   :  { %v708_v14 = vadd.f32 %v3750_v27, %v707_v61  ;;  %v855_v6 = vadd.f32 %v3750_v27, %v854_v3  ;;  %v4108_v53 = vmax.f32 %v911_v46, %v960_v60 }
 0x20f   :  { %5305 = vst [vmem:[#allocation79_spill] sm:$0xff] %v4108_v53  ;;  %v1009_v26 = vmax.f32 %v708_v14, 0.0  ;;  %v1058_v19 = vmax.f32 %v855_v6, 0.0 }
 0x210   :  { %v416_v44 = vpop.f32.mrf.mxu0  ;;  %v563_v54 = vpop.f32.mrf.mxu1 }
 0x211   :  { %v4110_v41 = vmax.f32 %v1009_v26, %v1058_v19  ;;  %v417_v33 = vadd.f32 %v3750_v27, %v416_v44  ;;  %v564_v9 = vadd.f32 %v3750_v27, %v563_v54 }
 0x213   :  { %5306 = vst [vmem:[#allocation80_spill] sm:$0xff] %v4110_v41  ;;  %v912_v11 = vmax.f32 %v417_v33, 0.0  ;;  %v961_v50 = vmax.f32 %v564_v9, 0.0 }
 0x214   :  { %v710_v61 = vpop.f32.mrf.mxu2  ;;  %v857_v20 = vpop.f32.mrf.mxu3 }
 0x215   :  { %v711_v3 = vadd.f32 %v3750_v27, %v710_v61  ;;  %v858_v60 = vadd.f32 %v3750_v27, %v857_v20  ;;  %v4118_v46 = vmax.f32 %v912_v11, %v961_v50 }
 0x217   :  { %5307 = vst [vmem:[#allocation81_spill] sm:$0xff] %v4118_v46  ;;  %v1010_v14 = vmax.f32 %v711_v3, 0.0  ;;  %v1059_v6 = vmax.f32 %v858_v60, 0.0 }
 0x218   :  { %v419_v26 = vpop.f32.mrf.mxu0  ;;  %v566_v19 = vpop.f32.mrf.mxu1 }
 0x219   :  { %v4120_v44 = vmax.f32 %v1010_v14, %v1059_v6  ;;  %v420_v54 = vadd.f32 %v3750_v27, %v419_v26  ;;  %v567_v15 = vadd.f32 %v3750_v27, %v566_v19 }
 0x21b   :  { %5308 = vst [vmem:[#allocation82_spill] sm:$0xff] %v4120_v44  ;;  %v913_v33 = vmax.f32 %v420_v54, 0.0  ;;  %v962_v30 = vmax.f32 %v567_v15, 0.0  ;;  %v4150_v15 = vmov 0.0  }
 0x21c   :  { %v713_v61 = vpop.f32.mrf.mxu2  ;;  %v860_v45 = vpop.f32.mrf.mxu3 }
 0x21d   :  { %v714_v50 = vadd.f32 %v3750_v27, %v713_v61  ;;  %v861_v20 = vadd.f32 %v3750_v27, %v860_v45  ;;  %v4128_v11 = vmax.f32 %v913_v33, %v962_v30 }
 0x21f   :  { %5309 = vst [vmem:[#allocation83_spill] sm:$0xff] %v4128_v11  ;;  %v1011_v3 = vmax.f32 %v714_v50, 0.0  ;;  %v1060_v60 = vmax.f32 %v861_v20, 0.0 }
 0x220   :  { %v422_v14 = vpop.f32.mrf.mxu0  ;;  %v569_v6 = vpop.f32.mrf.mxu1 }
 0x221   :  { %v4130_v26 = vmax.f32 %v1011_v3, %v1060_v60  ;;  %v423_v19 = vadd.f32 %v3750_v27, %v422_v14  ;;  %v570_v9 = vadd.f32 %v3750_v27, %v569_v6  ;;  %v4140_v14 = vmov 0.0  }
 0x222   :  { %v4142_v6 = vmov 0.0  }
 0x223   :  { %5310 = vst [vmem:[#allocation84_spill] sm:$0xff] %v4130_v26  ;;  %v914_v54 = vmax.f32 %v423_v19, 0.0  ;;  %v963_v29 = vmax.f32 %v570_v9, 0.0  ;;  %v4146_v19 = vmov 0.0   ;;  %v4148_v9 = vmov 0.0  }
 0x224   :  { %v716_v61 = vpop.f32.mrf.mxu2  ;;  %v863_v51 = vpop.f32.mrf.mxu3 }
 0x225   :  { %v717_v45 = vadd.f32 %v3750_v27, %v716_v61  ;;  %v864_v30 = vadd.f32 %v3750_v27, %v863_v51  ;;  %v1110_v33 = vmax.f32 %v914_v54, %v963_v29  ;;  %v4152_v61 = vmov 0.0  }
 0x226   :  { %v4154_v27 = vmov 0.0   ;;  %v4156_v29 = vmov 0.0   ;;  %v4158_v51 = vmov 0.0   ;;  %v4160_v54 = vmov 0.0  }
 0x227   :  { %v1012_v50 = vmax.f32 %v717_v45, 0.0  ;;  %v1061_v20 = vmax.f32 %v864_v30, 0.0  ;;  %v4162_v45 = vmov 0.0   ;;  %v4164_v30 = vmov 0.0  }
 0x229   :  { %v1159_v3 = vmax.f32 %v1012_v50, %v1061_v20  ;;  %v4168_v50 = vmov 0.0   ;;  %v4170_v20 = vmov 0.0  }
 0x22b   :  { %v4138_v60 = vmax.f32 %v1110_v33, %v1159_v3  ;;  %v4166_v33 = vmov 0.0   ;;  %v4172_v3 = vmov 0.0  }
 0x22d   :  { %5311 = vst [vmem:[#allocation85_spill] sm:$0xff] %v4138_v60 }
 0x22e LB: > { %v5312_v62 = vld [vmem:[#allocation6_spill] sm:$0xff]  ;;  %v5314_v58 = vld [vmem:[#allocation15_spill] sm:$0xff]  ;;  %v5315_v57 = vld [vmem:[#allocation9_spill] sm:$0xff]  ;;  %5329 = vst [vmem:[#allocation86_spill] sm:$0xff] %v2879_v14  ;;  %s2390_s18 = smul.u32 896, %s2991_s0  ;;  %vm1358_vm0 = vcmask 64512   ;;  %v2943_v3 = vphi %v4172_v3, %v5504_v3   ;;  %v2939_v20 = vphi %v4170_v20, %v5503_v20   ;;  %v2935_v50 = vphi %v4168_v50, %v5502_v50   ;;  %v2931_v33 = vphi %v4166_v33, %v5501_v33   ;;  %v2927_v30 = vphi %v4164_v30, %v5500_v30   ;;  %v2923_v45 = vphi %v4162_v45, %v5499_v45   ;;  %v2919_v54 = vphi %v4160_v54, %v5498_v54   ;;  %v2915_v51 = vphi %v4158_v51, %v5497_v51   ;;  %v2911_v29 = vphi %v4156_v29, %v5496_v29   ;;  %v2907_v27 = vphi %v4154_v27, %v5495_v27   ;;  %v2903_v61 = vphi %v4152_v61, %v5494_v61   ;;  %v2899_v15 = vphi %v4150_v15, %v5493_v15   ;;  %v2895_v9 = vphi %v4148_v9, %v5492_v9   ;;  %v2891_v19 = vphi %v4146_v19, %v5491_v19   ;;  %v2887_v5 = vphi %v4144_v5, %v5490_v5   ;;  %v2883_v6 = vphi %v4142_v6, %v5489_v6   ;;  %v2879_v14 = vphi %v4140_v14, %v5488_v14   ;;  %s2991_s0 = sphi %s4196_s0, %s1214_s0   ;;  %v2987_v47 = vphi %v4194_v47, %v5515_v47   ;;  %v2983_v49 = vphi %v4192_v49, %v5514_v49   ;;  %v2979_v23 = vphi %v4190_v23, %v5513_v23   ;;  %v2975_v56 = vphi %v4188_v56, %v5512_v56   ;;  %v2971_v22 = vphi %v4186_v22, %v5511_v22   ;;  %v2967_v52 = vphi %v4184_v52, %v5510_v52   ;;  %v2963_v21 = vphi %v4182_v21, %v5509_v21   ;;  %v2959_v16 = vphi %v4180_v16, %v5508_v16   ;;  %v2955_v4 = vphi %v4178_v4, %v5507_v4   ;;  %v2951_v10 = vphi %v4176_v10, %v5506_v10   ;;  %v2947_v31 = vphi %v4174_v31, %v5505_v31  }
 0x22f   : > { %v5316_v55 = vld [vmem:[#allocation12_spill] sm:$0xff]  ;;  %v5318_v43 = vld [vmem:[#allocation5_spill] sm:$0xff]  ;;  %v5321_v35 = vld [vmem:[#allocation14_spill] sm:$0xff]  ;;  %5330 = vst [vmem:[#allocation87_spill] sm:$0xff] %v2883_v6  ;;  %s2386_s22 = sshll.u32 %s2991_s0, 7  ;;  %s1214_s0 = sadd.s32 1, %s2991_s0  }
 0x230   : > { %v5317_v48 = vld [vmem:[#allocation20_spill] sm:$0xff]  ;;  %v5319_v40 = vld [vmem:[#allocation17_spill] sm:$0xff]  ;;  %v5322_v34 = vld [vmem:[#allocation11_spill] sm:$0xff]  ;;  %5331 = vst [vmem:[#allocation88_spill] sm:$0xff] %v2887_v5  ;;  %s4329_s21 = scalar_lea.vmem %s5139_s3, %s2390_s18  ;;  %s4512_s25 = scalar_lea.vmem %s5140_s4, %s2386_s22 }
 0x231   : > { %v5320_v37 = vld [vmem:[#allocation8_spill] sm:$0xff]  ;;  %v5323_v24 = vld [vmem:[#allocation19_spill] sm:$0xff]  ;;  %v5326_v13 = vld [vmem:[#allocation10_spill] sm:$0xff]  ;;  %5332 = vst [vmem:[#allocation89_spill] sm:$0xff] %v2891_v19  ;;  %1443 = vmatpush.msra.mxu0 %v5317_v48  ;;  %2439 = vmatpush.msra.mxu1 %v5317_v48  ;;  %p4818_p0 = scmp.ge.s32.totalorder %s1214_s0, 25  }
 0x232   : > { %v5324_v18 = vld [vmem:[#allocation7_spill] sm:$0xff]  ;;  %v5325_v17 = vld [vmem:[#allocation16_spill] sm:$0xff]  ;;  %v5327_v12 = vld [vmem:[#allocation13_spill] sm:$0xff]  ;;  %5333 = vst [vmem:[#allocation90_spill] sm:$0xff] %v2895_v9  ;;  %2440 = vmatpush.msra.mxu2 %v5317_v48  ;;  %s4979_s3 = smov (%p4818_p0), 0  }
 0x233   : > { %v5328_v0 = vld [vmem:[#allocation18_spill] sm:$0xff]  ;;  %5334 = vst [vmem:[#allocation91_spill] sm:$0xff] %v2899_v15  ;;  %1444 = vmatpush.msra.mxu0 %v5323_v24  ;;  %2441 = vmatpush.msra.mxu1 %v5323_v24  ;;  %v5347_v1 = vld [vmem:[#allocation51_spill] sm:$0xff]  ;;  %v5348_v59 = vld [vmem:[#allocation52_spill] sm:$0xff] }
 0x234   : > { %v5313_v60 = vld [vmem:[#allocation85_spill] sm:$0xff]  ;;  %5335 = vst [vmem:[#allocation92_spill] sm:$0xff] %v2903_v61  ;;  %2442 = vmatpush.msra.mxu2 %v5323_v24  ;;  %v5350_v11 = vld [vmem:[#allocation83_spill] sm:$0xff]  ;;  %v5351_v26 = vld [vmem:[#allocation84_spill] sm:$0xff] }
 0x235   : > { %5336 = vst [vmem:[#allocation93_spill] sm:$0xff] %v2907_v27  ;;  %2471 = vmatpush.msra.mxu3 %v5313_v60  ;;  %1445 = vmatpush.msra.mxu0 %v5328_v0  ;;  %v5353_v36 = vld [vmem:[#allocation49_spill] sm:$0xff]  ;;  %v5354_v39 = vld [vmem:[#allocation50_spill] sm:$0xff]  ;;  %v5359_v7 = vld [vmem:[#allocation47_spill] sm:$0xff] }
 0x236   : > { %5337 = vst [vmem:[#allocation94_spill] sm:$0xff] %v2911_v29  ;;  %2443 = vmatpush.msra.mxu1 %v5328_v0  ;;  %2444 = vmatpush.msra.mxu2 %v5328_v0  ;;  %v1246_v0 = vld [vmem:[%s4329_s21] sm:$0xff]  ;;  %v5355_v24 = vmax.f32 %v5353_v36, %v5354_v39  ;;  %v5357_v44 = vld [vmem:[#allocation82_spill] sm:$0xff]  ;;  %v5362_v53 = vld [vmem:[#allocation79_spill] sm:$0xff] }
 0x237   : > { %5338 = vst [vmem:[#allocation95_spill] sm:$0xff] %v2915_v51  ;;  %1446 = vmatpush.msra.mxu0 %v5319_v40  ;;  %v5356_v46 = vld [vmem:[#allocation81_spill] sm:$0xff]  ;;  %v5360_v32 = vld [vmem:[#allocation48_spill] sm:$0xff]  ;;  %v5366_v63 = vld [vmem:[#allocation46_spill] sm:$0xff] }
 0x238   : > { %5339 = vst [vmem:[#allocation96_spill] sm:$0xff] %v2919_v54  ;;  %2445 = vmatpush.msra.mxu1 %v5319_v40  ;;  %2446 = vmatpush.msra.mxu2 %v5319_v40  ;;  %v5363_v41 = vld [vmem:[#allocation80_spill] sm:$0xff]  ;;  %v5365_v28 = vld [vmem:[#allocation45_spill] sm:$0xff]  ;;  %v5369_v2 = vld [vmem:[#allocation78_spill] sm:$0xff] }
 0x239   : > { %5340 = vst [vmem:[#allocation97_spill] sm:$0xff] %v2923_v45  ;;  %1447 = vmatpush.msra.mxu0 %v5325_v17  ;;  %v5368_v38 = vld [vmem:[#allocation77_spill] sm:$0xff]  ;;  %v5371_v8 = vld [vmem:[#allocation43_spill] sm:$0xff]  ;;  %v5372_v42 = vld [vmem:[#allocation44_spill] sm:$0xff] }
 0x23a   : > { %5341 = vst [vmem:[#allocation98_spill] sm:$0xff] %v2927_v30  ;;  %2447 = vmatpush.msra.mxu1 %v5325_v17  ;;  %2448 = vmatpush.msra.mxu2 %v5325_v17  ;;  %v5349_v17 = vmax.f32 %v5347_v1, %v5348_v59  ;;  %v5373_v1 = vmax.f32 %v5371_v8, %v5372_v42  ;;  %v5374_v25 = vld [vmem:[#allocation75_spill] sm:$0xff]  ;;  %v1307_v40 = vld [vmem:[%s4329_s21 + $0x1e8] sm:$0xff]  ;;  %v1853_v59 = vld [vmem:[%s4512_s25 + $0x20] sm:$0xff] }
 0x23b   : > { %5342 = vst [vmem:[#allocation99_spill] sm:$0xff] %v2931_v33  ;;  %1448 = vmatpush.msra.mxu0 %v5314_v58  ;;  %v5383_v8 = vld [vmem:[#allocation39_spill] sm:$0xff]  ;;  %v1850_v6 = vld [vmem:[%s4512_s25 + $0x8] sm:$0xff]  ;;  %v1849_v5 = vld [vmem:[%s4512_s25] sm:$0xff] }
 0x23c   : > { %5343 = vst [vmem:[#allocation100_spill] sm:$0xff] %v2935_v50  ;;  %2449 = vmatpush.msra.mxu1 %v5314_v58  ;;  %2450 = vmatpush.msra.mxu2 %v5314_v58  ;;  %v1860_v39 = vld [vmem:[%s4512_s25 + $0x58] sm:$0xff]  ;;  %v1312_v42 = vld [vmem:[%s4329_s21 + $0x210] sm:$0xff]  ;;  %v1323_v58 = vld [vmem:[%s4329_s21 + $0x268] sm:$0xff] }
 0x23d   : > { %5344 = vst [vmem:[#allocation101_spill] sm:$0xff] %v2939_v20  ;;  %1449 = vmatpush.msra.mxu0 %v5321_v35  ;;  %v1316_v48 = vld [vmem:[%s4329_s21 + $0x230] sm:$0xff]  ;;  %v1335_v19 = vld [vmem:[%s4329_s21 + $0x2c8] sm:$0xff]  ;;  %v1305_v27 = vld [vmem:[%s4329_s21 + $0x1d8] sm:$0xff] }
 0x23e   : > { %5345 = vst [vmem:[#allocation102_spill] sm:$0xff] %v2943_v3  ;;  %2451 = vmatpush.msra.mxu1 %v5321_v35  ;;  %2452 = vmatpush.msra.mxu2 %v5321_v35  ;;  %v5393_v35 = vld [vmem:[#allocation70_spill] sm:$0xff]  ;;  %v1313_v30 = vld [vmem:[%s4329_s21 + $0x218] sm:$0xff] }
 0x23f   : > { %5346 = vst [vmem:[#allocation103_spill] sm:$0xff] %v2947_v31  ;;  %1450 = vmatpush.msra.mxu0 %v5327_v12  ;;  %v1332_v14 = vld [vmem:[%s4329_s21 + $0x2b0] sm:$0xff]  ;;  %v1347_v54 = vld [vmem:[%s4329_s21 + $0x328] sm:$0xff] }
 0x240   : > { %2453 = vmatpush.msra.mxu1 %v5327_v12  ;;  %2454 = vmatpush.msra.mxu2 %v5327_v12  ;;  %v1310_v12 = vld [vmem:[%s4329_s21 + $0x200] sm:$0xff]  ;;  %v1336_v9 = vld [vmem:[%s4329_s21 + $0x2d0] sm:$0xff]  ;;  %v1351_v50 = vld [vmem:[%s4329_s21 + $0x348] sm:$0xff] }
 0x241   : > { %1451 = vmatpush.msra.mxu0 %v5316_v55  ;;  %v1352_v20 = vld [vmem:[%s4329_s21 + $0x350] sm:$0xff] }
 0x242   : > { %2455 = vmatpush.msra.mxu1 %v5316_v55  ;;  %2456 = vmatpush.msra.mxu2 %v5316_v55  ;;  %v1356_v3 = vld [vmem:[%s4329_s21 + $0x370] sm:$0xff] }
 0x243   : > { %1452 = vmatpush.msra.mxu0 %v5322_v34 }
 0x244   : > { %2457 = vmatpush.msra.mxu1 %v5322_v34  ;;  %2458 = vmatpush.msra.mxu2 %v5322_v34  ;;  %v1250_v34 = vld [vmem:[%s4329_s21 + $0x20] sm:$0xff] }
 0x245   : > { %1453 = vmatpush.msra.mxu0 %v5326_v13 }
 0x246   : > { %2459 = vmatpush.msra.mxu1 %v5326_v13  ;;  %2460 = vmatpush.msra.mxu2 %v5326_v13  ;;  %v1334_v13 = vld [vmem:[%s4329_s21 + $0x2c0] sm:$0xff] }
 0x247   : > { %1454 = vmatpush.msra.mxu0 %v5315_v57 }
 0x248   : > { %2461 = vmatpush.msra.mxu1 %v5315_v57  ;;  %2462 = vmatpush.msra.mxu2 %v5315_v57  ;;  %v1285_v57 = vld [vmem:[%s4329_s21 + $0x138] sm:$0xff] }
 0x249   : > { %1455 = vmatpush.msra.mxu0 %v5320_v37 }
 0x24a   : > { %2463 = vmatpush.msra.mxu1 %v5320_v37  ;;  %2464 = vmatpush.msra.mxu2 %v5320_v37  ;;  %v1303_v37 = vld [vmem:[%s4329_s21 + $0x1c8] sm:$0xff] }
 0x24b   : > { %1456 = vmatpush.msra.mxu0 %v5324_v18 }
 0x24c   : > { %2465 = vmatpush.msra.mxu1 %v5324_v18  ;;  %2466 = vmatpush.msra.mxu2 %v5324_v18  ;;  %v5352_v18 = vmax.f32 %v5350_v11, %v5351_v26 }
 0x24d   : > { %1457 = vmatpush.msra.mxu0 %v5312_v62 }
 0x24e   : > { %2467 = vmatpush.msra.mxu1 %v5312_v62  ;;  %2468 = vmatpush.msra.mxu2 %v5312_v62  ;;  %v1327_v62 = vld [vmem:[%s4329_s21 + $0x288] sm:$0xff] }
 0x24f   : > { %1458 = vmatpush.msra.mxu0 %v5318_v43 }
 0x250   : > { %2469 = vmatpush.msra.mxu1 %v5318_v43  ;;  %2470 = vmatpush.msra.mxu2 %v5318_v43  ;;  %v1858_v43 = vld [vmem:[%s4512_s25 + $0x48] sm:$0xff] }
 0x251   : > { %1459 = vmatmul.f32.vlgmr.msra.gmra.mxu0 %v1246_v0  ;;  %1507 = vmatmul.f32.vlgmr.msra.gmra.mxu1 %v1310_v12  ;;  %v1314_v12 = vld [vmem:[%s4329_s21 + $0x220] sm:$0xff] }
 0x252   : > { %1525 = vmatmul.f32.vlgmr.msra.gmra.mxu2 %v1334_v13  ;;  %1761 = vmatpush.msrb.mxu0 %v5313_v60  ;;  %v5358_v13 = vmax.f32 %v5356_v46, %v5357_v44  ;;  %v1338_v0 = vld [vmem:[%s4329_s21 + $0x2e0] sm:$0xff]  ;;  %v1315_v46 = vld [vmem:[%s4329_s21 + $0x228] sm:$0xff]  ;;  %v1852_v60 = vld [vmem:[%s4512_s25 + $0x18] sm:$0xff] }
 0x253   : > { %1544 = vmatpush.msrb.mxu1 %v5349_v17  ;;  %1645 = vmatpush.msrb.mxu2 %v5352_v18  ;;  %v5361_v17 = vmax.f32 %v5359_v7, %v5360_v32  ;;  %v5364_v18 = vmax.f32 %v5362_v53, %v5363_v41  ;;  %v5392_v32 = vld [vmem:[#allocation69_spill] sm:$0xff] }
 0x254   : > { %v5394_v36 = vmax.f32 %v5392_v32, %v5393_v35  ;;  %v5404_v35 = vld [vmem:[#allocation65_spill] sm:$0xff] }
 0x255   : > { %1545 = vmatpush.msrb.mxu1 %v5355_v24  ;;  %1646 = vmatpush.msrb.mxu2 %v5358_v13  ;;  %v5367_v24 = vmax.f32 %v5365_v28, %v5366_v63  ;;  %v5370_v13 = vmax.f32 %v5368_v38, %v5369_v2  ;;  %v5380_v2 = vld [vmem:[#allocation73_spill] sm:$0xff] }
 0x256   : > { %v1861_v38 = vld [vmem:[%s4512_s25 + $0x60] sm:$0xff]  ;;  %v1319_v53 = vld [vmem:[%s4329_s21 + $0x248] sm:$0xff] }
 0x257   : > { %1546 = vmatpush.msrb.mxu1 %v5361_v17  ;;  %1647 = vmatpush.msrb.mxu2 %v5364_v18  ;;  %v5375_v17 = vld [vmem:[#allocation76_spill] sm:$0xff]  ;;  %v5378_v18 = vld [vmem:[#allocation42_spill] sm:$0xff] }
 0x258   : > { %v5376_v7 = vmax.f32 %v5374_v25, %v5375_v17  ;;  %v5386_v17 = vld [vmem:[#allocation71_spill] sm:$0xff]  ;;  %v1857_v44 = vld [vmem:[%s4512_s25 + $0x40] sm:$0xff] }
 0x259   : > { %1462 = vmatmul.f32.gmra.mxu0 %v1250_v34  ;;  %1547 = vmatpush.msrb.mxu1 %v5367_v24  ;;  %v5377_v34 = vld [vmem:[#allocation41_spill] sm:$0xff] }
 0x25a   : > { %1510 = vmatmul.f32.gmra.mxu1 %v1314_v12  ;;  %1528 = vmatmul.f32.gmra.mxu2 %v1338_v0  ;;  %v5379_v11 = vmax.f32 %v5377_v34, %v5378_v18  ;;  %v1254_v12 = vld [vmem:[%s4329_s21 + $0x40] sm:$0xff]  ;;  %v5390_v34 = vld [vmem:[#allocation38_spill] sm:$0xff] }
 0x25b   : > { %1648 = vmatpush.msrb.mxu2 %v5370_v13  ;;  %1548 = vmatpush.msrb.mxu1 %v5373_v1  ;;  %v1318_v0 = vld [vmem:[%s4329_s21 + $0x240] sm:$0xff]  ;;  %v5381_v13 = vld [vmem:[#allocation74_spill] sm:$0xff] }
 0x25c   : > { %v1342_v24 = vld [vmem:[%s4329_s21 + $0x300] sm:$0xff]  ;;  %v5382_v26 = vmax.f32 %v5380_v2, %v5381_v13  ;;  %v5395_v2 = vld [vmem:[#allocation35_spill] sm:$0xff] }
 0x25d   : > { %1649 = vmatpush.msrb.mxu2 %v5376_v7  ;;  %1549 = vmatpush.msrb.mxu1 %v5379_v11  ;;  %v5384_v1 = vld [vmem:[#allocation40_spill] sm:$0xff]  ;;  %v5389_v11 = vld [vmem:[#allocation37_spill] sm:$0xff] }
 0x25e   : > { %v5385_v28 = vmax.f32 %v5383_v8, %v5384_v1  ;;  %v5387_v7 = vld [vmem:[#allocation72_spill] sm:$0xff]  ;;  %v5391_v18 = vmax.f32 %v5389_v11, %v5390_v34  ;;  %v5398_v8 = vld [vmem:[#allocation67_spill] sm:$0xff]  ;;  %v5401_v1 = vld [vmem:[#allocation33_spill] sm:$0xff] }
 0x25f   : > { %1650 = vmatpush.msrb.mxu2 %v5382_v26  ;;  %v5388_v25 = vmax.f32 %v5386_v17, %v5387_v7  ;;  %v5396_v26 = vld [vmem:[#allocation36_spill] sm:$0xff]  ;;  %v5402_v17 = vld [vmem:[#allocation34_spill] sm:$0xff]  ;;  %v5407_v11 = vld [vmem:[#allocation31_spill] sm:$0xff] }
 0x260   : > { %1550 = vmatpush.msrb.mxu1 %v5385_v28  ;;  %v5397_v13 = vmax.f32 %v5395_v2, %v5396_v26  ;;  %v5399_v28 = vld [vmem:[#allocation68_spill] sm:$0xff]  ;;  %v5403_v7 = vmax.f32 %v5401_v1, %v5402_v17  ;;  %v5410_v2 = vld [vmem:[#allocation63_spill] sm:$0xff]  ;;  %v5416_v1 = vld [vmem:[#allocation61_spill] sm:$0xff] }
 0x261   : > { %1465 = vmatmul.f32.gmra.mxu0 %v1254_v12  ;;  %1651 = vmatpush.msrb.mxu2 %v5388_v25  ;;  %v5400_v12 = vmax.f32 %v5398_v8, %v5399_v28  ;;  %v1258_v25 = vld [vmem:[%s4329_s21 + $0x60] sm:$0xff]  ;;  %v5414_v28 = vld [vmem:[#allocation30_spill] sm:$0xff] }
 0x262   : > { %1513 = vmatmul.f32.gmra.mxu1 %v1318_v0  ;;  %1531 = vmatmul.f32.gmra.mxu2 %v1342_v24  ;;  %v1322_v0 = vld [vmem:[%s4329_s21 + $0x260] sm:$0xff]  ;;  %v5417_v17 = vld [vmem:[#allocation62_spill] sm:$0xff] }
 0x263   : > { %1551 = vmatpush.msrb.mxu1 %v5391_v18  ;;  %1652 = vmatpush.msrb.mxu2 %v5394_v36  ;;  %v1346_v24 = vld [vmem:[%s4329_s21 + $0x320] sm:$0xff]  ;;  %v5405_v36 = vld [vmem:[#allocation66_spill] sm:$0xff] }
 0x264   : > { %v5406_v32 = vmax.f32 %v5404_v35, %v5405_v36  ;;  %v5408_v34 = vld [vmem:[#allocation32_spill] sm:$0xff]  ;;  %v5413_v8 = vld [vmem:[#allocation29_spill] sm:$0xff] }
 0x265   : > { %1552 = vmatpush.msrb.mxu1 %v5397_v13  ;;  %1653 = vmatpush.msrb.mxu2 %v5400_v12  ;;  %v5409_v18 = vmax.f32 %v5407_v11, %v5408_v34  ;;  %v5411_v26 = vld [vmem:[#allocation64_spill] sm:$0xff]  ;;  %v5415_v12 = vmax.f32 %v5413_v8, %v5414_v28  ;;  %v5422_v11 = vld [vmem:[#allocation59_spill] sm:$0xff]  ;;  %v5428_v8 = vld [vmem:[#allocation57_spill] sm:$0xff] }
 0x266   : > { %v5412_v13 = vmax.f32 %v5410_v2, %v5411_v26  ;;  %v5420_v35 = vld [vmem:[#allocation28_spill] sm:$0xff]  ;;  %v5425_v2 = vld [vmem:[#allocation25_spill] sm:$0xff]  ;;  %v5426_v26 = vld [vmem:[#allocation26_spill] sm:$0xff] }
 0x267   : > { %1553 = vmatpush.msrb.mxu1 %v5403_v7  ;;  %1654 = vmatpush.msrb.mxu2 %v5406_v32  ;;  %v5418_v7 = vmax.f32 %v5416_v1, %v5417_v17  ;;  %v1350_v32 = vld [vmem:[%s4329_s21 + $0x340] sm:$0xff]  ;;  %v5429_v28 = vld [vmem:[#allocation58_spill] sm:$0xff]  ;;  %v5431_v1 = vld [vmem:[#allocation23_spill] sm:$0xff] }
 0x268   : > { %v5423_v34 = vld [vmem:[#allocation60_spill] sm:$0xff] }
 0x269   : > { %1468 = vmatmul.f32.gmra.mxu0 %v1258_v25  ;;  %1554 = vmatpush.msrb.mxu1 %v5409_v18  ;;  %v5419_v25 = vld [vmem:[#allocation27_spill] sm:$0xff]  ;;  %v5424_v18 = vmax.f32 %v5422_v11, %v5423_v34  ;;  %v5432_v17 = vld [vmem:[#allocation24_spill] sm:$0xff]  ;;  %v5437_v11 = vld [vmem:[#allocation21_spill] sm:$0xff] }
 0x26a   : > { %1516 = vmatmul.f32.gmra.mxu1 %v1322_v0  ;;  %1534 = vmatmul.f32.gmra.mxu2 %v1346_v24  ;;  %v5421_v36 = vmax.f32 %v5419_v25, %v5420_v35  ;;  %v1262_v0 = vld [vmem:[%s4329_s21 + $0x80] sm:$0xff]  ;;  %v5434_v25 = vld [vmem:[#allocation55_spill] sm:$0xff]  ;;  %v5438_v34 = vld [vmem:[#allocation22_spill] sm:$0xff] }
 0x26b   : > { %1655 = vmatpush.msrb.mxu2 %v5412_v13  ;;  %1555 = vmatpush.msrb.mxu1 %v5415_v12  ;;  %v1326_v24 = vld [vmem:[%s4329_s21 + $0x280] sm:$0xff]  ;;  %v5427_v13 = vmax.f32 %v5425_v2, %v5426_v26  ;;  %v5430_v12 = vmax.f32 %v5428_v8, %v5429_v28  ;;  %v5441_v2 = vld [vmem:[#allocation54_spill] sm:$0xff] }
 0x26c   : > { %v5435_v35 = vld [vmem:[#allocation56_spill] sm:$0xff]  ;;  %v1247_v28 = vld [vmem:[%s4329_s21 + $0x8] sm:$0xff] }
 0x26d   : > { %1656 = vmatpush.msrb.mxu2 %v5418_v7  ;;  %1556 = vmatpush.msrb.mxu1 %v5421_v36  ;;  %v5433_v7 = vmax.f32 %v5431_v1, %v5432_v17  ;;  %v5436_v36 = vmax.f32 %v5434_v25, %v5435_v35  ;;  %v1270_v8 = vld [vmem:[%s4329_s21 + $0xc0] sm:$0xff]  ;;  %v1251_v17 = vld [vmem:[%s4329_s21 + $0x28] sm:$0xff] }
 0x26e   : > { %v1274_v1 = vld [vmem:[%s4329_s21 + $0xe0] sm:$0xff]  ;;  %v1255_v35 = vld [vmem:[%s4329_s21 + $0x48] sm:$0xff] }
 0x26f   : > { %1657 = vmatpush.msrb.mxu2 %v5424_v18  ;;  %1557 = vmatpush.msrb.mxu1 %v5427_v13  ;;  %v5439_v18 = vmax.f32 %v5437_v11, %v5438_v34  ;;  %v1354_v13 = vld [vmem:[%s4329_s21 + $0x360] sm:$0xff]  ;;  %v1259_v34 = vld [vmem:[%s4329_s21 + $0x68] sm:$0xff] }
 0x270   : > { %v1278_v25 = vld [vmem:[%s4329_s21 + $0x100] sm:$0xff] }
 0x271   : > { %1471 = vmatmul.f32.gmra.mxu0 %v1262_v0  ;;  %1658 = vmatpush.msrb.mxu2 %v5430_v12  ;;  %v5440_v0 = vld [vmem:[#allocation53_spill] sm:$0xff]  ;;  %v1248_v12 = vld [vmem:[%s4329_s21 + $0x10] sm:$0xff] }
 0x272   : > { %1519 = vmatmul.f32.gmra.mxu1 %v1326_v24  ;;  %1537 = vmatmul.f32.gmra.mxu2 %v1350_v32  ;;  %v5442_v26 = vmax.f32 %v5440_v0, %v5441_v2  ;;  %v1266_v24 = vld [vmem:[%s4329_s21 + $0xa0] sm:$0xff]  ;;  %v1263_v2 = vld [vmem:[%s4329_s21 + $0x88] sm:$0xff] }
 0x273   : > { %1558 = vmatpush.msrb.mxu1 %v5433_v7  ;;  %1659 = vmatpush.msrb.mxu2 %v5436_v36  ;;  %v1330_v32 = vld [vmem:[%s4329_s21 + $0x2a0] sm:$0xff]  ;;  %v1252_v7 = vld [vmem:[%s4329_s21 + $0x30] sm:$0xff] }
 0x274   : > { %v1256_v36 = vld [vmem:[%s4329_s21 + $0x50] sm:$0xff]  ;;  %v1282_v11 = vld [vmem:[%s4329_s21 + $0x120] sm:$0xff] }
 0x275   : > { %1559 = vmatpush.msrb.mxu1 %v5439_v18  ;;  %1660 = vmatpush.msrb.mxu2 %v5442_v26  ;;  %v1260_v18 = vld [vmem:[%s4329_s21 + $0x70] sm:$0xff]  ;;  %v1286_v0 = vld [vmem:[%s4329_s21 + $0x140] sm:$0xff] }
 0x276   : > { %v1264_v26 = vld [vmem:[%s4329_s21 + $0x90] sm:$0xff] }
 0x279   : > { %1474 = vmatmul.f32.gmra.mxu0 %v1266_v24  ;;  %v1290_v24 = vld [vmem:[%s4329_s21 + $0x160] sm:$0xff] }
 0x27a   : > { %1522 = vmatmul.f32.gmra.mxu1 %v1330_v32  ;;  %1540 = vmatmul.f32.gmra.mxu2 %v1354_v13  ;;  %v1267_v32 = vld [vmem:[%s4329_s21 + $0xa8] sm:$0xff]  ;;  %v1268_v13 = vld [vmem:[%s4329_s21 + $0xb0] sm:$0xff] }
 0x281   : > { %1477 = vmatmul.f32.gmra.mxu0 %v1270_v8  ;;  %v1294_v8 = vld [vmem:[%s4329_s21 + $0x180] sm:$0xff] }
 0x282   : > { %1560 = vmatmul.f32.vlgmr.msrb.gmra.mxu1 %v1247_v28  ;;  %1661 = vmatmul.f32.vlgmr.msrb.gmra.mxu2 %v1248_v12  ;;  %v1271_v28 = vld [vmem:[%s4329_s21 + $0xc8] sm:$0xff]  ;;  %v1272_v12 = vld [vmem:[%s4329_s21 + $0xd0] sm:$0xff] }
 0x289   : > { %1480 = vmatmul.f32.gmra.mxu0 %v1274_v1  ;;  %v1298_v1 = vld [vmem:[%s4329_s21 + $0x1a0] sm:$0xff] }
 0x28a   : > { %1563 = vmatmul.f32.gmra.mxu1 %v1251_v17  ;;  %1664 = vmatmul.f32.gmra.mxu2 %v1252_v7  ;;  %v1275_v17 = vld [vmem:[%s4329_s21 + $0xe8] sm:$0xff]  ;;  %v1276_v7 = vld [vmem:[%s4329_s21 + $0xf0] sm:$0xff] }
 0x291   : > { %1483 = vmatmul.f32.gmra.mxu0 %v1278_v25  ;;  %v1302_v25 = vld [vmem:[%s4329_s21 + $0x1c0] sm:$0xff] }
 0x292   : > { %1566 = vmatmul.f32.gmra.mxu1 %v1255_v35  ;;  %1667 = vmatmul.f32.gmra.mxu2 %v1256_v36  ;;  %v1279_v35 = vld [vmem:[%s4329_s21 + $0x108] sm:$0xff]  ;;  %v1280_v36 = vld [vmem:[%s4329_s21 + $0x110] sm:$0xff] }
 0x299   : > { %1486 = vmatmul.f32.gmra.mxu0 %v1282_v11  ;;  %v1306_v11 = vld [vmem:[%s4329_s21 + $0x1e0] sm:$0xff] }
 0x29a   : > { %1569 = vmatmul.f32.gmra.mxu1 %v1259_v34  ;;  %1670 = vmatmul.f32.gmra.mxu2 %v1260_v18  ;;  %v1283_v34 = vld [vmem:[%s4329_s21 + $0x128] sm:$0xff]  ;;  %v1284_v18 = vld [vmem:[%s4329_s21 + $0x130] sm:$0xff] }
 0x2a1   : > { %1489 = vmatmul.f32.gmra.mxu0 %v1286_v0 }
 0x2a2   : > { %1572 = vmatmul.f32.gmra.mxu1 %v1263_v2  ;;  %1673 = vmatmul.f32.gmra.mxu2 %v1264_v26  ;;  %v1249_v2 = vld [vmem:[%s4329_s21 + $0x18] sm:$0xff]  ;;  %v1287_v26 = vld [vmem:[%s4329_s21 + $0x148] sm:$0xff] }
 0x2a9   : > { %1492 = vmatmul.f32.gmra.mxu0 %v1290_v24  ;;  %v1288_v24 = vld [vmem:[%s4329_s21 + $0x150] sm:$0xff] }
 0x2aa   : > { %1575 = vmatmul.f32.gmra.mxu1 %v1267_v32  ;;  %1676 = vmatmul.f32.gmra.mxu2 %v1268_v13 }
 0x2b1   : > { %1495 = vmatmul.f32.gmra.mxu0 %v1294_v8 }
 0x2b2   : > { %1578 = vmatmul.f32.gmra.mxu1 %v1271_v28  ;;  %1679 = vmatmul.f32.gmra.mxu2 %v1272_v12  ;;  %v1253_v28 = vld [vmem:[%s4329_s21 + $0x38] sm:$0xff]  ;;  %v1291_v12 = vld [vmem:[%s4329_s21 + $0x168] sm:$0xff] }
 0x2b9   : > { %1498 = vmatmul.f32.gmra.mxu0 %v1298_v1  ;;  %v1292_v1 = vld [vmem:[%s4329_s21 + $0x170] sm:$0xff] }
 0x2ba   : > { %1581 = vmatmul.f32.gmra.mxu1 %v1275_v17  ;;  %1682 = vmatmul.f32.gmra.mxu2 %v1276_v7 }
 0x2c1   : > { %1501 = vmatmul.f32.gmra.mxu0 %v1302_v25  ;;  %v1257_v25 = vld [vmem:[%s4329_s21 + $0x58] sm:$0xff] }
 0x2c2   : > { %1584 = vmatmul.f32.gmra.mxu1 %v1279_v35  ;;  %1685 = vmatmul.f32.gmra.mxu2 %v1280_v36  ;;  %v1295_v35 = vld [vmem:[%s4329_s21 + $0x188] sm:$0xff]  ;;  %v1296_v36 = vld [vmem:[%s4329_s21 + $0x190] sm:$0xff] }
 0x2c9   : > { %1504 = vmatmul.f32.gmra.mxu0 %v1306_v11 }
 0x2ca   : > { %1587 = vmatmul.f32.gmra.mxu1 %v1283_v34  ;;  %1688 = vmatmul.f32.gmra.mxu2 %v1284_v18  ;;  %v1321_v34 = vld [vmem:[%s4329_s21 + $0x258] sm:$0xff] }
 0x2cb   : > { %v1864_v18 = vld [vmem:[%s4512_s25 + $0x78] sm:$0xff]  ;;  %2376 = vmatmul.msk.f32.vlgmr.msra.gmra.mxu3 %vm1358_vm0, %v1321_v34 }
 0x2cc   : > { %1865 = vmatpush.msrb.mxu3 %v1864_v18  ;;  %v1265_v18 = vld [vmem:[%s4329_s21 + $0x98] sm:$0xff] }
 0x2ce   : > { %v4485_v0 = vpop.f32.mrf.mxu0  ;;  %v4491_v32 = vpop.f32.mrf.mxu1 }
 0x2d1   : > { %2358 = vmatmul.msk.f32.vlgmr.msrb.gmra.mxu0 %vm1358_vm0, %v1249_v2 }
 0x2d2   : > { %1590 = vmatmul.f32.gmra.mxu1 %v1287_v26  ;;  %1691 = vmatmul.f32.gmra.mxu2 %v1288_v24  ;;  %v1261_v26 = vld [vmem:[%s4329_s21 + $0x78] sm:$0xff]  ;;  %v1299_v24 = vld [vmem:[%s4329_s21 + $0x1a8] sm:$0xff] }
 0x2d5   : > { %v4493_v13 = vpop.f32.mrf.mxu2 }
 0x2d6   : > { %v4495_v8 = vpop.f32.mrf.mxu0 }
 0x2d7   : > { %v4502_v17 = vpop.f32.mrf.mxu1 }
 0x2d9   : > { %2359 = vmatmul.msk.f32.gmra.mxu0 %vm1358_vm0, %v1253_v28  ;;  %v1300_v28 = vld [vmem:[%s4329_s21 + $0x1b0] sm:$0xff] }
 0x2da   : > { %1593 = vmatmul.f32.gmra.mxu1 %v1291_v12  ;;  %1694 = vmatmul.f32.gmra.mxu2 %v1292_v1  ;;  %v1863_v1 = vld [vmem:[%s4512_s25 + $0x70] sm:$0xff] }
 0x2db   : > { %1866 = vmatpush.msrb.mxu3 %v1863_v1 }
 0x2dd   : > { %v4514_v11 = vpop.f32.mrf.mxu2 }
 0x2de   : > { %v4504_v7 = vpop.f32.mrf.mxu0 }
 0x2df   : > { %v4525_v12 = vpop.f32.mrf.mxu1 }
 0x2e1   : > { %2360 = vmatmul.msk.f32.gmra.mxu0 %vm1358_vm0, %v1257_v25  ;;  %v1325_v25 = vld [vmem:[%s4329_s21 + $0x278] sm:$0xff] }
 0x2e2   : > { %1596 = vmatmul.f32.gmra.mxu1 %v1295_v35  ;;  %1697 = vmatmul.f32.gmra.mxu2 %v1296_v36  ;;  %v1862_v36 = vld [vmem:[%s4512_s25 + $0x68] sm:$0xff] }
 0x2e3   : > { %2377 = vmatmul.msk.f32.gmra.mxu3 %vm1358_vm0, %v1325_v25 }
 0x2e4   : > { %1867 = vmatpush.msrb.mxu3 %v1862_v36  ;;  %v1269_v36 = vld [vmem:[%s4329_s21 + $0xb8] sm:$0xff] }
 0x2e5   : > { %v4530_v35 = vpop.f32.mrf.mxu2 }
 0x2e6   : > { %v4520_v2 = vpop.f32.mrf.mxu0  ;;  %1868 = vmatpush.msrb.mxu3 %v1861_v38  ;;  %v1308_v38 = vld [vmem:[%s4329_s21 + $0x1f0] sm:$0xff] }
 0x2e8   : > { %1869 = vmatpush.msrb.mxu3 %v1860_v39  ;;  %v1273_v39 = vld [vmem:[%s4329_s21 + $0xd8] sm:$0xff] }
 0x2e9   : > { %2361 = vmatmul.msk.f32.gmra.mxu0 %vm1358_vm0, %v1261_v26  ;;  %v1304_v26 = vld [vmem:[%s4329_s21 + $0x1d0] sm:$0xff] }
 0x2ea   : > { %1599 = vmatmul.f32.gmra.mxu1 %v1299_v24  ;;  %1700 = vmatmul.f32.gmra.mxu2 %v1300_v28  ;;  %v1329_v24 = vld [vmem:[%s4329_s21 + $0x298] sm:$0xff]  ;;  %v4542_v28 = vpop.f32.mrf.mxu1 }
 0x2eb   : > { %2378 = vmatmul.msk.f32.gmra.mxu3 %vm1358_vm0, %v1329_v24 }
 0x2ed   : > { %v4545_v1 = vpop.f32.mrf.mxu2 }
 0x2ee   : > { %v4534_v34 = vpop.f32.mrf.mxu0 }
 0x2f1   : > { %2362 = vmatmul.msk.f32.gmra.mxu0 %vm1358_vm0, %v1265_v18  ;;  %v1859_v18 = vld [vmem:[%s4512_s25 + $0x50] sm:$0xff] }
 0x2f2   : > { %1602 = vmatmul.f32.gmra.mxu1 %v1303_v37  ;;  %1703 = vmatmul.f32.gmra.mxu2 %v1304_v26  ;;  %v1333_v37 = vld [vmem:[%s4329_s21 + $0x2b8] sm:$0xff]  ;;  %v4557_v26 = vpop.f32.mrf.mxu1 }
 0x2f3   : > { %2379 = vmatmul.msk.f32.gmra.mxu3 %vm1358_vm0, %v1333_v37 }
 0x2f4   : > { %1870 = vmatpush.msrb.mxu3 %v1859_v18  ;;  %v1277_v18 = vld [vmem:[%s4329_s21 + $0xf8] sm:$0xff] }
 0x2f5   : > { %v4559_v24 = vpop.f32.mrf.mxu2 }
 0x2f6   : > { %v4547_v25 = vpop.f32.mrf.mxu0  ;;  %1871 = vmatpush.msrb.mxu3 %v1858_v43 }
 0x2f8   : > { %1872 = vmatpush.msrb.mxu3 %v1857_v44  ;;  %v1320_v44 = vld [vmem:[%s4329_s21 + $0x250] sm:$0xff] }
 0x2f9   : > { %2363 = vmatmul.msk.f32.gmra.mxu0 %vm1358_vm0, %v1269_v36  ;;  %v1311_v36 = vld [vmem:[%s4329_s21 + $0x208] sm:$0xff] }
 0x2fa   : > { %1605 = vmatmul.f32.gmra.mxu1 %v1307_v40  ;;  %1706 = vmatmul.f32.gmra.mxu2 %v1308_v38  ;;  %v1337_v40 = vld [vmem:[%s4329_s21 + $0x2d8] sm:$0xff]  ;;  %v4570_v38 = vpop.f32.mrf.mxu1 }
 0x2fb   : > { %2380 = vmatmul.msk.f32.gmra.mxu3 %vm1358_vm0, %v1337_v40  ;;  %v1281_v40 = vld [vmem:[%s4329_s21 + $0x118] sm:$0xff] }
 0x2fd   : > { %v4578_v43 = vpop.f32.mrf.mxu2 }
 0x2fe   : > { %v4561_v41 = vpop.f32.mrf.mxu0 }
 0x301   : > { %2364 = vmatmul.msk.f32.gmra.mxu0 %vm1358_vm0, %v1273_v39  ;;  %v1856_v39 = vld [vmem:[%s4512_s25 + $0x38] sm:$0xff] }
 0x302   : > { %1608 = vmatmul.f32.gmra.mxu1 %v1311_v36  ;;  %1709 = vmatmul.f32.gmra.mxu2 %v1312_v42  ;;  %v1341_v42 = vld [vmem:[%s4329_s21 + $0x2f8] sm:$0xff]  ;;  %v4589_v55 = vpop.f32.mrf.mxu1 }
 0x303   : > { %2381 = vmatmul.msk.f32.gmra.mxu3 %vm1358_vm0, %v1341_v42  ;;  %v1854_v42 = vld [vmem:[%s4512_s25 + $0x28] sm:$0xff] }
 0x304   : > { %1873 = vmatpush.msrb.mxu3 %v1856_v39 }
 0x306   : > { %v4572_v37 = vpop.f32.mrf.mxu0 }
 0x309   : > { %2365 = vmatmul.msk.f32.gmra.mxu0 %vm1358_vm0, %v1277_v18  ;;  %v1855_v18 = vld [vmem:[%s4512_s25 + $0x30] sm:$0xff] }
 0x30a   : > { %1611 = vmatmul.f32.gmra.mxu1 %v1315_v46  ;;  %1712 = vmatmul.f32.gmra.mxu2 %v1316_v48  ;;  %v1345_v48 = vld [vmem:[%s4329_s21 + $0x318] sm:$0xff]  ;;  %v4594_v46 = vpop.f32.mrf.mxu2 }
 0x30b   : > { %1874 = vmatpush.msrb.mxu3 %v1855_v18 }
 0x30c   : > { %2382 = vmatmul.msk.f32.gmra.mxu3 %vm1358_vm0, %v1345_v48 }
 0x30d   : > { %1875 = vmatpush.msrb.mxu3 %v1854_v42  ;;  %v1289_v42 = vld [vmem:[%s4329_s21 + $0x158] sm:$0xff] }
 0x30e   : > { %v4584_v36 = vpop.f32.mrf.mxu0 }
 0x30f   : > { %1876 = vmatpush.msrb.mxu3 %v1853_v59  ;;  %v1851_v59 = vld [vmem:[%s4512_s25 + $0x10] sm:$0xff] }
 0x311   : > { %2366 = vmatmul.msk.f32.gmra.mxu0 %vm1358_vm0, %v1281_v40  ;;  %v1324_v40 = vld [vmem:[%s4329_s21 + $0x270] sm:$0xff]  ;;  %1877 = vmatpush.msrb.mxu3 %v1852_v60  ;;  %v1293_v60 = vld [vmem:[%s4329_s21 + $0x178] sm:$0xff] }
 0x312   : > { %1614 = vmatmul.f32.gmra.mxu1 %v1319_v53  ;;  %1715 = vmatmul.f32.gmra.mxu2 %v1320_v44  ;;  %v1349_v53 = vld [vmem:[%s4329_s21 + $0x338] sm:$0xff]  ;;  %v4606_v44 = vpop.f32.mrf.mxu1  ;;  %v4609_v18 = vpop.f32.mrf.mxu2 }
 0x313   : > { %1878 = vmatpush.msrb.mxu3 %v1851_v59  ;;  %v1297_v59 = vld [vmem:[%s4329_s21 + $0x198] sm:$0xff] }
 0x314   : > { %2383 = vmatmul.msk.f32.gmra.mxu3 %vm1358_vm0, %v1349_v53 }
 0x315   : > { %1879 = vmatpush.msrb.mxu3 %v1850_v6 }
 0x316   : > { %v4598_v39 = vpop.f32.mrf.mxu0 }
 0x317   : > { %1880 = vmatpush.msrb.mxu3 %v1849_v5 }
 0x319   : > { %2367 = vmatmul.msk.f32.gmra.mxu0 %vm1358_vm0, %v1285_v57  ;;  %v1328_v57 = vld [vmem:[%s4329_s21 + $0x290] sm:$0xff] }
 0x31a   : > { %1617 = vmatmul.f32.gmra.mxu1 %v1323_v58  ;;  %1718 = vmatmul.f32.gmra.mxu2 %v1324_v40  ;;  %v1353_v58 = vld [vmem:[%s4329_s21 + $0x358] sm:$0xff]  ;;  %v4621_v40 = vpop.f32.mrf.mxu1  ;;  %v4623_v53 = vpop.f32.mrf.mxu2 }
 0x31c   : > { %2384 = vmatmul.msk.f32.gmra.mxu3 %vm1358_vm0, %v1353_v58 }
 0x31e   : > { %v4611_v48 = vpop.f32.mrf.mxu0 }
 0x321   : > { %2368 = vmatmul.msk.f32.gmra.mxu0 %vm1358_vm0, %v1289_v42  ;;  %v1331_v42 = vld [vmem:[%s4329_s21 + $0x2a8] sm:$0xff] }
 0x322   : > { %1620 = vmatmul.f32.gmra.mxu1 %v1327_v62  ;;  %1721 = vmatmul.f32.gmra.mxu2 %v1328_v57  ;;  %v1357_v62 = vld [vmem:[%s4329_s21 + $0x378] sm:$0xff]  ;;  %v4634_v57 = vpop.f32.mrf.mxu1  ;;  %v4642_v6 = vpop.f32.mrf.mxu2 }
 0x324   : > { %2385 = vmatmul.msk.f32.gmra.mxu3 %vm1358_vm0, %v1357_v62  ;;  %v1340_v62 = vld [vmem:[%s4329_s21 + $0x2f0] sm:$0xff] }
 0x326   : > { %v4625_v63 = vpop.f32.mrf.mxu0 }
 0x329   : > { %2369 = vmatmul.msk.f32.gmra.mxu0 %vm1358_vm0, %v1293_v60  ;;  %v1301_v60 = vld [vmem:[%s4329_s21 + $0x1b8] sm:$0xff] }
 0x32a   : > { %1623 = vmatmul.f32.gmra.mxu1 %v1331_v42  ;;  %1724 = vmatmul.f32.gmra.mxu2 %v1332_v14  ;;  %v1339_v42 = vld [vmem:[%s4329_s21 + $0x2e8] sm:$0xff]  ;;  %v1573_v15 = vpop.f32.mrf.mxu1  ;;  %v1674_v5 = vpop.f32.mrf.mxu2 }
 0x32e   : > { %v4636_v58 = vpop.f32.mrf.mxu0 }
 0x331   : > { %2370 = vmatmul.msk.f32.gmra.mxu0 %vm1358_vm0, %v1297_v59  ;;  %v1343_v59 = vld [vmem:[%s4329_s21 + $0x308] sm:$0xff] }
 0x332   : > { %1626 = vmatmul.f32.gmra.mxu1 %v1335_v19  ;;  %1727 = vmatmul.f32.gmra.mxu2 %v1336_v9  ;;  %v1344_v19 = vld [vmem:[%s4329_s21 + $0x310] sm:$0xff]  ;;  %v1576_v9 = vpop.f32.mrf.mxu1  ;;  %v1677_v29 = vpop.f32.mrf.mxu2 }
 0x336   : > { %v4645_v14 = vpop.f32.mrf.mxu0 }
 0x339   : > { %2371 = vmatmul.msk.f32.gmra.mxu0 %vm1358_vm0, %v1301_v60  ;;  %v1309_v60 = vld [vmem:[%s4329_s21 + $0x1f8] sm:$0xff] }
 0x33a   : > { %1629 = vmatmul.f32.gmra.mxu1 %v1339_v42  ;;  %1730 = vmatmul.f32.gmra.mxu2 %v1340_v62  ;;  %v1348_v42 = vld [vmem:[%s4329_s21 + $0x330] sm:$0xff]  ;;  %v1562_v62 = vadd.f32 %v4589_v55, %v4485_v0  ;;  %v1565_v55 = vadd.f32 %v4606_v44, %v4495_v8  ;;  %v1571_v44 = vadd.f32 %v4634_v57, %v4520_v2 }
 0x33e   : > { %v4651_v61 = vpop.f32.mrf.mxu0 }
 0x341   : > { %2372 = vmatmul.msk.f32.gmra.mxu0 %vm1358_vm0, %v1305_v27  ;;  %v1579_v27 = vpop.f32.mrf.mxu1 }
 0x342   : > { %1632 = vmatmul.f32.gmra.mxu1 %v1343_v59  ;;  %1733 = vmatmul.f32.gmra.mxu2 %v1344_v19  ;;  %v1663_v59 = vadd.f32 %v4594_v46, %v1562_v62  ;;  %v1680_v19 = vpop.f32.mrf.mxu2  ;;  %v1355_v62 = vld [vmem:[%s4329_s21 + $0x368] sm:$0xff] }
 0x346   : > { %v4657_v51 = vpop.f32.mrf.mxu0 }
 0x349   : > { %2373 = vmatmul.msk.f32.gmra.mxu0 %vm1358_vm0, %v1309_v60  ;;  %v1582_v0 = vpop.f32.mrf.mxu1  ;;  %v1317_v60 = vld [vmem:[%s4329_s21 + $0x238] sm:$0xff] }
 0x34a   : > { %1635 = vmatmul.f32.gmra.mxu1 %v1347_v54  ;;  %1736 = vmatmul.f32.gmra.mxu2 %v1348_v42  ;;  %v1666_v54 = vadd.f32 %v4609_v18, %v1565_v55  ;;  %v1683_v31 = vpop.f32.mrf.mxu2  ;;  %v1672_v18 = vadd.f32 %v4642_v6, %v1571_v44 }
 0x34e   : > { %v1763_v45 = vpop.f32.mrf.mxu0 }
 0x34f   : > { %v1764_v33 = vadd.f32 %v1763_v45, %v1663_v59  ;;  %v1568_v45 = vadd.f32 %v4621_v40, %v4504_v7 }
 0x351   : > { %2374 = vmatmul.msk.f32.gmra.mxu0 %vm1358_vm0, %v1313_v30  ;;  %1881 = vmatmul.f32.vlgmr.msrb.gmra.mxu3 %v1764_v33  ;;  %v1669_v30 = vadd.f32 %v4623_v53, %v1568_v45 }
 0x352   : > { %1638 = vmatmul.f32.gmra.mxu1 %v1351_v50  ;;  %1739 = vmatmul.f32.gmra.mxu2 %v1352_v20  ;;  %v1585_v20 = vpop.f32.mrf.mxu1  ;;  %v1686_v8 = vpop.f32.mrf.mxu2 }
 0x356   : > { %v1766_v46 = vpop.f32.mrf.mxu0 }
 0x357   : > { %v1767_v42 = vadd.f32 %v1766_v46, %v1666_v54 }
 0x359   : > { %2375 = vmatmul.msk.f32.gmra.mxu0 %vm1358_vm0, %v1317_v60  ;;  %1884 = vmatmul.f32.gmra.mxu3 %v1767_v42  ;;  %v4684_v60 = vpop.f32.mrf.mxu3  ;;  %v1577_v42 = vadd.f32 %v1576_v9, %v4547_v25 }
 0x35a   : > { %1641 = vmatmul.f32.gmra.mxu1 %v1355_v62  ;;  %1742 = vmatmul.f32.gmra.mxu2 %v1356_v3  ;;  %v1588_v54 = vpop.f32.mrf.mxu1  ;;  %v1574_v3 = vadd.f32 %v1573_v15, %v4534_v34  ;;  %v1689_v46 = vpop.f32.mrf.mxu2 }
 0x35b   : > { %v1678_v45 = vadd.f32 %v1677_v29, %v1577_v42  ;;  %v1589_v42 = vadd.f32 %v1588_v54, %v4598_v39 }
 0x35c   : > { %v1675_v7 = vadd.f32 %v1674_v5, %v1574_v3 }
 0x35e   : > { %v1769_v33 = vpop.f32.mrf.mxu0 }
 0x35f   : > { %v1770_v50 = vadd.f32 %v1769_v33, %v1669_v30  ;;  %v1580_v33 = vadd.f32 %v1579_v27, %v4561_v41 }
 0x361   : > { %1887 = vmatmul.f32.gmra.mxu3 %v1770_v50  ;;  %v1681_v15 = vadd.f32 %v1680_v19, %v1580_v33 }
 0x362   : > { %v1591_v62 = vpop.f32.mrf.mxu1  ;;  %v1692_v2 = vpop.f32.mrf.mxu2 }
 0x366   : > { %v1772_v59 = vpop.f32.mrf.mxu0  ;;  %v4687_v30 = vpop.f32.mrf.mxu3 }
 0x367   : > { %v1773_v55 = vadd.f32 %v1772_v59, %v1672_v18  ;;  %v1583_v18 = vadd.f32 %v1582_v0, %v4572_v37  ;;  %v1690_v0 = vadd.f32 %v1689_v46, %v1589_v42 }
 0x369   : > { %1890 = vmatmul.f32.gmra.mxu3 %v1773_v55  ;;  %v1684_v25 = vadd.f32 %v1683_v31, %v1583_v18 }
 0x36a   : > { %v1594_v34 = vpop.f32.mrf.mxu1  ;;  %v1695_v44 = vpop.f32.mrf.mxu2 }
 0x36e   : > { %v1775_v40 = vpop.f32.mrf.mxu0  ;;  %v4691_v59 = vpop.f32.mrf.mxu3 }
 0x36f   : > { %v1776_v53 = vadd.f32 %v1775_v40, %v1675_v7  ;;  %v1586_v7 = vadd.f32 %v1585_v20, %v4584_v36 }
 0x371   : > { %1893 = vmatmul.f32.gmra.mxu3 %v1776_v53  ;;  %v1687_v40 = vadd.f32 %v1686_v8, %v1586_v7 }
 0x372   : > { %v1597_v55 = vpop.f32.mrf.mxu1  ;;  %v1698_v3 = vpop.f32.mrf.mxu2 }
 0x376   : > { %v1778_v57 = vpop.f32.mrf.mxu0  ;;  %v4694_v27 = vpop.f32.mrf.mxu3 }
 0x377   : > { %v1779_v6 = vadd.f32 %v1778_v57, %v1678_v45 }
 0x379   : > { %1896 = vmatmul.f32.gmra.mxu3 %v1779_v6  ;;  %v1592_v6 = vadd.f32 %v1591_v62, %v4611_v48 }
 0x37a   : > { %v1600_v53 = vpop.f32.mrf.mxu1  ;;  %v1701_v37 = vpop.f32.mrf.mxu2 }
 0x37b   : > { %v1693_v36 = vadd.f32 %v1692_v2, %v1592_v6 }
 0x37e   : > { %v1781_v5 = vpop.f32.mrf.mxu0  ;;  %v4697_v57 = vpop.f32.mrf.mxu3 }
 0x37f   : > { %v1782_v50 = vadd.f32 %v1781_v5, %v1681_v15 }
 0x381   : > { %1899 = vmatmul.f32.gmra.mxu3 %v1782_v50  ;;  %v1595_v50 = vadd.f32 %v1594_v34, %v4625_v63 }
 0x382   : > { %v1603_v33 = vpop.f32.mrf.mxu1  ;;  %v1704_v20 = vpop.f32.mrf.mxu2 }
 0x383   : > { %v1696_v39 = vadd.f32 %v1695_v44, %v1595_v50 }
 0x386   : > { %v1784_v29 = vpop.f32.mrf.mxu0  ;;  %v4700_v5 = vpop.f32.mrf.mxu3 }
 0x387   : > { %v1785_v9 = vadd.f32 %v1784_v29, %v1684_v25  ;;  %v1598_v29 = vadd.f32 %v1597_v55, %v4636_v58 }
 0x389   : > { %1902 = vmatmul.f32.gmra.mxu3 %v1785_v9  ;;  %v1699_v48 = vadd.f32 %v1698_v3, %v1598_v29 }
 0x38a   : > { %v1606_v54 = vpop.f32.mrf.mxu1  ;;  %v1707_v25 = vpop.f32.mrf.mxu2 }
 0x38b   : > { %v1607_v6 = vadd.f32 %v1606_v54, %v4657_v51 }
 0x38e   : > { %v1787_v41 = vpop.f32.mrf.mxu0 }
 0x38f   : > { %v1788_v19 = vadd.f32 %v1787_v41, %v1687_v40  ;;  %v4704_v9 = vpop.f32.mrf.mxu3  ;;  %v1601_v41 = vadd.f32 %v1600_v53, %v4645_v14  ;;  %v1708_v14 = vadd.f32 %v1707_v25, %v1607_v6 }
 0x391   : > { %1905 = vmatmul.f32.gmra.mxu3 %v1788_v19  ;;  %v1702_v19 = vadd.f32 %v1701_v37, %v1601_v41 }
 0x392   : > { %v1609_v7 = vpop.f32.mrf.mxu1  ;;  %v1710_v40 = vpop.f32.mrf.mxu2 }
 0x393   : > { %v1610_v50 = vadd.f32 %v1609_v7, %v4491_v32 }
 0x396   : > { %v1790_v45 = vpop.f32.mrf.mxu0 }
 0x397   : > { %v1791_v31 = vadd.f32 %v1790_v45, %v1690_v0  ;;  %v4707_v34 = vpop.f32.mrf.mxu3  ;;  %v1604_v0 = vadd.f32 %v1603_v33, %v4651_v61  ;;  %v1711_v61 = vadd.f32 %v1710_v40, %v1610_v50 }
 0x399   : > { %1908 = vmatmul.f32.gmra.mxu3 %v1791_v31  ;;  %v1705_v55 = vadd.f32 %v1704_v20, %v1604_v0 }
 0x39a   : > { %v1612_v42 = vpop.f32.mrf.mxu1  ;;  %v1713_v58 = vpop.f32.mrf.mxu2 }
 0x39e   : > { %v1793_v8 = vpop.f32.mrf.mxu0 }
 0x39f   : > { %v1794_v15 = vadd.f32 %v1793_v8, %v1693_v36  ;;  %v4710_v31 = vpop.f32.mrf.mxu3 }
 0x3a1   : > { %1911 = vmatmul.f32.gmra.mxu3 %v1794_v15 }
 0x3a2   : > { %v1615_v36 = vpop.f32.mrf.mxu1  ;;  %v1716_v53 = vpop.f32.mrf.mxu2 }
 0x3a6   : > { %v1796_v46 = vpop.f32.mrf.mxu0 }
 0x3a7   : > { %v1797_v18 = vadd.f32 %v1796_v46, %v1696_v39  ;;  %v4713_v15 = vpop.f32.mrf.mxu3 }
 0x3a9   : > { %1914 = vmatmul.f32.gmra.mxu3 %v1797_v18  ;;  %v1613_v18 = vadd.f32 %v1612_v42, %v4502_v17 }
 0x3aa   : > { %v1618_v33 = vpop.f32.mrf.mxu1  ;;  %v1719_v46 = vpop.f32.mrf.mxu2 }
 0x3ab   : > { %v1714_v51 = vadd.f32 %v1713_v58, %v1613_v18  ;;  %v1619_v17 = vadd.f32 %v1618_v33, %v4542_v28 }
 0x3ae   : > { %v1799_v62 = vpop.f32.mrf.mxu0 }
 0x3af   : > { %v1800_v2 = vadd.f32 %v1799_v62, %v1699_v48 }
 0x3b1   : > { %1917 = vmatmul.f32.gmra.mxu3 %v1800_v2  ;;  %v1616_v2 = vadd.f32 %v1615_v36, %v4525_v12 }
 0x3b2   : > { %v1621_v62 = vpop.f32.mrf.mxu1  ;;  %v1722_v32 = vpop.f32.mrf.mxu2 }
 0x3b3   : > { %v1717_v7 = vadd.f32 %v1716_v53, %v1616_v2  ;;  %v1622_v58 = vadd.f32 %v1621_v62, %v4557_v26 }
 0x3b6   : > { %v1802_v63 = vpop.f32.mrf.mxu0 }
 0x3b7   : > { %v1803_v44 = vadd.f32 %v1802_v63, %v1702_v19  ;;  %v1818_v19 = vadd.f32 %v4684_v60, %v1717_v7 }
 0x3b9   : > { %1920 = vmatmul.f32.gmra.mxu3 %v1803_v44  ;;  %v1720_v44 = vadd.f32 %v1719_v46, %v1619_v17 }
 0x3ba   : > { %v1624_v63 = vpop.f32.mrf.mxu1 }
 0x3bb   : > { %v1821_v12 = vadd.f32 %v4687_v30, %v1720_v44  ;;  %v1625_v6 = vadd.f32 %v1624_v63, %v4570_v38  ;;  %v5453_v63 = vld [vmem:[#allocation103_spill] sm:$0xff] }
 0x3be   : > { %v1805_v45 = vpop.f32.mrf.mxu0 }
 0x3bf   : > { %v1806_v3 = vadd.f32 %v1805_v45, %v1705_v55  ;;  %v1723_v55 = vadd.f32 %v1722_v32, %v1622_v58 }
 0x3c1   : > { %1923 = vmatmul.f32.gmra.mxu3 %v1806_v3  ;;  %v1824_v3 = vadd.f32 %v4691_v59, %v1723_v55 }
 0x3c2   : > { %v1627_v45 = vpop.f32.mrf.mxu1 }
 0x3c6   : > { %v1808_v37 = vpop.f32.mrf.mxu0 }
 0x3c7   : > { %v1809_v8 = vadd.f32 %v1808_v37, %v1708_v14  ;;  %v1628_v37 = vadd.f32 %v1627_v45, %v4493_v13  ;;  %v5459_v45 = vld [vmem:[#allocation100_spill] sm:$0xff] }
 0x3c9   : > { %1926 = vmatmul.f32.gmra.mxu3 %v1809_v8 }
 0x3ce   : > { %v1811_v20 = vpop.f32.mrf.mxu0 }
 0x3cf   : > { %v1812_v39 = vadd.f32 %v1811_v20, %v1711_v61 }
 0x3d1   : > { %1929 = vmatmul.f32.gmra.mxu3 %v1812_v39 }
 0x3d4   : > { %v1882_v29 = vpop.f32.mrf.mxu3 }
 0x3d5   : > { %v4718_v47 = vadd.f32 %v2987_v47, %v1882_v29  }
 0x3d6   : > { %v1814_v54 = vpop.f32.mrf.mxu0 }
 0x3d7   : > { %v5443_v25 = vmov %v4718_v47  ;;  %v1815_v48 = vadd.f32 %v1814_v54, %v1714_v51  ;;  %v1725_v47 = vpop.f32.mrf.mxu2 }
 0x3d8   : > { %v1726_v36 = vadd.f32 %v1725_v47, %v1625_v6  ;;  %v5455_v47 = vld [vmem:[#allocation102_spill] sm:$0xff] }
 0x3d9   : > { %1932 = vmatmul.f32.gmra.mxu3 %v1815_v48  ;;  %v5463_v6 = vld [vmem:[#allocation98_spill] sm:$0xff] }
 0x3da   : > { %v1827_v26 = vadd.f32 %v4694_v27, %v1726_v36 }
 0x3dc   : > { %v1885_v40 = vpop.f32.mrf.mxu3 }
 0x3dd   : > { %v4722_v49 = vadd.f32 %v2983_v49, %v1885_v40  }
 0x3df   : > { %v5444_v41 = vmov %v4722_v49  ;;  %v1728_v28 = vpop.f32.mrf.mxu2 }
 0x3e0   : > { %v1729_v8 = vadd.f32 %v1728_v28, %v1628_v37  ;;  %v5461_v28 = vld [vmem:[#allocation99_spill] sm:$0xff] }
 0x3e1   : > { %1935 = vmatmul.f32.gmra.mxu3 %v1818_v19 }
 0x3e2   : > { %v1830_v38 = vadd.f32 %v4697_v57, %v1729_v8 }
 0x3e4   : > { %v1888_v42 = vpop.f32.mrf.mxu3 }
 0x3e5   : > { %v4727_v23 = vadd.f32 %v2979_v23, %v1888_v42  }
 0x3e7   : > { %v5445_v0 = vmov %v4727_v23  ;;  %v1630_v23 = vpop.f32.mrf.mxu1  ;;  %v1731_v30 = vpop.f32.mrf.mxu2 }
 0x3e8   : > { %v1631_v61 = vadd.f32 %v1630_v23, %v4514_v11  ;;  %v5467_v23 = vld [vmem:[#allocation96_spill] sm:$0xff] }
 0x3e9   : > { %1938 = vmatmul.f32.gmra.mxu3 %v1821_v12  ;;  %v5457_v12 = vld [vmem:[#allocation101_spill] sm:$0xff] }
 0x3ec   : > { %v1891_v49 = vpop.f32.mrf.mxu3 }
 0x3ed   : > { %v4732_v56 = vadd.f32 %v2975_v56, %v1891_v49  }
 0x3ef   : > { %v5446_v60 = vmov %v4732_v56  ;;  %v1633_v50 = vpop.f32.mrf.mxu1  ;;  %v1734_v33 = vpop.f32.mrf.mxu2 }
 0x3f0   : > { %v1634_v27 = vadd.f32 %v1633_v50, %v4530_v35 }
 0x3f1   : > { %1941 = vmatmul.f32.gmra.mxu3 %v1824_v3 }
 0x3f2   : > { %v1735_v18 = vadd.f32 %v1734_v33, %v1634_v27 }
 0x3f4   : > { %v1894_v14 = vpop.f32.mrf.mxu3  ;;  %v1836_v11 = vadd.f32 %v4704_v9, %v1735_v18 }
 0x3f5   : > { %v4737_v22 = vadd.f32 %v2971_v22, %v1894_v14   ;;  %v5465_v14 = vld [vmem:[#allocation97_spill] sm:$0xff] }
 0x3f7   : > { %v5447_v53 = vmov %v4737_v22  ;;  %v1732_v22 = vadd.f32 %v1731_v30, %v1631_v61  ;;  %v1636_v46 = vpop.f32.mrf.mxu1  ;;  %v5471_v61 = vld [vmem:[#allocation94_spill] sm:$0xff] }
 0x3f8   : > { %v1637_v51 = vadd.f32 %v1636_v46, %v4545_v1 }
 0x3f9   : > { %1944 = vmatmul.f32.gmra.mxu3 %v1827_v26  ;;  %v1833_v13 = vadd.f32 %v4700_v5, %v1732_v22  ;;  %v5473_v22 = vld [vmem:[#allocation93_spill] sm:$0xff] }
 0x3fc   : > { %v1897_v56 = vpop.f32.mrf.mxu3 }
 0x3fd   : > { %v4742_v52 = vadd.f32 %v2967_v52, %v1897_v56  }
 0x3ff   : > { %v5448_v59 = vmov %v4742_v52  ;;  %v1737_v52 = vpop.f32.mrf.mxu2  ;;  %v1639_v48 = vpop.f32.mrf.mxu1 }
 0x400   : > { %v1738_v54 = vadd.f32 %v1737_v52, %v1637_v51  ;;  %v1640_v2 = vadd.f32 %v1639_v48, %v4559_v24  ;;  %v5477_v48 = vld [vmem:[#allocation91_spill] sm:$0xff] }
 0x401   : > { %1947 = vmatmul.f32.gmra.mxu3 %v1830_v38  ;;  %v5469_v38 = vld [vmem:[#allocation95_spill] sm:$0xff] }
 0x402   : > { %v1839_v5 = vadd.f32 %v4707_v34, %v1738_v54 }
 0x404   : > { %v1900_v20 = vpop.f32.mrf.mxu3 }
 0x405   : > { %v4747_v21 = vadd.f32 %v2963_v21, %v1900_v20  }
 0x407   : > { %v5449_v39 = vmov %v4747_v21  ;;  %v1740_v35 = vpop.f32.mrf.mxu2 }
 0x408   : > { %v1741_v32 = vadd.f32 %v1740_v35, %v1640_v2 }
 0x409   : > { %1950 = vmatmul.f32.gmra.mxu3 %v1833_v13 }
 0x40a   : > { %v1842_v1 = vadd.f32 %v4710_v31, %v1741_v32 }
 0x40c   : > { %v1903_v29 = vpop.f32.mrf.mxu3 }
 0x40d   : > { %v4752_v16 = vadd.f32 %v2959_v16, %v1903_v29  }
 0x40f   : > { %v5450_v57 = vmov %v4752_v16  ;;  %v1642_v16 = vpop.f32.mrf.mxu1  ;;  %v1743_v9 = vpop.f32.mrf.mxu2 }
 0x410   : > { %v1643_v19 = vadd.f32 %v1642_v16, %v4578_v43  ;;  %v5485_v16 = vld [vmem:[#allocation87_spill] sm:$0xff] }
 0x411   : > { %1953 = vmatmul.f32.gmra.mxu3 %v1836_v11 }
 0x412   : > { %v1744_v17 = vadd.f32 %v1743_v9, %v1643_v19 }
 0x414   : > { %v1906_v21 = vpop.f32.mrf.mxu3  ;;  %v1845_v24 = vadd.f32 %v4713_v15, %v1744_v17 }
 0x415   : > { %v4757_v4 = vadd.f32 %v2955_v4, %v1906_v21   ;;  %v5479_v21 = vld [vmem:[#allocation90_spill] sm:$0xff] }
 0x417   : > { %v5451_v62 = vmov %v4757_v4 }
 0x419   : > { %1956 = vmatmul.f32.gmra.mxu3 %v1839_v5  ;;  %v5481_v5 = vld [vmem:[#allocation89_spill] sm:$0xff] }
 0x41c   : > { %v1909_v7 = vpop.f32.mrf.mxu3 }
 0x41d   : > { %v4762_v10 = vadd.f32 %v2951_v10, %v1909_v7   ;;  %v5483_v7 = vld [vmem:[#allocation88_spill] sm:$0xff] }
 0x41f   : > { %v5452_v40 = vmov %v4762_v10 }
 0x421   : > { %1959 = vmatmul.f32.gmra.mxu3 %v1842_v1 }
 0x424   : > { %v1912_v4 = vpop.f32.mrf.mxu3 }
 0x425   : > { %v4767_v31 = vadd.f32 %v5453_v63, %v1912_v4   ;;  %v5486_v63 = vld [vmem:[#allocation86_spill] sm:$0xff] }
 0x427   : > { %v5454_v34 = vmov %v4767_v31 }
 0x429   : > { %1962 = vmatmul.f32.gmra.mxu3 %v1845_v24 }
 0x42c   : > { %v1915_v44 = vpop.f32.mrf.mxu3 }
 0x42d   : > { %v4771_v3 = vadd.f32 %v5455_v47, %v1915_v44   ;;  %v5515_v47 = vmov %v5443_v25  ;;  %v2723_v44 = vld [vmem:[%s5141_s5] ss:$0 sm:$0xff] (%p4818_p0) }
 0x42e   :  { %v1998_v47 = vadd.f32 (%p4818_p0), %v2723_v44, %v5443_v25  ;;  %v2008_v25 = vadd.f32 (%p4818_p0), %v2723_v44, %v5454_v34 }
 0x42f   : > { %v5456_v42 = vmov %v4771_v3 }
 0x434   : > { %v1918_v10 = vpop.f32.mrf.mxu3 }
 0x435   : > { %v4774_v20 = vadd.f32 %v5457_v12, %v1918_v10   ;;  %v5506_v10 = vmov %v5452_v40  ;;  %v1999_v12 = vadd.f32 (%p4818_p0), %v2723_v44, %v5444_v41 }
 0x437   : > { %v5458_v58 = vmov %v4774_v20  ;;  %v5475_v20 = vld [vmem:[#allocation92_spill] sm:$0xff] }
 0x43c   : > { %v1921_v55 = vpop.f32.mrf.mxu3 }
 0x43d   : > { %v4777_v50 = vadd.f32 %v5459_v45, %v1921_v55   ;;  %v2000_v55 = vadd.f32 (%p4818_p0), %v2723_v44, %v5445_v0 }
 0x43f   : > { %v5460_v43 = vmov %v4777_v50 }
 0x444   : > { %v1924_v49 = vpop.f32.mrf.mxu3 }
 0x445   : > { %v4780_v33 = vadd.f32 %v5461_v28, %v1924_v49   ;;  %v5514_v49 = vmov %v5444_v41  ;;  %v2001_v28 = vadd.f32 (%p4818_p0), %v2723_v44, %v5446_v60  ;;  %v2009_v41 = vadd.f32 (%p4818_p0), %v2723_v44, %v5456_v42 }
 0x447   : > { %v5462_v36 = vmov %v4780_v33 }
 0x44c   : > { %v1927_v31 = vpop.f32.mrf.mxu3 }
 0x44d   : > { %v4783_v30 = vadd.f32 %v5463_v6, %v1927_v31   ;;  %v5505_v31 = vmov %v5454_v34 }
 0x44e   :  { %v2026_v31 = vmax.f32 (%p4818_p0), %v1998_v47, 0.0 }
 0x44f   : > { %v5464_v26 = vmov %v4783_v30 }
 0x454   : > { %v1930_v15 = vpop.f32.mrf.mxu3 }
 0x455   : > { %v4786_v45 = vadd.f32 %v5465_v14, %v1930_v15  }
 0x457   : > { %v5466_v37 = vmov %v4786_v45 }
 0x458   : > { %v5499_v45 = vmov %v5466_v37 }
 0x45c   : > { %v1933_v3 = vpop.f32.mrf.mxu3 }
 0x45d   : > { %v4789_v54 = vadd.f32 %v5467_v23, %v1933_v3   ;;  %v5504_v3 = vmov %v5456_v42  ;;  %v5513_v23 = vmov %v5445_v0  ;;  %v2010_v0 = vadd.f32 (%p4818_p0), %v2723_v44, %v5458_v58 }
 0x45f   : > { %v5468_v8 = vmov %v4789_v54 }
 0x464   : > { %v1936_v56 = vpop.f32.mrf.mxu3 }
 0x465   : > { %v4792_v51 = vadd.f32 %v5469_v38, %v1936_v56   ;;  %v5512_v56 = vmov %v5446_v60  ;;  %v2002_v38 = vadd.f32 (%p4818_p0), %v2723_v44, %v5447_v53  ;;  %v2011_v60 = vadd.f32 (%p4818_p0), %v2723_v44, %v5460_v43 }
 0x467   : > { %v5470_v13 = vmov %v4792_v51 }
 0x46c   : > { %v1939_v50 = vpop.f32.mrf.mxu3 }
 0x46d   : > { %v4795_v29 = vadd.f32 %v5471_v61, %v1939_v50   ;;  %v5502_v50 = vmov %v5460_v43 }
 0x46e   :  { %v2037_v50 = vmax.f32 (%p4818_p0), %v2009_v41, 0.0 }
 0x46f   : > { %v5472_v46 = vmov %v4795_v29 }
 0x474   : > { %v1942_v33 = vpop.f32.mrf.mxu3 }
 0x475   : > { %v4798_v27 = vadd.f32 %v5473_v22, %v1942_v33   ;;  %v5501_v33 = vmov %v5462_v36  ;;  %v5511_v22 = vmov %v5447_v53  ;;  %v2012_v53 = vadd.f32 (%p4818_p0), %v2723_v44, %v5462_v36 }
 0x477   : > { %v5474_v18 = vmov %v4798_v27  ;;  %v2040_v33 = vmax.f32 (%p4818_p0), %v2012_v53, 0.0 }
 0x478   :  { %v2018_v34 = vadd.f32 (%p4818_p0), %v2723_v44, %v5474_v18 }
 0x47c   : > { %v1945_v30 = vpop.f32.mrf.mxu3 }
 0x47d   : > { %v4801_v61 = vadd.f32 %v5475_v20, %v1945_v30   ;;  %v5500_v30 = vmov %v5464_v26  ;;  %v5503_v20 = vmov %v5458_v58 }
 0x47f   : > { %v5476_v11 = vmov %v4801_v61 }
 0x480   : > { %v5494_v61 = vmov %v5476_v11  ;;  %v2019_v42 = vadd.f32 (%p4818_p0), %v2723_v44, %v5476_v11 }
 0x481   :  { %v2038_v61 = vmax.f32 (%p4818_p0), %v2010_v0, 0.0 }
 0x484   : > { %v1948_v52 = vpop.f32.mrf.mxu3 }
 0x485   : > { %v4804_v15 = vadd.f32 %v5477_v48, %v1948_v52   ;;  %v5510_v52 = vmov %v5448_v59  ;;  %v2003_v48 = vadd.f32 (%p4818_p0), %v2723_v44, %v5448_v59  ;;  %v2013_v59 = vadd.f32 (%p4818_p0), %v2723_v44, %v5464_v26 }
 0x486   :  { %v2028_v26 = vmax.f32 (%p4818_p0), %v2000_v55, 0.0  ;;  %v2046_v52 = vmax.f32 (%p4818_p0), %v2018_v34, 0.0 }
 0x487   : > { %v5478_v35 = vmov %v4804_v15  ;;  %v2041_v22 = vmax.f32 (%p4818_p0), %v2013_v59, 0.0 }
 0x488   : > { %v5493_v15 = vmov %v5478_v35  ;;  %v2020_v10 = vadd.f32 (%p4818_p0), %v2723_v44, %v5478_v35  ;;  %v2047_v35 = vmax.f32 (%p4818_p0), %v2019_v42, 0.0 }
 0x489   :  { %v2029_v15 = vmax.f32 (%p4818_p0), %v2001_v28, 0.0 }
 0x48c   : > { %v1951_v54 = vpop.f32.mrf.mxu3 }
 0x48d   : > { %v4807_v9 = vadd.f32 %v5479_v21, %v1951_v54   ;;  %v5498_v54 = vmov %v5468_v8  ;;  %v5509_v21 = vmov %v5449_v39 }
 0x48e   :  { %v2048_v54 = vmax.f32 (%p4818_p0), %v2020_v10, 0.0 }
 0x48f   : > { %v5480_v2 = vmov %v4807_v9 }
 0x490   : > { %v5492_v9 = vmov %v5480_v2  ;;  %v2021_v58 = vadd.f32 (%p4818_p0), %v2723_v44, %v5480_v2  ;;  %v4953_v47 = vmax.f32 (%p4818_p0), %v2041_v22, %v2048_v54 }
 0x491   :  { %v2006_v9 = vadd.f32 (%p4818_p0), %v2723_v44, %v5451_v62 }
 0x492   :  { %v2049_v21 = vmax.f32 (%p4818_p0), %v2021_v58, 0.0 }
 0x494   : > { %v1954_v51 = vpop.f32.mrf.mxu3 }
 0x495   : > { %v4810_v19 = vadd.f32 %v5481_v5, %v1954_v51   ;;  %v5497_v51 = vmov %v5470_v13 }
 0x497   : > { %v5482_v32 = vmov %v4810_v19 }
 0x498   : > { %v5491_v19 = vmov %v5482_v32  ;;  %v2022_v45 = vadd.f32 (%p4818_p0), %v2723_v44, %v5482_v32 }
 0x499   :  { %v2007_v19 = vadd.f32 (%p4818_p0), %v2723_v44, %v5452_v40  ;;  %v2017_v40 = vadd.f32 (%p4818_p0), %v2723_v44, %v5472_v46 }
 0x49a   :  { %v2050_v2 = vmax.f32 (%p4818_p0), %v2022_v45, 0.0 }
 0x49b   :  { %v2035_v56 = vmax.f32 (%p4818_p0), %v2007_v19, 0.0  ;;  %v2045_v11 = vmax.f32 (%p4818_p0), %v2017_v40, 0.0 }
 0x49c   : > { %v1957_v29 = vpop.f32.mrf.mxu3 }
 0x49d   : > { %v4813_v5 = vadd.f32 %v5483_v7, %v1957_v29   ;;  %v5496_v29 = vmov %v5472_v46  ;;  %v2004_v7 = vadd.f32 (%p4818_p0), %v2723_v44, %v5449_v39  ;;  %v2014_v39 = vadd.f32 (%p4818_p0), %v2723_v44, %v5466_v37 }
 0x49e   :  { %v2031_v37 = vmax.f32 (%p4818_p0), %v2003_v48, 0.0  ;;  %v2039_v46 = vmax.f32 (%p4818_p0), %v2011_v60, 0.0  ;;  %v2993_v60 = vmov (%p4818_p0), 0.0  }
 0x49f   : > { %v5484_v1 = vmov %v4813_v5  ;;  %v2032_v3 = vmax.f32 (%p4818_p0), %v2004_v7, 0.0 }
 0x4a0   : > { %v5490_v5 = vmov %v5484_v1  ;;  %v2023_v43 = vadd.f32 (%p4818_p0), %v2723_v44, %v5484_v1 }
 0x4a2   :  { %v2051_v51 = vmax.f32 (%p4818_p0), %v2023_v43, 0.0 }
 0x4a4   : > { %v1960_v27 = vpop.f32.mrf.mxu3 }
 0x4a5   : > { %v1992_v17 = vadd.f32 %v5485_v16, %v1960_v27   ;;  %v5495_v27 = vmov %v5474_v18  ;;  %v5508_v16 = vmov %v5450_v57  ;;  %v2042_v18 = vmax.f32 (%p4818_p0), %v2014_v39, 0.0 }
 0x4a6   :  { %v4941_v27 = vmax.f32 (%p4818_p0), %v2028_v26, %v2035_v56 }
 0x4a7   : > { %v5489_v6 = vmov %v1992_v17  ;;  %v2024_v49 = vadd.f32 (%p4818_p0), %v2723_v44, %v1992_v17 }
 0x4a8   :  { %v2027_v6 = vmax.f32 (%p4818_p0), %v1999_v12, 0.0  ;;  %v4955_v12 = vmax.f32 (%p4818_p0), %v2042_v18, %v2049_v21 }
 0x4a9   :  { %v2052_v5 = vmax.f32 (%p4818_p0), %v2024_v49, 0.0 }
 0x4ab   :  { %1213 = sbr.rel (!%p4818_p0) target bundleno = 558 (0x22e), region = 90 }
 0x4ac   : > { %v1963_v4 = vpop.f32.mrf.mxu3 }
 0x4ad   : > { %v1993_v24 = vadd.f32 %v5486_v63, %v1963_v4   ;;  %v5507_v4 = vmov %v5451_v62  ;;  %v2005_v63 = vadd.f32 (%p4818_p0), %v2723_v44, %v5450_v57  ;;  %v2015_v57 = vadd.f32 (%p4818_p0), %v2723_v44, %v5468_v8 }
 0x4ae   :  { %v2016_v62 = vadd.f32 (%p4818_p0), %v2723_v44, %v5470_v13  ;;  %v2034_v8 = vmax.f32 (%p4818_p0), %v2006_v9, 0.0  ;;  %v2036_v13 = vmax.f32 (%p4818_p0), %v2008_v25, 0.0  ;;  %v4947_v4 = vmax.f32 (%p4818_p0), %v2031_v37, %v2038_v61 }
 0x4af   : > { %v5488_v14 = vmov %v1993_v24  ;;  %v2025_v36 = vadd.f32 (%p4818_p0), %v2723_v44, %v1993_v24  ;;  %v2033_v23 = vmax.f32 (%p4818_p0), %v2005_v63, 0.0  ;;  %v2043_v30 = vmax.f32 (%p4818_p0), %v2015_v57, 0.0 }
 0x4b0   :  { %v2030_v14 = vmax.f32 %v2002_v38, 0.0  ;;  %v2044_v20 = vmax.f32 %v2016_v62, 0.0  ;;  %v4939_v1 = vmax.f32 %v2027_v6, %v2034_v8  ;;  %v4943_v16 = vmax.f32 %v2029_v15, %v2036_v13 }
 0x4b1   :  { %v2053_v32 = vmax.f32 %v2025_v36, 0.0  ;;  %v4937_v29 = vmax.f32 %v2026_v31, %v2033_v23  ;;  %v4949_v24 = vmax.f32 %v2032_v3, %v2039_v46  ;;  %v4951_v44 = vmax.f32 %v2040_v33, %v2047_v35 }
 0x4b2   :  { %v4945_v17 = vmax.f32 %v2030_v14, %v2037_v50  ;;  %v4957_v55 = vmax.f32 %v2043_v30, %v2050_v2  ;;  %v4959_v28 = vmax.f32 %v2044_v20, %v2051_v51  ;;  %v4961_v38 = vmax.f32 %v2045_v11, %v2052_v5 }
 0x4b3   :  { %v4963_v48 = vmax.f32 %v2046_v52, %v2053_v32  ;;  %v2068_v7 = vmax.f32 %v4937_v29, %v4951_v44  ;;  %v2069_v63 = vmax.f32 %v4939_v1, %v4953_v47  ;;  %v2070_v9 = vmax.f32 %v4941_v27, %v4955_v12 }
 0x4b4   :  { %v2071_v19 = vmax.f32 %v4943_v16, %v4957_v55  ;;  %v2072_v25 = vmax.f32 %v4945_v17, %v4959_v28  ;;  %v2073_v41 = vmax.f32 %v4947_v4, %v4961_v38 }
 0x4b5   :  { %v2074_v0 = vmax.f32 %v4949_v24, %v4963_v48 }
 0x4b6 LB: > { %s2389_s4 = sshll.u32 %s2999_s3, 7  ;;  %s2387_s30 = sshll.u32 %s2999_s3, 1  ;;  %vm2085_vm1 = vcmask 457728   ;;  %s2999_s3 = sphi %s4979_s3, %s2080_s3   ;;  %v2995_v60 = vphi %v2993_v60, %v2994_v60  }
 0x4b7   : > { %2098 = vmatpush.msra.mxu0 %v2074_v0  ;;  %s4988_s29 = scalar_lea.vmem %s5143_s7, %s2389_s4  ;;  %s2083_s2 = scalar_lea.vmem %s5142_s6, %s2387_s30 }
 0x4b8   : > { %v2126_v53 = vld [vmem:[%s4988_s29 + $0x78] sm:$0xff]  ;;  %v2125_v59 = vld [vmem:[%s4988_s29 + $0x70] sm:$0xff]  ;;  %v2124_v39 = vld [vmem:[%s4988_s29 + $0x68] sm:$0xff]  ;;  %s2080_s3 = sadd.s32 1, %s2999_s3  }
 0x4b9   : > { %2099 = vmatpush.msra.mxu0 %v2073_v41  ;;  %2127 = vmatpush.msra.mxu1 %v2126_v53  ;;  %v2123_v57 = vld [vmem:[%s4988_s29 + $0x60] sm:$0xff]  ;;  %v2122_v40 = vld [vmem:[%s4988_s29 + $0x58] sm:$0xff]  ;;  %v2121_v34 = vld [vmem:[%s4988_s29 + $0x50] sm:$0xff]  ;;  %p2077_p1 = scmp.ge.s32.totalorder %s2080_s3, 25  }
 0x4ba   : > { %v2084_v62 = vld [vmem:[%s2083_s2] sm:$0x3]  ;;  %v2120_v42 = vld [vmem:[%s4988_s29 + $0x48] sm:$0xff]  ;;  %v2118_v58 = vld [vmem:[%s4988_s29 + $0x38] sm:$0xff]  ;;  %s3001_s5 = smov (%p2077_p1), [#allocation2]   ;;  %s2243_s14 = sshll.u32 (%p2077_p1), %s5149_s13, 4  ;;  %s2244_s14 = int_to_ptr.hbm [resolvable:$true] %s2243_s14 }
 0x4bb   : > { %2100 = vmatpush.msra.mxu0 %v2072_v25  ;;  %2128 = vmatpush.msra.mxu1 %v2125_v59  ;;  %v2119_v10 = vld [vmem:[%s4988_s29 + $0x40] sm:$0xff]  ;;  %v2117_v45 = vld [vmem:[%s4988_s29 + $0x30] sm:$0xff]  ;;  %v2116_v43 = vld [vmem:[%s4988_s29 + $0x28] sm:$0xff]  ;;  %s2241_s1 = sshll.u32 (%p2077_p1), %s3001_s5, 4  ;;  %s2242_s1 = int_to_ptr.vmem [resolvable:$true] %s2241_s1 }
 0x4bc   : > { %v2115_v49 = vld [vmem:[%s4988_s29 + $0x20] sm:$0xff]  ;;  %v2114_v36 = vld [vmem:[%s4988_s29 + $0x18] sm:$0xff]  ;;  %v2113_v31 = vld [vmem:[%s4988_s29 + $0x10] sm:$0xff] }
 0x4bd   : > { %2101 = vmatpush.msra.mxu0 %v2071_v19  ;;  %2129 = vmatpush.msra.mxu1 %v2124_v39  ;;  %v2112_v6 = vld [vmem:[%s4988_s29 + $0x8] sm:$0xff]  ;;  %v2111_v26 = vld [vmem:[%s4988_s29] sm:$0xff]  ;;  %v2169_v3 = vld [vmem:[%s5145_s9 + $0x78] sm:$0xff] (%p2077_p1) }
 0x4be   :  { %v2168_v23 = vld [vmem:[%s5145_s9 + $0x70] sm:$0xff] (%p2077_p1)  ;;  %v2167_v8 = vld [vmem:[%s5145_s9 + $0x68] sm:$0xff] (%p2077_p1)  ;;  %v2166_v56 = vld [vmem:[%s5145_s9 + $0x60] sm:$0xff] (%p2077_p1) }
 0x4bf   : > { %2102 = vmatpush.msra.mxu0 %v2070_v9  ;;  %2130 = vmatpush.msra.mxu1 %v2123_v57  ;;  %v2165_v13 = vld [vmem:[%s5145_s9 + $0x58] sm:$0xff] (%p2077_p1)  ;;  %v2209_v61 = vld [vmem:[%s5147_s11 + $0x70] sm:$0xff] (%p2077_p1)  ;;  %v2208_v33 = vld [vmem:[%s5147_s11 + $0x68] sm:$0xff] (%p2077_p1) }
 0x4c0   :  { %v2210_v50 = vld [vmem:[%s5147_s11 + $0x78] sm:$0xff] (%p2077_p1)  ;;  %v2164_v46 = vld [vmem:[%s5145_s9 + $0x50] sm:$0xff] (%p2077_p1)  ;;  %v2163_v22 = vld [vmem:[%s5145_s9 + $0x48] sm:$0xff] (%p2077_p1) }
 0x4c1   : > { %2103 = vmatpush.msra.mxu0 %v2069_v63  ;;  %2131 = vmatpush.msra.mxu1 %v2122_v40  ;;  %v2207_v18 = vld [vmem:[%s5147_s11 + $0x60] sm:$0xff] (%p2077_p1)  ;;  %v2206_v20 = vld [vmem:[%s5147_s11 + $0x58] sm:$0xff] (%p2077_p1)  ;;  %v2205_v52 = vld [vmem:[%s5147_s11 + $0x50] sm:$0xff] (%p2077_p1) }
 0x4c2   :  { %v2162_v30 = vld [vmem:[%s5145_s9 + $0x40] sm:$0xff] (%p2077_p1)  ;;  %v2161_v11 = vld [vmem:[%s5145_s9 + $0x38] sm:$0xff] (%p2077_p1)  ;;  %v2160_v35 = vld [vmem:[%s5145_s9 + $0x30] sm:$0xff] (%p2077_p1) }
 0x4c3   : > { %2104 = vmatpush.msra.mxu0 %v2068_v7  ;;  %2132 = vmatpush.msra.mxu1 %v2121_v34  ;;  %v2204_v54 = vld [vmem:[%s5147_s11 + $0x48] sm:$0xff] (%p2077_p1)  ;;  %v2203_v2 = vld [vmem:[%s5147_s11 + $0x40] sm:$0xff] (%p2077_p1)  ;;  %v2202_v32 = vld [vmem:[%s5147_s11 + $0x38] sm:$0xff] (%p2077_p1) }
 0x4c4   : > { %2388 = vmatmul.msk.f32.vlgmr.msra.gmra.mxu0 %vm2085_vm1, %v2084_v62  ;;  %v2159_v21 = vld [vmem:[%s5145_s9 + $0x28] sm:$0xff] (%p2077_p1)  ;;  %v2158_v51 = vld [vmem:[%s5145_s9 + $0x20] sm:$0xff] (%p2077_p1)  ;;  %v2157_v29 = vld [vmem:[%s5145_s9 + $0x18] sm:$0xff] (%p2077_p1) }
 0x4c5   : > { %2133 = vmatpush.msra.mxu1 %v2120_v42  ;;  %2174 = vmatpush.msra.mxu0 (%p2077_p1), %v2169_v3  ;;  %v2724_v5 = vld [vmem:[%s5144_s8] ss:$0 sm:$0xff] (%p2077_p1)  ;;  %v2201_v1 = vld [vmem:[%s5147_s11 + $0x30] sm:$0xff] (%p2077_p1)  ;;  %v2200_v17 = vld [vmem:[%s5147_s11 + $0x28] sm:$0xff] (%p2077_p1) }
 0x4c6   :  { %v2156_v27 = vld [vmem:[%s5145_s9 + $0x10] sm:$0xff] (%p2077_p1)  ;;  %v2155_v4 = vld [vmem:[%s5145_s9 + $0x8] sm:$0xff] (%p2077_p1)  ;;  %v2199_v24 = vld [vmem:[%s5147_s11 + $0x20] sm:$0xff] (%p2077_p1) }
 0x4c7   : > { %2134 = vmatpush.msra.mxu1 %v2119_v10  ;;  %2175 = vmatpush.msra.mxu0 (%p2077_p1), %v2168_v23  ;;  %v2154_v44 = vld [vmem:[%s5145_s9] sm:$0xff] (%p2077_p1)  ;;  %v2198_v12 = vld [vmem:[%s5147_s11 + $0x18] sm:$0xff] (%p2077_p1)  ;;  %v2197_v55 = vld [vmem:[%s5147_s11 + $0x10] sm:$0xff] (%p2077_p1) }
 0x4c8   :  { %v2196_v28 = vld [vmem:[%s5147_s11 + $0x8] sm:$0xff] (%p2077_p1)  ;;  %v2195_v38 = vld [vmem:[%s5147_s11] sm:$0xff] (%p2077_p1) }
 0x4c9   : > { %2135 = vmatpush.msra.mxu1 %v2118_v58  ;;  %2176 = vmatpush.msra.mxu0 (%p2077_p1), %v2167_v8  ;;  %v2725_v48 = vld [vmem:[%s5146_s10] ss:$0 sm:$0xff] (%p2077_p1) }
 0x4ca   :  { %v2726_v19 = vld [vmem:[%s5148_s12] ss:$0 sm:$0xff] (%p2077_p1) }
 0x4cb   : > { %2136 = vmatpush.msra.mxu1 %v2117_v45  ;;  %2177 = vmatpush.msra.mxu0 (%p2077_p1), %v2166_v56 }
 0x4cd   : > { %2137 = vmatpush.msra.mxu1 %v2116_v43  ;;  %2178 = vmatpush.msra.mxu0 (%p2077_p1), %v2165_v13 }
 0x4cf   : > { %2138 = vmatpush.msra.mxu1 %v2115_v49  ;;  %2179 = vmatpush.msra.mxu0 (%p2077_p1), %v2164_v46 }
 0x4d1   : > { %2139 = vmatpush.msra.mxu1 %v2114_v36  ;;  %2180 = vmatpush.msra.mxu0 (%p2077_p1), %v2163_v22 }
 0x4d3   : > { %2140 = vmatpush.msra.mxu1 %v2113_v31  ;;  %2181 = vmatpush.msra.mxu0 (%p2077_p1), %v2162_v30 }
 0x4d5   : > { %2141 = vmatpush.msra.mxu1 %v2112_v6  ;;  %2182 = vmatpush.msra.mxu0 (%p2077_p1), %v2161_v11 }
 0x4d7   : > { %2142 = vmatpush.msra.mxu1 %v2111_v26  ;;  %2183 = vmatpush.msra.mxu0 (%p2077_p1), %v2160_v35 }
 0x4d9   :  { %2184 = vmatpush.msra.mxu0 (%p2077_p1), %v2159_v21 }
 0x4db   :  { %2185 = vmatpush.msra.mxu0 (%p2077_p1), %v2158_v51 }
 0x4dd   :  { %2186 = vmatpush.msra.mxu0 (%p2077_p1), %v2157_v29 }
 0x4df   :  { %2187 = vmatpush.msra.mxu0 (%p2077_p1), %v2156_v27 }
 0x4e1   :  { %2188 = vmatpush.msra.mxu0 (%p2077_p1), %v2155_v4 }
 0x4e3   :  { %2189 = vmatpush.msra.mxu0 (%p2077_p1), %v2154_v44 }
 0x541   : > { %v2106_v15 = vpop.f32.mrf.mxu0 }
 0x542   : > { %2143 = vmatmul.f32.vlgmr.msra.gmra.mxu1 %v2106_v15 }
 0x543   :  { %2215 = vmatpush.msra.mxu1 (%p2077_p1), %v2210_v50 }
 0x545   :  { %2216 = vmatpush.msra.mxu1 (%p2077_p1), %v2209_v61 }
 0x547   :  { %2217 = vmatpush.msra.mxu1 (%p2077_p1), %v2208_v33 }
 0x549   :  { %2218 = vmatpush.msra.mxu1 (%p2077_p1), %v2207_v18 }
 0x54b   :  { %2219 = vmatpush.msra.mxu1 (%p2077_p1), %v2206_v20 }
 0x54d   :  { %2220 = vmatpush.msra.mxu1 (%p2077_p1), %v2205_v52 }
 0x54f   :  { %2221 = vmatpush.msra.mxu1 (%p2077_p1), %v2204_v54 }
 0x551   :  { %2222 = vmatpush.msra.mxu1 (%p2077_p1), %v2203_v2 }
 0x553   :  { %2223 = vmatpush.msra.mxu1 (%p2077_p1), %v2202_v32 }
 0x555   :  { %2224 = vmatpush.msra.mxu1 (%p2077_p1), %v2201_v1 }
 0x557   :  { %2225 = vmatpush.msra.mxu1 (%p2077_p1), %v2200_v17 }
 0x559   :  { %2226 = vmatpush.msra.mxu1 (%p2077_p1), %v2199_v24 }
 0x55b   :  { %2227 = vmatpush.msra.mxu1 (%p2077_p1), %v2198_v12 }
 0x55d   :  { %2228 = vmatpush.msra.mxu1 (%p2077_p1), %v2197_v55 }
 0x55f   :  { %2229 = vmatpush.msra.mxu1 (%p2077_p1), %v2196_v28 }
 0x561   :  { %2230 = vmatpush.msra.mxu1 (%p2077_p1), %v2195_v38 }
 0x5be   :  { %2079 = sbr.rel (!%p2077_p1) target bundleno = 1206 (0x4b6), region = 101 }
 0x5bf   : > { %v2144_v14 = vpop.f32.mrf.mxu1 }
 0x5c0   : > { %v2147_v37 = vadd.f32 %v2995_v60, %v2144_v14  }
 0x5c2   : > { %v2994_v60 = vmov %v2147_v37   ;;  %v2152_v16 = vadd.f32 (%p2077_p1), %v2724_v5, %v2147_v37 }
 0x5c4   :  { %v2153_v47 = vmax.f32 %v2152_v16, 0.0 }
 0x5c6   :  { %2190 = vmatmul.f32.vlgmr.msra.gmra.mxu0 %v2153_v47 }
 0x643   :  { %v2191_v7 = vpop.f32.mrf.mxu0 }
 0x644   :  { %v2192_v63 = vadd.f32 %v2725_v48, %v2191_v7 }
 0x646   :  { %v2194_v9 = vmax.f32 %v2192_v63, 0.0 }
 0x648   :  { %2231 = vmatmul.f32.vlgmr.msra.gmra.mxu1 %v2194_v9 }
 0x6c5   :  { %v2232_v25 = vpop.f32.mrf.mxu1 }
 0x6c6   :  { %v2233_v41 = vadd.f32 %v2726_v19, %v2232_v25 }
 0x6c8   :  { %2235 = vst [vmem:[#allocation2] sm:$0x3] %v2233_v41 }
 0x6c9   :  { %2246 = dma.vmem_to_hbm [thread:$0]  %s2242_s1, 32, %s2244_s14, [#allocation3]  }
 0x6ca   :  { %2875 = dma.done.wait [#allocation3], 32  }
 0x6cb   :  { %2876 = vsyncadd [#allocation3], 4294967264 }
 0x6cc   :  { %2251 = vsyncpa [#allocation3], 1 }

</bundles_post_ra>
